<compile_context>
chip_gen: v7x
topology: tpu7x:2x2x1
jax: 0.10.0
libtpu: 0.0.40
codegen_flags: <defaults>
</compile_context>

<pallas_src>
import functools

import jax
import jax.numpy as jnp
import numpy as np
from jax import lax
from jax.experimental import pallas as pl
from jax.experimental.pallas import tpu as pltpu


def _round_up(x, m):
    return (x + m - 1) // m * m


# ----------------------------- Pallas kernel --------------------------------
def _make_kernel(*, TH, Wp, extra=8):
    padn = (TH + 2) * Wp          # rows of the per-tile padded/flattened layout
    outn = TH * Wp                # rows of the per-tile output (junk-column) layout

    def kernel(x_ref, mask_ref, w1_ref, b1_ref, w2_ref, b2_ref, w3_ref, b3_ref,
               o_ref, h1_ref):
        t = pl.program_id(1)
        cin = x_ref.shape[3]
        pp = w1_ref.shape[1]
        coutp = w3_ref.shape[1]

        # Row-tile of the padded image (incl. 1-row halo top/bottom), flattened so
        # the 3x3 conv becomes contiguous flat-offset taps. bf16 for the MXU.
        r0 = pl.multiple_of(t * TH, TH)
        xt = x_ref[0, pl.ds(r0, TH + 2), :, :].reshape(padn, cin)

        m0 = pl.multiple_of(t * outn, 8)
        mask = mask_ref[pl.ds(m0, padn), :]                       # (padn, 1) f32

        # --- conv1 (1x1, BN scale folded) + bias + relu; mask re-zeroes the halo
        h1 = jnp.dot(xt, w1_ref[...], preferred_element_type=jnp.float32)
        h1 = jnp.maximum(h1 + b1_ref[...], 0.0) * mask
        h1_ref[0:padn, :] = h1.astype(jnp.bfloat16)
        h1_ref[padn:padn + extra, :] = jnp.zeros((extra, pp), jnp.bfloat16)

        # --- conv2 (3x3, pad=1) + bias + relu: 9 contiguous flat-offset taps ----
        acc = jnp.dot(h1_ref[0:outn, :], w2_ref[0],
                      preferred_element_type=jnp.float32)
        for k in range(1, 9):
            off = (k // 3) * Wp + (k % 3)
            acc = acc + jnp.dot(h1_ref[off:off + outn, :], w2_ref[k],
                                preferred_element_type=jnp.float32)
        h2 = jnp.maximum(acc + b2_ref[...], 0.0).astype(jnp.bfloat16)

        # --- conv3 (1x1) + bn3 bias ---------------------------------------------
        h3 = jnp.dot(h2, w3_ref[...], preferred_element_type=jnp.float32) + b3_ref[...]

        # --- residual add (x sits at flat offset Wp+1 in the padded layout) + relu
        res = xt[Wp + 1:Wp + 1 + outn, :].astype(jnp.float32)
        out = jnp.maximum(h3 + res, 0.0)
        o_ref[0] = out.reshape(TH, Wp, coutp).astype(o_ref.dtype)

    return kernel


# ----------------------------- weight prep (one-time) ------------------------
def fold_bn(gamma, beta, mean, var, eps=1e-5):
    scale = gamma / jnp.sqrt(var + eps)
    bias = beta - mean * scale
    return scale.astype(jnp.float32), bias.astype(jnp.float32)


def prepare_params(params, eps=1e-5):
    """Fold BN scale into conv weights, lane-pad channels to multiples of 128,
    convert MXU operands to bf16.  Call once, outside the per-step hot path."""
    P, Cin = params["w1"].shape[0], params["w1"].shape[1]
    Cout = params["w3"].shape[0]
    assert Cout == Cin, "stride=1 / no-downsample bottleneck requires inplanes == 4*planes"
    Pp, Cinp, Coutp = _round_up(P, 128), _round_up(Cin, 128), _round_up(Cout, 128)

    s1, b1 = fold_bn(params["g1"], params["be1"], params["m1"], params["v1"], eps)
    s2, b2 = fold_bn(params["g2"], params["be2"], params["m2"], params["v2"], eps)
    s3, b3 = fold_bn(params["g3"], params["be3"], params["m3"], params["v3"], eps)

    w1 = (params["w1"][:, :, 0, 0] * s1[:, None]).T              # (Cin, P)
    w2 = jnp.transpose(params["w2"], (2, 3, 1, 0)) * s2          # (3,3,P,P), out-ch scaled
    w3 = (params["w3"][:, :, 0, 0] * s3[:, None]).T              # (P, Cout)

    def pad2(a, r, c):
        return jnp.pad(a, ((0, r - a.shape[0]), (0, c - a.shape[1])))

    w2p = jnp.pad(w2, ((0, 0), (0, 0), (0, Pp - P), (0, Pp - P)))
    return {
        "w1": pad2(w1, Cinp, Pp).astype(jnp.bfloat16),
        "b1": jnp.pad(b1, (0, Pp - P)).reshape(1, Pp),
        "w2": w2p.reshape(9, Pp, Pp).astype(jnp.bfloat16),
        "b2": jnp.pad(b2, (0, Pp - P)).reshape(1, Pp),
        "w3": pad2(w3, Pp, Coutp).astype(jnp.bfloat16),
        "b3": jnp.pad(b3, (0, Coutp - Cout)).reshape(1, Coutp),
    }


# ----------------------------- forward wrapper --------------------------------
@functools.partial(jax.jit, static_argnames=("row_block",))
def bottleneck_forward(x_nchw, prepped, row_block=8):
    N, C, H, W = x_nchw.shape
    Cinp, Pp = prepped["w1"].shape
    Coutp = prepped["w3"].shape[1]
    assert Cinp == Coutp

    TH = row_block if (row_block is not None and H % row_block == 0) else H
    nt = H // TH
    Wp = _round_up(W + 2, 16)                 # sublane-friendly padded width
    padn_img = (H + 2) * Wp

    # NCHW -> NHWC (kept only at the block boundary for PyTorch interface parity),
    # zero spatial halo + lane-pad channels, bf16 operands for the MXU.
    x = jnp.transpose(x_nchw, (0, 2, 3, 1))
    x = jnp.pad(x, ((0, 0), (1, 1), (1, Wp - W - 1), (0, Cinp - C)))
    x = x.astype(jnp.bfloat16)

    # Interior mask (re-zeroes the halo after conv1's bias, preserving the 3x3
    # zero-padding semantics in the flattened layout).
    ri = jnp.arange(H + 2)
    ci = jnp.arange(Wp)
    mask = ((ri[:, None] >= 1) & (ri[:, None] <= H)
            & (ci[None, :] >= 1) & (ci[None, :] <= W))
    mask = mask.astype(jnp.float32).reshape(padn_img, 1)

    kernel = _make_kernel(TH=TH, Wp=Wp)

    out = pl.pallas_call(
        kernel,
        out_shape=jax.ShapeDtypeStruct((N, H, Wp, Coutp), jnp.float32),
        grid_spec=pltpu.PrefetchScalarGridSpec(
            num_scalar_prefetch=0,
            grid=(N, nt),
            in_specs=[
                # x block stays resident across the row-tile axis (index const in t)
                pl.BlockSpec((1, H + 2, Wp, Cinp), lambda n, t: (n, 0, 0, 0)),
                pl.BlockSpec((padn_img, 1), lambda n, t: (0, 0)),
                pl.BlockSpec((Cinp, Pp), lambda n, t: (0, 0)),
                pl.BlockSpec((1, Pp), lambda n, t: (0, 0)),
                pl.BlockSpec((9, Pp, Pp), lambda n, t: (0, 0, 0)),
                pl.BlockSpec((1, Pp), lambda n, t: (0, 0)),
                pl.BlockSpec((Pp, Coutp), lambda n, t: (0, 0)),
                pl.BlockSpec((1, Coutp), lambda n, t: (0, 0)),
            ],
            out_specs=pl.BlockSpec((1, TH, Wp, Coutp), lambda n, t: (n, t, 0, 0)),
            scratch_shapes=[pltpu.VMEM(((TH + 2) * Wp + 8, Pp), jnp.bfloat16)],
        ),
        compiler_params=pltpu.CompilerParams(
            dimension_semantics=("parallel", "parallel"),
            vmem_limit_bytes=64 * 1024 * 1024),
    )(x, mask, prepped["w1"], prepped["b1"], prepped["w2"], prepped["b2"],
      prepped["w3"], prepped["b3"])

    # Drop junk columns / padded channels; back to NCHW.
    return jnp.transpose(out[:, :, :W, :C], (0, 3, 1, 2))


# ----------------------- pure-JAX reference (NCHW) ---------------------------
def reference_forward(x, params, eps=1e-5):
    dn = ("NCHW", "OIHW", "NCHW")

    def bn(h, g, be, m, v):
        return (h - m[None, :, None, None]) / jnp.sqrt(v[None, :, None, None] + eps) \
            * g[None, :, None, None] + be[None, :, None, None]

    out = lax.conv_general_dilated(x, params["w1"], (1, 1), "VALID",
                                   dimension_numbers=dn)
    out = jax.nn.relu(bn(out, params["g1"], params["be1"], params["m1"], params["v1"]))
    out = lax.conv_general_dilated(out, params["w2"], (1, 1), ((1, 1), (1, 1)),
                                   dimension_numbers=dn)
    out = jax.nn.relu(bn(out, params["g2"], params["be2"], params["m2"], params["v2"]))
    out = lax.conv_general_dilated(out, params["w3"], (1, 1), "VALID",
                                   dimension_numbers=dn)
    out = bn(out, params["g3"], params["be3"], params["m3"], params["v3"])
    return jax.nn.relu(out + x)


# ----------------------------- main ------------------------------------------
if __name__ == "__main__":
    N, planes, H, W = 2, 16, 16, 16
    inplanes = planes * 4          # residual requires inplanes == 4 * planes

    key = jax.random.PRNGKey(0)
    ks = jax.random.split(key, 16)

    def rnd(k, shape, scale=0.1):
        return jax.random.normal(k, shape, jnp.float32) * scale

    params = {
        # conv weights in PyTorch OIHW layout
        "w1": rnd(ks[0], (planes, inplanes, 1, 1)),
        "w2": rnd(ks[1], (planes, planes, 3, 3)),
        "w3": rnd(ks[2], (inplanes, planes, 1, 1)),
        # bn1
        "g1": 1.0 + 0.1 * jax.random.normal(ks[3], (planes,), jnp.float32),
        "be1": rnd(ks[4], (planes,)),
        "m1": rnd(ks[5], (planes,)),
        "v1": 0.5 + jnp.abs(jax.random.normal(ks[6], (planes,), jnp.float32)),
        # bn2
        "g2": 1.0 + 0.1 * jax.random.normal(ks[7], (planes,), jnp.float32),
        "be2": rnd(ks[8], (planes,)),
        "m2": rnd(ks[9], (planes,)),
        "v2": 0.5 + jnp.abs(jax.random.normal(ks[10], (planes,), jnp.float32)),
        # bn3
        "g3": 1.0 + 0.1 * jax.random.normal(ks[11], (inplanes,), jnp.float32),
        "be3": rnd(ks[12], (inplanes,)),
        "m3": rnd(ks[13], (inplanes,)),
        "v3": 0.5 + jnp.abs(jax.random.normal(ks[14], (inplanes,), jnp.float32)),
    }

    x = jax.random.normal(ks[15], (N, inplanes, H, W), jnp.float32)

    prepped = prepare_params(params)           # one-time weight prep
    out = jax.block_until_ready(bottleneck_forward(x, prepped, row_block=8))

    ref = jax.block_until_ready(reference_forward(x, params))
    np.testing.assert_allclose(np.asarray(out), np.asarray(ref),
                               rtol=2e-2, atol=2e-2)

    print("KERNEL_OK")
</pallas_src>

<mosaic_0001>
module attributes {stable_mosaic.version = 11 : i64} {
  func.func @kernel(%arg0: i32, %arg1: i32, %arg2: memref<1x18x32x128xbf16, #tpu.memory_space<vmem>>, %arg3: memref<576x1xf32, #tpu.memory_space<vmem>>, %arg4: memref<128x128xbf16, #tpu.memory_space<vmem>>, %arg5: memref<1x128xf32, #tpu.memory_space<vmem>>, %arg6: memref<9x128x128xbf16, #tpu.memory_space<vmem>>, %arg7: memref<1x128xf32, #tpu.memory_space<vmem>>, %arg8: memref<128x128xbf16, #tpu.memory_space<vmem>>, %arg9: memref<1x128xf32, #tpu.memory_space<vmem>>, %arg10: memref<1x8x32x128xf32, #tpu.memory_space<vmem>>, %arg11: memref<328x128xbf16, #tpu.memory_space<vmem>>) attributes {dimension_semantics = [#tpu.dimension_semantics<parallel>, #tpu.dimension_semantics<parallel>], iteration_bounds = array<i64: 2, 2>, scalar_prefetch = 0 : i64, scratch_operands = 1 : i64, tpu.core_type = #tpu.core_type<tc>, window_params = [{transform_indices = @transform_0, window_bounds = array<i64: 1, 18, 32, 128>}, {pipeline_mode = #tpu.pipeline_mode<synchronous>, transform_indices = @transform_1, window_bounds = array<i64: 576, 1>}, {pipeline_mode = #tpu.pipeline_mode<synchronous>, transform_indices = @transform_2, window_bounds = array<i64: 128, 128>}, {pipeline_mode = #tpu.pipeline_mode<synchronous>, transform_indices = @transform_3, window_bounds = array<i64: 1, 128>}, {pipeline_mode = #tpu.pipeline_mode<synchronous>, transform_indices = @transform_4, window_bounds = array<i64: 9, 128, 128>}, {pipeline_mode = #tpu.pipeline_mode<synchronous>, transform_indices = @transform_5, window_bounds = array<i64: 1, 128>}, {pipeline_mode = #tpu.pipeline_mode<synchronous>, transform_indices = @transform_6, window_bounds = array<i64: 128, 128>}, {pipeline_mode = #tpu.pipeline_mode<synchronous>, transform_indices = @transform_7, window_bounds = array<i64: 1, 128>}, {transform_indices = @transform_8, window_bounds = array<i64: 1, 8, 32, 128>}]} {
    %c8_i32 = arith.constant 8 : i32
    %0 = arith.muli %arg1, %c8_i32 : i32
    %1 = tpu.assume_multiple %0, 8 : i32
    %c0 = arith.constant 0 : index
    %2 = arith.index_cast %1 : i32 to index
    %c0_0 = arith.constant 0 : index
    %c0_1 = arith.constant 0 : index
    %3 = vector.load %arg2[%c0, %2, %c0_0, %c0_1] : memref<1x18x32x128xbf16, #tpu.memory_space<vmem>>, vector<1x10x32x128xbf16>
    %4 = vector.shape_cast %3 : vector<1x10x32x128xbf16> to vector<10x32x128xbf16>
    %5 = vector.shape_cast %4 : vector<10x32x128xbf16> to vector<320x128xbf16>
    %c256_i32 = arith.constant 256 : i32
    %6 = arith.muli %arg1, %c256_i32 : i32
    %7 = tpu.assume_multiple %6, 8 : i32
    %8 = arith.index_cast %7 : i32 to index
    %c0_2 = arith.constant 0 : index
    %9 = vector.load %arg3[%8, %c0_2] : memref<576x1xf32, #tpu.memory_space<vmem>>, vector<320x1xf32>
    %c0_3 = arith.constant 0 : index
    %c0_4 = arith.constant 0 : index
    %10 = vector.load %arg4[%c0_3, %c0_4] : memref<128x128xbf16, #tpu.memory_space<vmem>>, vector<128x128xbf16>
    %cst = arith.constant dense<0.000000e+00> : vector<320x128xf32>
    %11 = tpu.matmul %5, %10, %cst {dimension_numbers = #tpu.dot_dimension_numbers<[1], [0], [0], [1], [0, 0, 1, 1], [], []>} : vector<320x128xbf16>, vector<128x128xbf16>, vector<320x128xf32> -> vector<320x128xf32>
    %c0_5 = arith.constant 0 : index
    %c0_6 = arith.constant 0 : index
    %12 = vector.load %arg5[%c0_5, %c0_6] : memref<1x128xf32, #tpu.memory_space<vmem>>, vector<1x128xf32>
    %13 = vector.broadcast %12 : vector<1x128xf32> to vector<320x128xf32>
    %14 = arith.addf %11, %13 : vector<320x128xf32>
    %cst_7 = arith.constant 0.000000e+00 : f32
    %15 = vector.broadcast %cst_7 : f32 to vector<320x128xf32>
    %16 = arith.maximumf %14, %15 : vector<320x128xf32>
    %17 = vector.broadcast %9 : vector<320x1xf32> to vector<320x128xf32>
    %18 = arith.mulf %16, %17 : vector<320x128xf32>
    %19 = arith.truncf %18 : vector<320x128xf32> to vector<320x128xbf16>
    %c0_8 = arith.constant 0 : index
    %c0_9 = arith.constant 0 : index
    %20 = vector.load %arg11[%c0_8, %c0_9] : memref<328x128xbf16, #tpu.memory_space<vmem>>, vector<320x128xbf16>
    tpu.vector_store %arg11[%c0_8, %c0_9], %19 {strides = array<i32>} : memref<328x128xbf16, #tpu.memory_space<vmem>>, vector<320x128xbf16>,
    %cst_10 = arith.constant 0.000000e+00 : bf16
    %21 = vector.broadcast %cst_10 : bf16 to vector<8x128xbf16>
    %c320 = arith.constant 320 : index
    %c0_11 = arith.constant 0 : index
    %22 = vector.load %arg11[%c320, %c0_11] : memref<328x128xbf16, #tpu.memory_space<vmem>>, vector<8x128xbf16>
    tpu.vector_store %arg11[%c320, %c0_11], %21 {strides = array<i32>} : memref<328x128xbf16, #tpu.memory_space<vmem>>, vector<8x128xbf16>,
    %c0_12 = arith.constant 0 : index
    %c0_13 = arith.constant 0 : index
    %23 = vector.load %arg11[%c0_12, %c0_13] : memref<328x128xbf16, #tpu.memory_space<vmem>>, vector<256x128xbf16>
    %c0_14 = arith.constant 0 : index
    %c0_15 = arith.constant 0 : index
    %c0_16 = arith.constant 0 : index
    %24 = vector.load %arg6[%c0_14, %c0_15, %c0_16] : memref<9x128x128xbf16, #tpu.memory_space<vmem>>, vector<1x128x128xbf16>
    %25 = vector.shape_cast %24 : vector<1x128x128xbf16> to vector<128x128xbf16>
    %cst_17 = arith.constant dense<0.000000e+00> : vector<256x128xf32>
    %26 = tpu.matmul %23, %25, %cst_17 {dimension_numbers = #tpu.dot_dimension_numbers<[1], [0], [0], [1], [0, 0, 1, 1], [], []>} : vector<256x128xbf16>, vector<128x128xbf16>, vector<256x128xf32> -> vector<256x128xf32>
    %c1 = arith.constant 1 : index
    %c0_18 = arith.constant 0 : index
    %27 = vector.load %arg11[%c1, %c0_18] : memref<328x128xbf16, #tpu.memory_space<vmem>>, vector<256x128xbf16>
    %c1_19 = arith.constant 1 : index
    %c0_20 = arith.constant 0 : index
    %c0_21 = arith.constant 0 : index
    %28 = vector.load %arg6[%c1_19, %c0_20, %c0_21] : memref<9x128x128xbf16, #tpu.memory_space<vmem>>, vector<1x128x128xbf16>
    %29 = vector.shape_cast %28 : vector<1x128x128xbf16> to vector<128x128xbf16>
    %cst_22 = arith.constant dense<0.000000e+00> : vector<256x128xf32>
    %30 = tpu.matmul %27, %29, %cst_22 {dimension_numbers = #tpu.dot_dimension_numbers<[1], [0], [0], [1], [0, 0, 1, 1], [], []>} : vector<256x128xbf16>, vector<128x128xbf16>, vector<256x128xf32> -> vector<256x128xf32>
    %31 = arith.addf %26, %30 : vector<256x128xf32>
    %c2 = arith.constant 2 : index
    %c0_23 = arith.constant 0 : index
    %32 = vector.load %arg11[%c2, %c0_23] : memref<328x128xbf16, #tpu.memory_space<vmem>>, vector<256x128xbf16>
    %c2_24 = arith.constant 2 : index
    %c0_25 = arith.constant 0 : index
    %c0_26 = arith.constant 0 : index
    %33 = vector.load %arg6[%c2_24, %c0_25, %c0_26] : memref<9x128x128xbf16, #tpu.memory_space<vmem>>, vector<1x128x128xbf16>
    %34 = vector.shape_cast %33 : vector<1x128x128xbf16> to vector<128x128xbf16>
    %cst_27 = arith.constant dense<0.000000e+00> : vector<256x128xf32>
    %35 = tpu.matmul %32, %34, %cst_27 {dimension_numbers = #tpu.dot_dimension_numbers<[1], [0], [0], [1], [0, 0, 1, 1], [], []>} : vector<256x128xbf16>, vector<128x128xbf16>, vector<256x128xf32> -> vector<256x128xf32>
    %36 = arith.addf %31, %35 : vector<256x128xf32>
    %c32 = arith.constant 32 : index
    %c0_28 = arith.constant 0 : index
    %37 = vector.load %arg11[%c32, %c0_28] : memref<328x128xbf16, #tpu.memory_space<vmem>>, vector<256x128xbf16>
    %c3 = arith.constant 3 : index
    %c0_29 = arith.constant 0 : index
    %c0_30 = arith.constant 0 : index
    %38 = vector.load %arg6[%c3, %c0_29, %c0_30] : memref<9x128x128xbf16, #tpu.memory_space<vmem>>, vector<1x128x128xbf16>
    %39 = vector.shape_cast %38 : vector<1x128x128xbf16> to vector<128x128xbf16>
    %cst_31 = arith.constant dense<0.000000e+00> : vector<256x128xf32>
    %40 = tpu.matmul %37, %39, %cst_31 {dimension_numbers = #tpu.dot_dimension_numbers<[1], [0], [0], [1], [0, 0, 1, 1], [], []>} : vector<256x128xbf16>, vector<128x128xbf16>, vector<256x128xf32> -> vector<256x128xf32>
    %41 = arith.addf %36, %40 : vector<256x128xf32>
    %c33 = arith.constant 33 : index
    %c0_32 = arith.constant 0 : index
    %42 = vector.load %arg11[%c33, %c0_32] : memref<328x128xbf16, #tpu.memory_space<vmem>>, vector<256x128xbf16>
    %c4 = arith.constant 4 : index
    %c0_33 = arith.constant 0 : index
    %c0_34 = arith.constant 0 : index
    %43 = vector.load %arg6[%c4, %c0_33, %c0_34] : memref<9x128x128xbf16, #tpu.memory_space<vmem>>, vector<1x128x128xbf16>
    %44 = vector.shape_cast %43 : vector<1x128x128xbf16> to vector<128x128xbf16>
    %cst_35 = arith.constant dense<0.000000e+00> : vector<256x128xf32>
    %45 = tpu.matmul %42, %44, %cst_35 {dimension_numbers = #tpu.dot_dimension_numbers<[1], [0], [0], [1], [0, 0, 1, 1], [], []>} : vector<256x128xbf16>, vector<128x128xbf16>, vector<256x128xf32> -> vector<256x128xf32>
    %46 = arith.addf %41, %45 : vector<256x128xf32>
    %c34 = arith.constant 34 : index
    %c0_36 = arith.constant 0 : index
    %47 = vector.load %arg11[%c34, %c0_36] : memref<328x128xbf16, #tpu.memory_space<vmem>>, vector<256x128xbf16>
    %c5 = arith.constant 5 : index
    %c0_37 = arith.constant 0 : index
    %c0_38 = arith.constant 0 : index
    %48 = vector.load %arg6[%c5, %c0_37, %c0_38] : memref<9x128x128xbf16, #tpu.memory_space<vmem>>, vector<1x128x128xbf16>
    %49 = vector.shape_cast %48 : vector<1x128x128xbf16> to vector<128x128xbf16>
    %cst_39 = arith.constant dense<0.000000e+00> : vector<256x128xf32>
    %50 = tpu.matmul %47, %49, %cst_39 {dimension_numbers = #tpu.dot_dimension_numbers<[1], [0], [0], [1], [0, 0, 1, 1], [], []>} : vector<256x128xbf16>, vector<128x128xbf16>, vector<256x128xf32> -> vector<256x128xf32>
    %51 = arith.addf %46, %50 : vector<256x128xf32>
    %c64 = arith.constant 64 : index
    %c0_40 = arith.constant 0 : index
    %52 = vector.load %arg11[%c64, %c0_40] : memref<328x128xbf16, #tpu.memory_space<vmem>>, vector<256x128xbf16>
    %c6 = arith.constant 6 : index
    %c0_41 = arith.constant 0 : index
    %c0_42 = arith.constant 0 : index
    %53 = vector.load %arg6[%c6, %c0_41, %c0_42] : memref<9x128x128xbf16, #tpu.memory_space<vmem>>, vector<1x128x128xbf16>
    %54 = vector.shape_cast %53 : vector<1x128x128xbf16> to vector<128x128xbf16>
    %cst_43 = arith.constant dense<0.000000e+00> : vector<256x128xf32>
    %55 = tpu.matmul %52, %54, %cst_43 {dimension_numbers = #tpu.dot_dimension_numbers<[1], [0], [0], [1], [0, 0, 1, 1], [], []>} : vector<256x128xbf16>, vector<128x128xbf16>, vector<256x128xf32> -> vector<256x128xf32>
    %56 = arith.addf %51, %55 : vector<256x128xf32>
    %c65 = arith.constant 65 : index
    %c0_44 = arith.constant 0 : index
    %57 = vector.load %arg11[%c65, %c0_44] : memref<328x128xbf16, #tpu.memory_space<vmem>>, vector<256x128xbf16>
    %c7 = arith.constant 7 : index
    %c0_45 = arith.constant 0 : index
    %c0_46 = arith.constant 0 : index
    %58 = vector.load %arg6[%c7, %c0_45, %c0_46] : memref<9x128x128xbf16, #tpu.memory_space<vmem>>, vector<1x128x128xbf16>
    %59 = vector.shape_cast %58 : vector<1x128x128xbf16> to vector<128x128xbf16>
    %cst_47 = arith.constant dense<0.000000e+00> : vector<256x128xf32>
    %60 = tpu.matmul %57, %59, %cst_47 {dimension_numbers = #tpu.dot_dimension_numbers<[1], [0], [0], [1], [0, 0, 1, 1], [], []>} : vector<256x128xbf16>, vector<128x128xbf16>, vector<256x128xf32> -> vector<256x128xf32>
    %61 = arith.addf %56, %60 : vector<256x128xf32>
    %c66 = arith.constant 66 : index
    %c0_48 = arith.constant 0 : index
    %62 = vector.load %arg11[%c66, %c0_48] : memref<328x128xbf16, #tpu.memory_space<vmem>>, vector<256x128xbf16>
    %c8 = arith.constant 8 : index
    %c0_49 = arith.constant 0 : index
    %c0_50 = arith.constant 0 : index
    %63 = vector.load %arg6[%c8, %c0_49, %c0_50] : memref<9x128x128xbf16, #tpu.memory_space<vmem>>, vector<1x128x128xbf16>
    %64 = vector.shape_cast %63 : vector<1x128x128xbf16> to vector<128x128xbf16>
    %cst_51 = arith.constant dense<0.000000e+00> : vector<256x128xf32>
    %65 = tpu.matmul %62, %64, %cst_51 {dimension_numbers = #tpu.dot_dimension_numbers<[1], [0], [0], [1], [0, 0, 1, 1], [], []>} : vector<256x128xbf16>, vector<128x128xbf16>, vector<256x128xf32> -> vector<256x128xf32>
    %66 = arith.addf %61, %65 : vector<256x128xf32>
    %c0_52 = arith.constant 0 : index
    %c0_53 = arith.constant 0 : index
    %67 = vector.load %arg7[%c0_52, %c0_53] : memref<1x128xf32, #tpu.memory_space<vmem>>, vector<1x128xf32>
    %68 = vector.broadcast %67 : vector<1x128xf32> to vector<256x128xf32>
    %69 = arith.addf %66, %68 : vector<256x128xf32>
    %cst_54 = arith.constant 0.000000e+00 : f32
    %70 = vector.broadcast %cst_54 : f32 to vector<256x128xf32>
    %71 = arith.maximumf %69, %70 : vector<256x128xf32>
    %72 = arith.truncf %71 : vector<256x128xf32> to vector<256x128xbf16>
    %c0_55 = arith.constant 0 : index
    %c0_56 = arith.constant 0 : index
    %73 = vector.load %arg8[%c0_55, %c0_56] : memref<128x128xbf16, #tpu.memory_space<vmem>>, vector<128x128xbf16>
    %cst_57 = arith.constant dense<0.000000e+00> : vector<256x128xf32>
    %74 = tpu.matmul %72, %73, %cst_57 {dimension_numbers = #tpu.dot_dimension_numbers<[1], [0], [0], [1], [0, 0, 1, 1], [], []>} : vector<256x128xbf16>, vector<128x128xbf16>, vector<256x128xf32> -> vector<256x128xf32>
    %c0_58 = arith.constant 0 : index
    %c0_59 = arith.constant 0 : index
    %75 = vector.load %arg9[%c0_58, %c0_59] : memref<1x128xf32, #tpu.memory_space<vmem>>, vector<1x128xf32>
    %76 = vector.broadcast %75 : vector<1x128xf32> to vector<256x128xf32>
    %77 = arith.addf %74, %76 : vector<256x128xf32>
    %78 = vector.extract_strided_slice %5 {offsets = [33, 0], sizes = [256, 128], strides = [1, 1]} : vector<320x128xbf16> to vector<256x128xbf16>
    %79 = arith.extf %78 : vector<256x128xbf16> to vector<256x128xf32>
    %80 = arith.addf %77, %79 : vector<256x128xf32>
    %cst_60 = arith.constant 0.000000e+00 : f32
    %81 = vector.broadcast %cst_60 : f32 to vector<256x128xf32>
    %82 = arith.maximumf %80, %81 : vector<256x128xf32>
    %83 = vector.shape_cast %82 : vector<256x128xf32> to vector<8x32x128xf32>
    %c0_61 = arith.constant 0 : index
    %c0_62 = arith.constant 0 : index
    %c0_63 = arith.constant 0 : index
    %c0_64 = arith.constant 0 : index
    %84 = vector.load %arg10[%c0_61, %c0_62, %c0_63, %c0_64] : memref<1x8x32x128xf32, #tpu.memory_space<vmem>>, vector<1x8x32x128xf32>
    %85 = vector.shape_cast %84 : vector<1x8x32x128xf32> to vector<8x32x128xf32>
    %86 = vector.shape_cast %83 : vector<8x32x128xf32> to vector<1x8x32x128xf32>
    tpu.vector_store %arg10[%c0_61, %c0_62, %c0_63, %c0_64], %86 {strides = array<i32>} : memref<1x8x32x128xf32, #tpu.memory_space<vmem>>, vector<1x8x32x128xf32>,
    return
  }
  func.func @transform_0(%arg0: i32, %arg1: i32) -> (i32, i32, i32, i32) {
    %c0_i32 = arith.constant 0 : i32
    %c0_i32_0 = arith.constant 0 : i32
    %c0_i32_1 = arith.constant 0 : i32
    %c0_i32_2 = arith.constant 0 : i32
    return %arg0, %c0_i32, %c0_i32_0, %c0_i32_1 : i32, i32, i32, i32
  }
  func.func @transform_1(%arg0: i32, %arg1: i32) -> (i32, i32) {
    %c0_i32 = arith.constant 0 : i32
    %c0_i32_0 = arith.constant 0 : i32
    %c0_i32_1 = arith.constant 0 : i32
    return %c0_i32, %c0_i32_0 : i32, i32
  }
  func.func @transform_2(%arg0: i32, %arg1: i32) -> (i32, i32) {
    %c0_i32 = arith.constant 0 : i32
    %c0_i32_0 = arith.constant 0 : i32
    %c0_i32_1 = arith.constant 0 : i32
    return %c0_i32, %c0_i32_0 : i32, i32
  }
  func.func @transform_3(%arg0: i32, %arg1: i32) -> (i32, i32) {
    %c0_i32 = arith.constant 0 : i32
    %c0_i32_0 = arith.constant 0 : i32
    %c0_i32_1 = arith.constant 0 : i32
    return %c0_i32, %c0_i32_0 : i32, i32
  }
  func.func @transform_4(%arg0: i32, %arg1: i32) -> (i32, i32, i32) {
    %c0_i32 = arith.constant 0 : i32
    %c0_i32_0 = arith.constant 0 : i32
    %c0_i32_1 = arith.constant 0 : i32
    %c0_i32_2 = arith.constant 0 : i32
    return %c0_i32, %c0_i32_0, %c0_i32_1 : i32, i32, i32
  }
  func.func @transform_5(%arg0: i32, %arg1: i32) -> (i32, i32) {
    %c0_i32 = arith.constant 0 : i32
    %c0_i32_0 = arith.constant 0 : i32
    %c0_i32_1 = arith.constant 0 : i32
    return %c0_i32, %c0_i32_0 : i32, i32
  }
  func.func @transform_6(%arg0: i32, %arg1: i32) -> (i32, i32) {
    %c0_i32 = arith.constant 0 : i32
    %c0_i32_0 = arith.constant 0 : i32
    %c0_i32_1 = arith.constant 0 : i32
    return %c0_i32, %c0_i32_0 : i32, i32
  }
  func.func @transform_7(%arg0: i32, %arg1: i32) -> (i32, i32) {
    %c0_i32 = arith.constant 0 : i32
    %c0_i32_0 = arith.constant 0 : i32
    %c0_i32_1 = arith.constant 0 : i32
    return %c0_i32, %c0_i32_0 : i32, i32
  }
  func.func @transform_8(%arg0: i32, %arg1: i32) -> (i32, i32, i32, i32) {
    %c0_i32 = arith.constant 0 : i32
    %c0_i32_0 = arith.constant 0 : i32
    %c0_i32_1 = arith.constant 0 : i32
    return %arg0, %arg1, %c0_i32, %c0_i32_0 : i32, i32, i32, i32
  }
}

</mosaic_0001>

<bundles_post_ra>
// kernel: bottleneck_forward.1
= control target key start
LH: loop header
LB: loop body
LE: loop exit
PB: predicated region body
PF: predicated region fallthrough
CT: control target
= control target key end

     0   :  { %s9495_s0 = inlined_call_operand.hbm [shape: bf16[2,18,32,128], index: 0, kind: input, shape index: {}]   ;;  %s9496_s1 = inlined_call_operand.hbm [shape: f32[576,1], index: 1, kind: input, shape index: {}]   ;;  %s9497_s2 = inlined_call_operand.hbm [shape: bf16[128,128], index: 2, kind: input, shape index: {}]   ;;  %s9498_s3 = inlined_call_operand.hbm [shape: f32[1,128], index: 3, kind: input, shape index: {}]   ;;  %s9499_s4 = inlined_call_operand.hbm [shape: bf16[9,128,128], index: 4, kind: input, shape index: {}]   ;;  %s9500_s5 = inlined_call_operand.hbm [shape: f32[1,128], index: 5, kind: input, shape index: {}]   ;;  %s9501_s6 = inlined_call_operand.hbm [shape: bf16[128,128], index: 6, kind: input, shape index: {}]   ;;  %s9502_s7 = inlined_call_operand.hbm [shape: f32[1,128], index: 7, kind: input, shape index: {}]   ;;  %s9503_s8 = inlined_call_operand.hbm [shape: f32[2,16,32,128], index: 8, kind: output, shape index: {}]  }
   0x1   :  { %9517 = sst [smem:[#allocation37_spill]] %s9495_s0 }
   0x2   :  { %9518 = sst [smem:[#allocation38_spill]] %s9496_s1 }
   0x3   :  { %9519 = sst [smem:[#allocation39_spill]] %s9497_s2 }
   0x4   :  { %9520 = sst [smem:[#allocation40_spill]] %s9498_s3 }
   0x5   :  { %9521 = sst [smem:[#allocation41_spill]] %s9499_s4 }
   0x6   :  { %9522 = sst [smem:[#allocation42_spill]] %s9503_s8 }
   0x7   :  { %13 = vsyncpa [#allocation4], 0 }
   0x8   :  { %15 = vsyncpa [#allocation4 + $0x1], 0 }
   0x9   :  { %16 = vsyncpa [#allocation7], 0 }
   0xa   :  { %17 = vsyncpa [#allocation10], 0 }
   0xb   :  { %18 = vsyncpa [#allocation13], 0 }
   0xc   :  { %19 = vsyncpa [#allocation16], 0 }
   0xd   :  { %20 = vsyncpa [#allocation5], 0 }
   0xe   :  { %22 = vsyncpa [#allocation5 + $0x1], 0  ;;  %s8008_s27 = smov 0   ;;  %s8010_s28 = smov 0  }
   0xf   :  { %s8012_s29 = smov 0   ;;  %s8014_s30 = smov 0  }
  0x10   :  { %s8016_s9 = smov 0   ;;  %s8018_s10 = smov 0  }
  0x11   :  { %s8020_s11 = smov 0   ;;  %s8022_s12 = smov 0  }
  0x12   :  { %s8024_s13 = smov 0   ;;  %s8026_s14 = smov 0  }
  0x13   :  { %s8028_s15 = smov 0  }
  0x14 LB: > { %9523 = sst [smem:[#allocation24_spill]] %s7905_s27  ;;  %s9504_s16 = sadd.s32 4294967295, %s7945_s15   ;;  %s7945_s15 = sphi %s8028_s15, %s28_s15   ;;  %s7941_s14 = sphi %s8026_s14, %s9583_s14   ;;  %s7937_s13 = sphi %s8024_s13, %s9582_s13   ;;  %s7933_s12 = sphi %s8022_s12, %s9581_s12   ;;  %s7929_s11 = sphi %s8020_s11, %s9580_s11   ;;  %s7925_s10 = sphi %s8018_s10, %s9579_s10   ;;  %s7921_s9 = sphi %s8016_s9, %s9578_s9   ;;  %s7917_s30 = sphi %s8014_s30, %s9577_s30   ;;  %s7913_s29 = sphi %s8012_s29, %s9576_s29   ;;  %s7909_s28 = sphi %s8010_s28, %s9575_s28   ;;  %s7905_s27 = sphi %s8008_s27, %s9574_s27  }
  0x15   : > { %9524 = sst [smem:[#allocation25_spill]] %s7909_s28  ;;  %p5625_p0 = scmp.ge.s32.totalorder %s7945_s15, 1 }
  0x16   : > { %9525 = sst [smem:[#allocation26_spill]] %s7929_s11  ;;  %p8067_p1 = scmp.eq.s32.totalorder %s9504_s16, 0 }
  0x17   : > { %9526 = sst [smem:[#allocation27_spill]] %s7933_s12  ;;  %p246_p2 = scmp.lt.s32.totalorder %s7945_s15, 5 }
  0x18   : > { %s9527_s17 = scalar_select %p8067_p1, 1, 0 }
  0x19   : > { %p8072_p3 = pnand %p5625_p0, %p246_p2  ;;  %s7947_s19 = smov [#allocation6]  }
  0x1a   : > { %s258_s20 = sshll.u32 %s7947_s19, 4  ;;  %s7948_s22 = smov [#allocation9]   ;;  %s8076_s20 = int_to_ptr.vmem [resolvable:$true] %s258_s20 }
  0x1b   : > { %s9528_s18 = scalar_select %p8072_p3, 1, 0 }
  0x1c   : > { %p7181_p4 = pneg %p8072_p3  ;;  %s285_s23 = sshll.u32 %s7948_s22, 4  ;;  %s8086_s23 = int_to_ptr.vmem [resolvable:$true] %s285_s23 }
  0x1d   : > { %9529 = sst [smem:[#allocation28_spill]] %s9528_s18  ;;  %s7949_s24 = smov [#allocation12]  }
  0x1e   : > { %p8082_p5 = pnand %p7181_p4, %p8067_p1  ;;  %s8088_s25 = sshll.u32 %s7949_s24, 4  ;;  %s310_s25 = int_to_ptr.vmem [resolvable:$true] %s8088_s25 }
  0x1f   : > { %s9531_s1 = sld [smem:[#allocation38_spill]] }
  0x20   : > { %p8098_p7 = pneg %p8082_p5 }
  0x25   : > { %s7581_s19 = scalar_lea.hbm %s9531_s1, 9216 }
  0x26   : > { %p7582_p6 = scmp.ne.s32.totalorder %s9531_s1, %s7581_s19  ;;  %p7588_p10 = scmp.lt.u32.totalorder %s7581_s19, %s9531_s1 }
  0x28   : > { %p7584_p8 = pnand %p8098_p7, %p7582_p6 }
  0x2a   : > { %p7585_p9 = pneg %p7584_p8 }
  0x2c   : > { %p7590_p11 = pnand %p7588_p10, %p7585_p9 }
  0x2e   : > { %7593 = shalt.err (!%p7590_p11)
}
  0x2f   : > { %s7594_s8 = scalar_lea.vmem %s8076_s20, 9216  ;;  %p7602_p2 = scmp.lt.s32.totalorder %s8076_s20, %s8076_s20 }
  0x30   : > { %p7595_p12 = scmp.ne.s32.totalorder %s8076_s20, %s7594_s8  ;;  %p7603_p4 = scmp.lt.s32.totalorder %s7594_s8, %s7594_s8 }
  0x32   : > { %p7597_p13 = pnand %p7595_p12, %p8098_p7  ;;  %p7604_p6 = por %p7603_p4, %p7602_p2 }
  0x34   : > { %p7598_p0 = pneg %p7597_p13 }
  0x36   : > { %p7605_p8 = pnand %p7604_p6, %p7598_p0 }
  0x38   : > { %7608 = shalt.err (!%p7605_p8)
}
  0x39   : > { %s7950_s12 = smov 128   ;;  %s7951_s16 = smov 8  }
  0x3a   : > { %7184 = dma.hbm_to_vmem [thread:$0]  (!%p8082_p5), %s9531_s1, 9216, %s8076_s20, [#allocation7], %s7950_s12, %s7950_s12, %s7951_s16  }
  0x3b   : > { %s9533_s3 = sld [smem:[#allocation40_spill]] }
  0x41   : > { %s7609_s18 = scalar_lea.hbm %s9533_s3, 16 }
  0x42   : > { %p7610_p9 = scmp.ne.s32.totalorder %s9533_s3, %s7609_s18  ;;  %p7616_p12 = scmp.lt.u32.totalorder %s7609_s18, %s9533_s3 }
  0x44   : > { %p7612_p10 = pnand %p7610_p9, %p8098_p7 }
  0x46   : > { %p7613_p11 = pneg %p7612_p10 }
  0x48   : > { %p7618_p13 = pnand %p7616_p12, %p7613_p11 }
  0x4a   : > { %7621 = shalt.err (!%p7618_p13)
}
  0x4b   : > { %s7622_s20 = scalar_lea.vmem %s8086_s23, 16  ;;  %s7629_s0 = scalar_lea.vmem %s8086_s23, 32 }
  0x4c   : > { %p7623_p0 = scmp.ne.s32.totalorder %s8086_s23, %s7622_s20  ;;  %p7630_p6 = scmp.lt.s32.totalorder %s8086_s23, %s8086_s23 }
  0x4d   : > { %p7631_p8 = scmp.lt.s32.totalorder %s7629_s0, %s7622_s20 }
  0x4e   : > { %p7625_p2 = pnand %p7623_p0, %p8098_p7 }
  0x4f   : > { %p7632_p9 = por %p7631_p8, %p7630_p6 }
  0x50   : > { %p7626_p4 = pneg %p7625_p2 }
  0x52   : > { %p7633_p10 = pnand %p7632_p9, %p7626_p4 }
  0x54   : > { %7636 = shalt.err (!%p7633_p10)
}
  0x55   : > { %7190 = dma.hbm_to_vmem [thread:$0]  (!%p8082_p5), %s9533_s3, 16, %s8086_s23, [#allocation10]  }
  0x56   : > { %s7637_s16 = scalar_lea.hbm %s9500_s5, 16 }
  0x57   : > { %p7638_p11 = scmp.ne.s32.totalorder %s9500_s5, %s7637_s16  ;;  %p7644_p0 = scmp.lt.u32.totalorder %s7637_s16, %s9500_s5 }
  0x59   : > { %p7640_p12 = pnand %p7638_p11, %p8098_p7 }
  0x5b   : > { %p7641_p13 = pneg %p7640_p12 }
  0x5d   : > { %p7646_p2 = pnand %p7644_p0, %p7641_p13 }
  0x5f   : > { %7649 = shalt.err (!%p7646_p2)
}
  0x60   : > { %s7650_s8 = scalar_lea.vmem %s310_s25, 16  ;;  %s7657_s23 = scalar_lea.vmem %s310_s25, 32 }
  0x61   : > { %p7651_p4 = scmp.ne.s32.totalorder %s310_s25, %s7650_s8  ;;  %p7658_p9 = scmp.lt.s32.totalorder %s310_s25, %s310_s25 }
  0x62   : > { %p7659_p10 = scmp.lt.s32.totalorder %s7657_s23, %s7650_s8 }
  0x63   : > { %p7653_p6 = pnand %p7651_p4, %p8098_p7 }
  0x64   : > { %p7660_p3 = por %p7659_p10, %p7658_p9 }
  0x65   : > { %p7654_p8 = pneg %p7653_p6 }
  0x67   : > { %p7661_p1 = pnand %p7660_p3, %p7654_p8 }
  0x69   : > { %7664 = shalt.err (!%p7661_p1)
}
  0x6a   : > { %7196 = dma.hbm_to_vmem [thread:$0]  (!%p8082_p5), %s9500_s5, 16, %s310_s25, [#allocation13]  }
  0x6b   : > { %s7952_s27 = smov [#allocation8]   ;;  %s9534_s2 = sld [smem:[#allocation39_spill]] }
  0x6c   : > { %s271_s28 = sshll.u32 %s7952_s27, 4  ;;  %s272_s28 = int_to_ptr.vmem [resolvable:$true] %s271_s28 }
  0x71   : > { %s7665_s16 = scalar_lea.hbm %s9534_s2, 1024 }
  0x72   : > { %p7666_p11 = scmp.ne.s32.totalorder %s9534_s2, %s7665_s16  ;;  %p7672_p12 = scmp.lt.u32.totalorder %s7665_s16, %s9534_s2 }
  0x74   : > { %p7668_p1 = pnand %p7666_p11, %p8098_p7 }
  0x76   : > { %p7669_p3 = pneg %p7668_p1 }
  0x78   : > { %p7674_p13 = pnand %p7672_p12, %p7669_p3 }
  0x7a   : > { %7677 = shalt.err (!%p7674_p13)
}
  0x7b   : > { %s7678_s25 = scalar_lea.vmem %s272_s28, 1024  ;;  %p7686_p6 = scmp.lt.s32.totalorder %s272_s28, %s272_s28 }
  0x7c   : > { %p7679_p0 = scmp.ne.s32.totalorder %s272_s28, %s7678_s25  ;;  %p7687_p8 = scmp.lt.s32.totalorder %s7678_s25, %s7678_s25 }
  0x7e   : > { %p7681_p2 = pnand %p7679_p0, %p8098_p7  ;;  %p7688_p9 = por %p7687_p8, %p7686_p6 }
  0x80   : > { %p7682_p4 = pneg %p7681_p2 }
  0x82   : > { %p7689_p10 = pnand %p7688_p9, %p7682_p4 }
  0x84   : > { %7692 = shalt.err (!%p7689_p10)
}
  0x85   : > { %s9514_s8 = smov 64   ;;  %s9515_s23 = smov 4  }
  0x86   : > { %7187 = dma.hbm_to_vmem [thread:$0]  (!%p8082_p5), %s9534_s2, 1024, %s272_s28, [#allocation7], %s9514_s8, %s9514_s8, %s9515_s23  }
  0x87   : > { %s7955_s27 = smov [#allocation11]   ;;  %s7956_s12 = smov [#allocation14]  }
  0x88   : > { %s295_s18 = sshll.u32 %s7955_s27, 4  ;;  %s319_s16 = sshll.u32 %s7956_s12, 4  ;;  %s296_s18 = int_to_ptr.vmem [resolvable:$true] %s295_s18  ;;  %s8183_s16 = int_to_ptr.vmem [resolvable:$true] %s319_s16 }
  0x89   : > { %s9535_s4 = sld [smem:[#allocation41_spill]] }
  0x8f   : > { %s7693_s22 = scalar_lea.hbm %s9535_s4, 9216 }
  0x90   : > { %p7694_p11 = scmp.ne.s32.totalorder %s9535_s4, %s7693_s22  ;;  %p7700_p12 = scmp.lt.u32.totalorder %s7693_s22, %s9535_s4 }
  0x92   : > { %p7696_p1 = pnand %p7694_p11, %p8098_p7 }
  0x94   : > { %p7697_p3 = pneg %p7696_p1 }
  0x96   : > { %p7702_p13 = pnand %p7700_p12, %p7697_p3 }
  0x98   : > { %7705 = shalt.err (!%p7702_p13)
}
  0x99   : > { %s7706_s0 = scalar_lea.vmem %s296_s18, 9216  ;;  %p7714_p6 = scmp.lt.s32.totalorder %s296_s18, %s296_s18 }
  0x9a   : > { %p7707_p0 = scmp.ne.s32.totalorder %s296_s18, %s7706_s0  ;;  %p7715_p8 = scmp.lt.s32.totalorder %s7706_s0, %s7706_s0 }
  0x9c   : > { %p7709_p2 = pnand %p7707_p0, %p8098_p7  ;;  %p7716_p9 = por %p7715_p8, %p7714_p6 }
  0x9e   : > { %p7710_p4 = pneg %p7709_p2 }
  0xa0   : > { %p7717_p10 = pnand %p7716_p9, %p7710_p4 }
  0xa2   : > { %7720 = shalt.err (!%p7717_p10)
}
  0xa3   : > { %7193 = dma.hbm_to_vmem [thread:$0]  (!%p8082_p5), %s9535_s4, 9216, %s296_s18, [#allocation10], %s9514_s8, %s9514_s8, %s9515_s23  }
  0xa4   : > { %s7721_s22 = scalar_lea.hbm %s9501_s6, 1024 }
  0xa5   : > { %p7722_p11 = scmp.ne.s32.totalorder %s9501_s6, %s7721_s22  ;;  %p7728_p12 = scmp.lt.u32.totalorder %s7721_s22, %s9501_s6 }
  0xa7   : > { %p7724_p1 = pnand %p7722_p11, %p8098_p7 }
  0xa9   : > { %p7725_p3 = pneg %p7724_p1 }
  0xab   : > { %p7730_p13 = pnand %p7728_p12, %p7725_p3 }
  0xad   : > { %7733 = shalt.err (!%p7730_p13)
}
  0xae   : > { %s7734_s18 = scalar_lea.vmem %s8183_s16, 1024  ;;  %p7742_p6 = scmp.lt.s32.totalorder %s8183_s16, %s8183_s16 }
  0xaf   : > { %p7735_p0 = scmp.ne.s32.totalorder %s8183_s16, %s7734_s18  ;;  %p7743_p8 = scmp.lt.s32.totalorder %s7734_s18, %s7734_s18 }
  0xb1   : > { %p7737_p2 = pnand %p7735_p0, %p8098_p7  ;;  %p7744_p9 = por %p7743_p8, %p7742_p6 }
  0xb3   : > { %p7738_p4 = pneg %p7737_p2 }
  0xb5   : > { %p7745_p10 = pnand %p7744_p9, %p7738_p4 }
  0xb7   : > { %7748 = shalt.err (!%p7745_p10)
}
  0xb8   : > { %7199 = dma.hbm_to_vmem [thread:$0]  (!%p8082_p5), %s9501_s6, 1024, %s8183_s16, [#allocation13], %s9514_s8, %s9514_s8, %s9515_s23  }
  0xb9   : > { %s7957_s12 = smov [#allocation15]   ;;  %s7749_s24 = scalar_lea.hbm %s9502_s7, 16 }
  0xba   : > { %s333_s26 = sshll.u32 %s7957_s12, 4  ;;  %p7750_p11 = scmp.ne.s32.totalorder %s9502_s7, %s7749_s24  ;;  %s334_s26 = int_to_ptr.vmem [resolvable:$true] %s333_s26 }
  0xbb   : > { %p7756_p12 = scmp.lt.u32.totalorder %s7749_s24, %s9502_s7 }
  0xbc   : > { %p7752_p1 = pnand %p7750_p11, %p8098_p7 }
  0xbe   : > { %p7753_p3 = pneg %p7752_p1 }
  0xc0   : > { %p7758_p13 = pnand %p7756_p12, %p7753_p3 }
  0xc2   : > { %7761 = shalt.err (!%p7758_p13)
}
  0xc3   : > { %s7762_s16 = scalar_lea.vmem %s334_s26, 16  ;;  %s7769_s0 = scalar_lea.vmem %s334_s26, 32 }
  0xc4   : > { %p7763_p0 = scmp.ne.s32.totalorder %s334_s26, %s7762_s16  ;;  %p7770_p6 = scmp.lt.s32.totalorder %s334_s26, %s334_s26 }
  0xc5   : > { %p7771_p8 = scmp.lt.s32.totalorder %s7769_s0, %s7762_s16 }
  0xc6   : > { %p7765_p2 = pnand %p7763_p0, %p8098_p7 }
  0xc7   : > { %p7772_p9 = por %p7771_p8, %p7770_p6 }
  0xc8   : > { %p7766_p4 = pneg %p7765_p2 }
  0xca   : > { %p7773_p10 = pnand %p7772_p9, %p7766_p4 }
  0xcc   : > { %7776 = shalt.err (!%p7773_p10)
}
  0xcd   : > { %7202 = dma.hbm_to_vmem [thread:$0]  (!%p8082_p5), %s9502_s7, 16, %s334_s26, [#allocation16]  }
  0xce   : > { %s5624_s11 = sadd.s32 4294967294, %s7945_s15   ;;  %s9536_s19 = sld [smem:[#allocation25_spill]] }
  0xcf   : > { %s37_s21 = sadd.s32 1, %s7937_s13  ;;  %s40_s22 = sadd.s32 1, %s7941_s14 }
  0xd0   : > { %p38_p7 = scmp.ge.s32.totalorder %s37_s21, 2  ;;  %s9537_s24 = sld [smem:[#allocation24_spill]] }
  0xd1   : > { %s47_s25 = sadd.s32 1, %s7925_s10  ;;  %p54_p11 = scmp.ne.s32.totalorder %s7925_s10, %s7921_s9 }
  0xd2   : > { %p55_p1 = scmp.eq.s32.totalorder %s7945_s15, 0  ;;  %s9585_s21 = smov (%p38_p7, %s37_s21), 0 }
  0xd3   : > { %s9587_s22 = smov (!%p38_p7, %s40_s22), %s7941_s14  ;;  %p60_p5 = scmp.ne.s32.totalorder %s7921_s9, %s7917_s30 }
  0xd4   : > { %p8260_p3 = por %p55_p1, %p54_p11  ;;  %p42_p12 = scmp.ge.s32.totalorder %s9587_s22, 2 }
  0xd5   : > { %s218_s20 = ssub.s32 %s7937_s13, %s9585_s21  ;;  %p9539_p13 = scmp.ne.s32.totalorder %s9527_s17, 0 }
  0xd6   : > { %s222_s18 = sadd.s32 1, %s7913_s29  ;;  %s9589_s22 = smov (%p42_p12, %s9587_s22), 0 }
  0xd7   : > { %p8270_p0 = por %p9539_p13, %p60_p5  ;;  %p232_p2 = scmp.ne.s32.totalorder %s7913_s29, %s9536_s19 }
  0xd8   : > { %s9541_s16 = sadd.s32 4294967295, %s7945_s15   ;;  %s44_s0 = ssub.s32 %s7941_s14, %s9589_s22 }
  0xd9   : > { %p233_p4 = scmp.eq.s32.totalorder %s9541_s16, 3  ;;  %p238_p6 = scmp.ne.s32.totalorder %s9536_s19, %s9537_s24 }
  0xda   : > { %p45_p8 = scmp.eq.s32.totalorder %s44_s0, 0  ;;  %s219_s30 = sor.u32 %s218_s20, %s44_s0 }
  0xdb   : > { %p220_p9 = scmp.eq.s32.totalorder %s219_s30, 0  ;;  %p8285_p10 = por %p233_p4, %p232_p2 }
  0xdc   : > { %s8290_s12 = scalar_select %p45_p8, %s7925_s10, %s47_s25  }
  0xdd   : > { %s9542_s27 = scalar_select %p8285_p10, 1, 0 }
  0xde   : > { %s8293_s8 = scalar_select %p220_p9, %s7913_s29, %s222_s18  }
  0xdf   : > { %p239_p7 = scmp.eq.s32.totalorder %s5624_s11, 3  ;;  %p7218_p11 = scmp.lt.s32.totalorder %s7945_s15, 4 }
  0xe0   : > { %s344_s23 = sand.u32 1, %s7925_s10   ;;  %s7147_s1 = smul.u32 4608, %s7941_s14 }
  0xe1   : > { %p8298_p1 = por %p239_p7, %p238_p6  ;;  %s7146_s19 = smul.u32 288, %s344_s23 }
  0xe2   : > { %p8304_p5 = pnand %p7218_p11, %p8260_p3  ;;  %s9545_s25 = sld [smem:[#allocation37_spill]] }
  0xe3   : > { %s9543_s2 = scalar_select %p8298_p1, 1, 0 }
  0xe4   : > { %s348_s11 = scalar_lea.vmem [#allocation3], %s7146_s19  ;;  %s8315_s26 = scalar_lea.sflag [#allocation4], %s344_s23 }
  0xe5   : > { %s355_s0 = sshll.u32 %s348_s11, 4  ;;  %p7779_p12 = pneg %p8304_p5  ;;  %s8313_s0 = int_to_ptr.vmem [resolvable:$true] %s355_s0 }
  0xe8   : > { %s8311_s18 = scalar_lea.hbm %s9545_s25, %s7147_s1  ;;  %s7782_s16 = scalar_lea.hbm %s9545_s25, 9216 }
  0xe9   : > { %s7777_s30 = scalar_lea.hbm %s8311_s18, 4608  ;;  %p7783_p4 = scmp.lt.u32.totalorder %s8311_s18, %s9545_s25 }
  0xea   : > { %p7778_p3 = scmp.ne.s32.totalorder %s8311_s18, %s7777_s30  ;;  %p7784_p6 = scmp.lt.u32.totalorder %s7782_s16, %s7777_s30 }
  0xeb   : > { %p7786_p9 = scmp.lt.u32.totalorder %s7777_s30, %s8311_s18 }
  0xec   : > { %p7780_p13 = pnand %p7779_p12, %p7778_p3  ;;  %p7785_p8 = por %p7784_p6, %p7783_p4 }
  0xee   : > { %p7781_p2 = pneg %p7780_p13  ;;  %p7787_p7 = por %p7786_p9, %p7785_p8 }
  0xf0   : > { %p7788_p11 = pnand %p7787_p7, %p7781_p2 }
  0xf2   : > { %7791 = shalt.err (!%p7788_p11)
}
  0xf3   : > { %s7792_s23 = scalar_lea.vmem %s8313_s0, 4608  ;;  %s7958_s19 = smov [#allocation3]  }
  0xf4   : > { %p7793_p3 = scmp.ne.s32.totalorder %s8313_s0, %s7792_s23  ;;  %s7797_s11 = sshll.u32 %s7958_s19, 4  ;;  %s7798_s11 = int_to_ptr.vmem [resolvable:$false] %s7797_s11 }
  0xf5   : > { %s7799_s3 = scalar_lea.vmem %s7798_s11, 9216  ;;  %p7800_p10 = scmp.lt.s32.totalorder %s8313_s0, %s7798_s11 }
  0xf6   : > { %p7795_p13 = pnand %p7793_p3, %p7779_p12  ;;  %p7801_p4 = scmp.lt.s32.totalorder %s7799_s3, %s7792_s23 }
  0xf8   : > { %p7796_p1 = pneg %p7795_p13  ;;  %p7802_p6 = por %p7801_p4, %p7800_p10 }
  0xfa   : > { %p7803_p8 = pnand %p7802_p6, %p7796_p1 }
  0xfc   : > { %7806 = shalt.err (!%p7803_p8)
}
  0xfd   : > { %s9546_s4 = smov 4   ;;  %s9547_s30 = smov 64  }
  0xfe   : > { %7206 = dma.hbm_to_vmem [thread:$0]  (!%p8304_p5), %s8311_s18, 4608, %s8313_s0, %s8315_s26, %s9547_s30, %s9547_s30, %s9546_s4  }
  0xff   : > { %s9548_s1 = sld [smem:[#allocation28_spill]] }
 0x105   : > { %p9549_p12 = scmp.ne.s32.totalorder %s9548_s1, 0 }
 0x107   : > { %367 = sbr.rel (%p9549_p12) target bundleno = 1394 (0x572), region = 52 }
 0x10e   : > { %s369_s20 = sand.u32 1, %s7921_s9  }
 0x10f   : > { %s7148_s16 = smul.u32 288, %s369_s20  ;;  %s370_s23 = scalar_lea.sflag [#allocation4], %s369_s20 }
 0x111   : > { %s373_s19 = scalar_lea.vmem [#allocation3], %s7148_s16 }
 0x112   : > { %7880 = dma.done.wait (%p8270_p0), %s370_s23, 4608  }
 0x113   : > { %7882 = vsyncadd (%p8270_p0), %s370_s23, 4294962688  ;;  %p9550_p10 = scmp.ne.s32.totalorder %s9527_s17, 0 }
 0x115   : > { %7884 = dma.done.wait (%p9550_p10), [#allocation7], 10240  }
 0x116   : > { %7886 = vsyncadd (%p9550_p10), [#allocation7], 4294957056 }
 0x117   : > { %7888 = dma.done.wait (%p9550_p10), [#allocation10], 9232  }
 0x118   : > { %7890 = vsyncadd (%p9550_p10), [#allocation10], 4294958064 }
 0x119   : > { %7892 = dma.done.wait (%p9550_p10), [#allocation13], 1040  }
 0x11a   : > { %7894 = vsyncadd (%p9550_p10), [#allocation13], 4294966256 }
 0x11b   : > { %7896 = dma.done.wait (%p9550_p10), [#allocation16], 16  }
 0x11c   : > { %7898 = vsyncadd (%p9550_p10), [#allocation16], 4294967280  ;;  %s9551_s28 = sld [smem:[#allocation26_spill]]  ;;  %v7959_v0 = vmov 0   ;;  %v7331_v1 = vld [vmem:[#allocation8] sm:$0xff]   ;;  %v7332_v2 = vld [vmem:[#allocation8 + $0x8] sm:$0xff]  }
 0x11d   : > { %7329 = vset.pattern.permute.xlu0 %v7959_v0  ;;  %1386 = vst [vmem:[#allocation2 + $0xa0] sm:$0xf] %v7959_v0  ;;  %7330 = vset.pattern.permute.xlu1 %v7959_v0  ;;  %v7333_v3 = vld [vmem:[#allocation8 + $0x10] sm:$0xff]   ;;  %v7334_v4 = vld [vmem:[#allocation8 + $0x18] sm:$0xff]   ;;  %v7335_v8 = vld [vmem:[#allocation8 + $0x20] sm:$0xff]   ;;  %vm2140_vm1 = vcmask 1046528  }
 0x11e   : > { %6322 = vmatprep.subr.bf16.mxu0 %v7331_v1  ;;  %v7336_v11 = vld [vmem:[#allocation8 + $0x28] sm:$0xff]   ;;  %v7337_v14 = vld [vmem:[#allocation8 + $0x30] sm:$0xff]   ;;  %v7338_v17 = vld [vmem:[#allocation8 + $0x38] sm:$0xff]   ;;  %vm1536_vm0 = vsmask.f32 7424  ;;  %s9568_s26 = sld [smem:[#allocation25_spill]] }
 0x11f   : > { %6323 = vmatpush3.bf16.msra.mxu0 %v7331_v1  ;;  %s9569_s30 = sld [smem:[#allocation27_spill]]  ;;  %p9571_p1 = scmp.ne.s32.totalorder %s9542_s27, 0 }
 0x120   : > { %6324 = vmatprep.subr.bf16.mxu0 %v7332_v2 }
 0x122   : > { %s5893_s24 = sshll.u32 %s9551_s28, 7  ;;  %s5647_s0 = sshll.u32 %s9551_s28, 8 }
 0x123   : > { %s8370_s18 = scalar_lea.vmem %s373_s19, %s5893_s24 [#allocation3]  ;;  %6325 = vmatpush3.bf16.msra.mxu0 %v7332_v2  ;;  %s8374_s17 = scalar_lea.vmem [#allocation6], %s5647_s0 }
 0x124   : > { %6326 = vmatprep.subr.bf16.mxu0 %v7333_v3  ;;  %v7339_v5 = vld [vmem:[%s8370_s18] sm:$0xff]   ;;  %v504_v7 = vld [vmem:[%s8374_s17 + $0xb0] sm:$0xff]  ;;  %v503_v9 = vld [vmem:[%s8374_s17 + $0xa8] sm:$0xff]  ;;  %s431_s11 = sand.u32 1, %s9568_s26   ;;  %s5934_s1 = sshll.u32 %s9551_s28, 5 }
 0x125   : > { %6338 = vmatprep.mubr.bf16.mxu0 %v7339_v5  ;;  %v502_v6 = vld [vmem:[%s8374_s17 + $0xa0] sm:$0xff]  ;;  %1058 = vperm.xlu1 %7330, %v504_v7   ;;  %v505_v10 = vld [vmem:[%s8374_s17 + $0xb8] sm:$0xff]  ;;  %v507_v13 = vld [vmem:[%s8374_s17 + $0xc8] sm:$0xff]  ;;  %s5643_s3 = sshll.u32 %s431_s11, 8  ;;  %s5888_s20 = sshll.u32 %s9569_s30, 6 }
 0x126   : > { %1048 = vperm.xlu0 %7329, %v502_v6   ;;  %v506_v12 = vld [vmem:[%s8374_s17 + $0xc0] sm:$0xff]  ;;  %v508_v15 = vld [vmem:[%s8374_s17 + $0xd0] sm:$0xff]  ;;  %v509_v16 = vld [vmem:[%s8374_s17 + $0xd8] sm:$0xff]  ;;  %s9304_s4 = scalar_lea.vmem [#allocation17], %s5643_s3  ;;  %s5462_s16 = sadd.s32 %s5934_s1, %s5888_s20 }
 0x127   : > { %6327 = vmatpush3.bf16.msra.mxu0 %v7333_v3  ;;  %v510_v18 = vld [vmem:[%s8374_s17 + $0xe0] sm:$0xff]  ;;  %v511_v19 = vld [vmem:[%s8374_s17 + $0xe8] sm:$0xff]  ;;  %v444_v20 = vld [vmem:[%s8370_s18 + $0x10] sm:$0xff]   ;;  %s5465_s23 = sshll.u32 %s9304_s4, 4  ;;  %s5889_s19 = sshll.u32 %s5462_s16, 7  ;;  %s9422_s23 = int_to_ptr.vmem [resolvable:$true] %s5465_s23 }
 0x128   : > { %6328 = vmatprep.subr.bf16.mxu0 %v7334_v4  ;;  %v7340_v21 = vld [vmem:[%s8370_s18 + $0x8] sm:$0xff]   ;;  %v512_v22 = vld [vmem:[%s8374_s17 + $0xf0] sm:$0xff]  ;;  %v513_v23 = vld [vmem:[%s8374_s17 + $0xf8] sm:$0xff]  ;;  %s7807_s3 = scalar_lea.vmem %s9422_s23, 4096  ;;  %s7960_s30 = smov [#allocation17]  }
 0x129   : > { %1063 = vperm.xlu1 %7330, %v505_v10   ;;  %v514_v24 = vld [vmem:[%s8374_s17 + $0x100] sm:$0xff]  ;;  %v515_v25 = vld [vmem:[%s8374_s17 + $0x108] sm:$0xff]  ;;  %v446_v26 = vld [vmem:[%s8370_s18 + $0x18] sm:$0xff]   ;;  %p7808_p0 = scmp.ne.s32.totalorder %s9422_s23, %s7807_s3  ;;  %s7811_s1 = sshll.u32 %s7960_s30, 4  ;;  %s7812_s1 = int_to_ptr.vmem [resolvable:$false] %s7811_s1 }
 0x12a   : > { %1053 = vperm.xlu0 %7329, %v503_v9   ;;  %v448_v27 = vld [vmem:[%s8370_s18 + $0x20] sm:$0xff]   ;;  %v487_v29 = vld [vmem:[%s8374_s17 + $0x28] sm:$0xff]  ;;  %v516_v30 = vld [vmem:[%s8374_s17 + $0x110] sm:$0xff]  ;;  %s7813_s20 = scalar_lea.vmem %s7812_s1, 8192  ;;  %p7814_p9 = scmp.lt.s32.totalorder %s9422_s23, %s7812_s1 }
 0x12b   : > { %6329 = vmatpush3.bf16.msra.mxu0 %v7334_v4  ;;  %v486_v28 = vld [vmem:[%s8374_s17 + $0x20] sm:$0xff]  ;;  %v517_v31 = vld [vmem:[%s8374_s17 + $0x118] sm:$0xff]  ;;  %v450_v32 = vld [vmem:[%s8370_s18 + $0x28] sm:$0xff]   ;;  %p7809_p5 = pnand %p7808_p0, %p9571_p1  ;;  %p7815_p7 = scmp.lt.s32.totalorder %s7813_s20, %s7807_s3 }
 0x12c   : > { %6330 = vmatprep.subr.bf16.mxu0 %v7335_v8  ;;  %v452_v33 = vld [vmem:[%s8370_s18 + $0x30] sm:$0xff]   ;;  %v489_v35 = vld [vmem:[%s8374_s17 + $0x38] sm:$0xff]  ;;  %v490_v36 = vld [vmem:[%s8374_s17 + $0x40] sm:$0xff] }
 0x12d   : > { %1073 = vperm.xlu1 %7330, %v507_v13   ;;  %v488_v34 = vld [vmem:[%s8374_s17 + $0x30] sm:$0xff]  ;;  %v491_v37 = vld [vmem:[%s8374_s17 + $0x48] sm:$0xff]  ;;  %v454_v38 = vld [vmem:[%s8370_s18 + $0x38] sm:$0xff]   ;;  %p7810_p2 = pneg %p7809_p5  ;;  %p7816_p11 = por %p7815_p7, %p7814_p9 }
 0x12e   : > { %1068 = vperm.xlu0 %7329, %v506_v12   ;;  %v456_v39 = vld [vmem:[%s8370_s18 + $0x40] sm:$0xff]   ;;  %v492_v40 = vld [vmem:[%s8374_s17 + $0x50] sm:$0xff]  ;;  %v493_v41 = vld [vmem:[%s8374_s17 + $0x58] sm:$0xff] }
 0x12f   : > { %6331 = vmatpush3.bf16.msra.mxu0 %v7335_v8  ;;  %v494_v42 = vld [vmem:[%s8374_s17 + $0x60] sm:$0xff]  ;;  %v495_v43 = vld [vmem:[%s8374_s17 + $0x68] sm:$0xff]  ;;  %v460_v45 = vld [vmem:[%s8370_s18 + $0x50] sm:$0xff]   ;;  %p7817_p3 = pnand %p7816_p11, %p7810_p2 }
 0x130   : > { %6332 = vmatprep.subr.bf16.mxu0 %v7336_v11  ;;  %v458_v44 = vld [vmem:[%s8370_s18 + $0x48] sm:$0xff]   ;;  %v496_v46 = vld [vmem:[%s8374_s17 + $0x70] sm:$0xff]  ;;  %v497_v47 = vld [vmem:[%s8374_s17 + $0x78] sm:$0xff] }
 0x131   : > { %1083 = vperm.xlu1 %7330, %v509_v16   ;;  %v498_v48 = vld [vmem:[%s8374_s17 + $0x80] sm:$0xff]  ;;  %v499_v49 = vld [vmem:[%s8374_s17 + $0x88] sm:$0xff]  ;;  %v462_v50 = vld [vmem:[%s8370_s18 + $0x58] sm:$0xff]  }
 0x132   : > { %1078 = vperm.xlu0 %7329, %v508_v15   ;;  %v464_v51 = vld [vmem:[%s8370_s18 + $0x60] sm:$0xff]   ;;  %v500_v52 = vld [vmem:[%s8374_s17 + $0x90] sm:$0xff]  ;;  %v501_v53 = vld [vmem:[%s8374_s17 + $0x98] sm:$0xff] }
 0x133   : > { %6333 = vmatpush3.bf16.msra.mxu0 %v7336_v11  ;;  %v518_v54 = vld [vmem:[%s8374_s17 + $0x120] sm:$0xff]  ;;  %v519_v55 = vld [vmem:[%s8374_s17 + $0x128] sm:$0xff]  ;;  %v468_v57 = vld [vmem:[%s8370_s18 + $0x70] sm:$0xff]  }
 0x134   : > { %6334 = vmatprep.subr.bf16.mxu0 %v7337_v14  ;;  %v466_v56 = vld [vmem:[%s8370_s18 + $0x68] sm:$0xff]   ;;  %v482_v58 = vld [vmem:[%s8374_s17] sm:$0xff]  ;;  %v484_v60 = vld [vmem:[%s8374_s17 + $0x10] sm:$0xff] }
 0x135   : > { %1093 = vperm.xlu1 %7330, %v511_v19   ;;  %v483_v59 = vld [vmem:[%s8374_s17 + $0x8] sm:$0xff]  ;;  %v485_v61 = vld [vmem:[%s8374_s17 + $0x18] sm:$0xff]  ;;  %v472_v63 = vld [vmem:[%s8370_s18 + $0x80] sm:$0xff]  }
 0x136   : > { %1088 = vperm.xlu0 %7329, %v510_v18   ;;  %v470_v62 = vld [vmem:[%s8370_s18 + $0x78] sm:$0xff]   ;;  %v520_v0 = vld [vmem:[%s8374_s17 + $0x130] sm:$0xff]  ;;  %v474_v2 = vld [vmem:[%s8370_s18 + $0x88] sm:$0xff]  }
 0x137   : > { %6335 = vmatpush3.bf16.msra.mxu0 %v7337_v14  ;;  %v521_v1 = vld [vmem:[%s8374_s17 + $0x138] sm:$0xff]  ;;  %v476_v3 = vld [vmem:[%s8370_s18 + $0x90] sm:$0xff]   ;;  %v7359_v5 = vld [vmem:[#allocation11 + $0x40] sm:$0xff]   ;;  %s9434_s17 = scalar_lea.sflag [#allocation5], %s431_s11 }
 0x138   : > { %6336 = vmatprep.subr.bf16.mxu0 %v7338_v17  ;;  %v7358_v4 = vld [vmem:[%s8370_s18 + $0x98] sm:$0xff]   ;;  %v7360_v6 = vld [vmem:[#allocation11 + $0x48] sm:$0xff]   ;;  %v7363_v9 = vld [vmem:[#allocation11 + $0x60] sm:$0xff]  }
 0x139   : > { %1103 = vperm.xlu1 %7330, %v513_v23   ;;  %v7361_v7 = vld [vmem:[#allocation11 + $0x50] sm:$0xff]   ;;  %v7362_v8 = vld [vmem:[#allocation11 + $0x58] sm:$0xff]   ;;  %v7364_v10 = vld [vmem:[#allocation11 + $0x68] sm:$0xff]  }
 0x13a   : > { %1098 = vperm.xlu0 %7329, %v512_v22   ;;  %v7365_v13 = vld [vmem:[#allocation11 + $0x70] sm:$0xff]   ;;  %v7368_v14 = vld [vmem:[#allocation11 + $0xc0] sm:$0xff]   ;;  %v7369_v15 = vld [vmem:[#allocation11 + $0x78] sm:$0xff]  }
 0x13b   : > { %6337 = vmatpush3.bf16.msra.mxu0 %v7338_v17  ;;  %6858 = vmatprep.subr.bf16.mxu1 %v7368_v14  ;;  %v7370_v18 = vld [vmem:[#allocation11 + $0xc8] sm:$0xff]   ;;  %v7374_v22 = vld [vmem:[#allocation11 + $0xd8] sm:$0xff]  }
 0x13c   : > { %6378 = vmatprep.subr.bf16.mxu0 %v7359_v5  ;;  %6866 = vmatpush3.bf16.msra.mxu1 %v7368_v14 }
 0x13d   : > { %1113 = vperm.xlu1 %7330, %v515_v25   ;;  %6859 = vmatprep.subr.bf16.mxu1 %v7370_v18  ;;  %v7377_v25 = vld [vmem:[#allocation11 + $0xe0] sm:$0xff]  }
 0x13e   : > { %6339 = vmatmul.mubr.bf16.vlgmr.msra.gmra.mrb[0].mxu0 %v7340_v21  ;;  %1108 = vperm.xlu0 %7329, %v514_v24   ;;  %v7373_v21 = vld [vmem:[#allocation11 + $0xd0] sm:$0xff]  }
 0x13f   : > { %6342 = vmatprep.mubr.bf16.mxu0 %v444_v20  ;;  %6379 = vmatpush3.bf16.msra.mxu0 %v7359_v5 }
 0x140   : > { %6380 = vmatprep.subr.bf16.mxu0 %v7360_v6  ;;  %6867 = vmatpush3.bf16.msra.mxu1 %v7370_v18 }
 0x141   : > { %973 = vperm.xlu1 %7330, %v487_v29   ;;  %6860 = vmatprep.subr.bf16.mxu1 %v7373_v21  ;;  %v7381_v29 = vld [vmem:[#allocation11 + $0xf0] sm:$0xff]  }
 0x142   : > { %968 = vperm.xlu0 %7329, %v486_v28   ;;  %v7378_v28 = vld [vmem:[#allocation11 + $0xe8] sm:$0xff]  }
 0x143   : > { %6381 = vmatpush3.bf16.msra.mxu0 %v7360_v6 }
 0x144   : > { %6382 = vmatprep.subr.bf16.mxu0 %v7361_v7  ;;  %6868 = vmatpush3.bf16.msra.mxu1 %v7373_v21 }
 0x145   : > { %1123 = vperm.xlu1 %7330, %v517_v31   ;;  %6861 = vmatprep.subr.bf16.mxu1 %v7374_v22 }
 0x146   : > { %6343 = vmatmul.mubr.bf16.gmra.mrb[4].mxu0 %v446_v26  ;;  %1118 = vperm.xlu0 %7329, %v516_v30  }
 0x147   : > { %6346 = vmatprep.mubr.bf16.mxu0 %v448_v27  ;;  %6383 = vmatpush3.bf16.msra.mxu0 %v7361_v7 }
 0x148   : > { %6384 = vmatprep.subr.bf16.mxu0 %v7362_v8  ;;  %6869 = vmatpush3.bf16.msra.mxu1 %v7374_v22 }
 0x149   : > { %983 = vperm.xlu1 %7330, %v489_v35   ;;  %6862 = vmatprep.subr.bf16.mxu1 %v7377_v25  ;;  %v8463_v35 = vld [vmem:[#allocation11 + $0x100] sm:$0xff]  }
 0x14a   : > { %978 = vperm.xlu0 %7329, %v488_v34  }
 0x14b   : > { %6385 = vmatpush3.bf16.msra.mxu0 %v7362_v8 }
 0x14c   : > { %6386 = vmatprep.subr.bf16.mxu0 %v7363_v9  ;;  %6870 = vmatpush3.bf16.msra.mxu1 %v7377_v25 }
 0x14d   : > { %993 = vperm.xlu1 %7330, %v491_v37   ;;  %6863 = vmatprep.subr.bf16.mxu1 %v7378_v28 }
 0x14e   : > { %6347 = vmatmul.mubr.bf16.gmra.mrb[8].mxu0 %v450_v32  ;;  %988 = vperm.xlu0 %7329, %v490_v36   ;;  %v7382_v32 = vld [vmem:[#allocation11 + $0xf8] sm:$0xff]  }
 0x14f   : > { %6350 = vmatprep.mubr.bf16.mxu0 %v452_v33  ;;  %6387 = vmatpush3.bf16.msra.mxu0 %v7363_v9 }
 0x150   : > { %6388 = vmatprep.subr.bf16.mxu0 %v7364_v10  ;;  %6871 = vmatpush3.bf16.msra.mxu1 %v7378_v28 }
 0x151   : > { %1003 = vperm.xlu1 %7330, %v493_v41   ;;  %6864 = vmatprep.subr.bf16.mxu1 %v7381_v29 }
 0x152   : > { %998 = vperm.xlu0 %7329, %v492_v40  }
 0x153   : > { %6389 = vmatpush3.bf16.msra.mxu0 %v7364_v10 }
 0x154   : > { %6390 = vmatprep.subr.bf16.mxu0 %v7365_v13  ;;  %6872 = vmatpush3.bf16.msra.mxu1 %v7381_v29 }
 0x155   : > { %1013 = vperm.xlu1 %7330, %v495_v43   ;;  %6865 = vmatprep.subr.bf16.mxu1 %v7382_v32 }
 0x156   : > { %6351 = vmatmul.mubr.bf16.gmra.mrb[12].mxu0 %v454_v38  ;;  %1008 = vperm.xlu0 %7329, %v494_v42   ;;  %v8466_v38 = vld [vmem:[#allocation11] sm:$0xff]  }
 0x157   : > { %6354 = vmatprep.mubr.bf16.mxu0 %v456_v39  ;;  %6391 = vmatpush3.bf16.msra.mxu0 %v7365_v13 }
 0x158   : > { %6392 = vmatprep.subr.bf16.mxu0 %v7369_v15  ;;  %6873 = vmatpush3.bf16.msra.mxu1 %v7382_v32 }
 0x159   : > { %1023 = vperm.xlu1 %7330, %v497_v47   ;;  %6570 = vmatprep.subr.bf16.mxu1 %v8463_v35 }
 0x15a   : > { %1018 = vperm.xlu0 %7329, %v496_v46  }
 0x15b   : > { %6393 = vmatpush3.bf16.msra.mxu0 %v7369_v15 }
 0x15c   : > { %6426 = vmatprep.subr.bf16.mxu0 %v8466_v38 }
 0x15d   : > { %1033 = vperm.xlu1 %7330, %v499_v49  }
 0x15e   : > { %6355 = vmatmul.mubr.bf16.gmra.mrb[16].mxu0 %v458_v44  ;;  %1028 = vperm.xlu0 %7329, %v498_v48  }
 0x15f   : > { %6358 = vmatprep.mubr.bf16.mxu0 %v460_v45 }
 0x161   : > { %1043 = vperm.xlu1 %7330, %v501_v53  }
 0x162   : > { %1038 = vperm.xlu0 %7329, %v500_v52  }
 0x165   : > { %1133 = vperm.xlu1 %7330, %v519_v55  }
 0x166   : > { %6359 = vmatmul.mubr.bf16.gmra.mrb[20].mxu0 %v462_v50  ;;  %1128 = vperm.xlu0 %7329, %v518_v54  }
 0x167   : > { %6362 = vmatprep.mubr.bf16.mxu0 %v464_v51 }
 0x169   : > { %953 = vperm.xlu1 %7330, %v483_v59  }
 0x16a   : > { %948 = vperm.xlu0 %7329, %v482_v58   ;;  %v8501_v58 = vld [vmem:[#allocation9] ss:$0 sm:$0xff] }
 0x16d   : > { %963 = vperm.xlu1 %7330, %v485_v61  }
 0x16e   : > { %6363 = vmatmul.mubr.bf16.gmra.mrb[24].mxu0 %v466_v56  ;;  %958 = vperm.xlu0 %7329, %v484_v60  }
 0x16f   : > { %6366 = vmatprep.mubr.bf16.mxu0 %v468_v57 }
 0x171   : > { %1143 = vperm.xlu1 %7330, %v521_v1  }
 0x172   : > { %1138 = vperm.xlu0 %7329, %v520_v0  }
 0x176   : > { %6367 = vmatmul.mubr.bf16.gmra.mrb[28].mxu0 %v470_v62 }
 0x177   : > { %6370 = vmatprep.mubr.bf16.mxu0 %v472_v63 }
 0x17e   : > { %6371 = vmatmul.mubr.bf16.gmra.mrb[32].mxu0 %v474_v2 }
 0x17f   : > { %6374 = vmatprep.mubr.bf16.mxu0 %v476_v3 }
 0x186   : > { %6375 = vmatmul.mubr.bf16.gmra.mrb[36].mxu0 %v7358_v4 }
 0x1a4   : > { %v8437_v12 = vpop.permute.xlu1 %1058 }
 0x1a5   : > { %v8435_v11 = vpop.permute.xlu0 %1048 }
 0x1a8   : > { %v8441_v17 = vpop.permute.xlu1 %1063 }
 0x1a9   : > { %v8439_v16 = vpop.permute.xlu0 %1053 }
 0x1ac   : > { %v8445_v20 = vpop.permute.xlu1 %1073 }
 0x1ad   : > { %v8443_v19 = vpop.permute.xlu0 %1068 }
 0x1b0   : > { %v8449_v24 = vpop.permute.xlu1 %1083 }
 0x1b1   : > { %v8447_v23 = vpop.permute.xlu0 %1078 }
 0x1b4   : > { %v8453_v27 = vpop.permute.xlu1 %1093 }
 0x1b5   : > { %v8451_v26 = vpop.permute.xlu0 %1088 }
 0x1b8   : > { %v8457_v31 = vpop.permute.xlu1 %1103 }
 0x1b9   : > { %v8455_v30 = vpop.permute.xlu0 %1098 }
 0x1bc   : > { %v8461_v34 = vpop.permute.xlu1 %1113 }
 0x1bd   : > { %v8459_v33 = vpop.permute.xlu0 %1108 }
 0x1c0   : > { %v974_v37 = vpop.permute.xlu1 %973 }
 0x1c1   : > { %v969_v36 = vpop.permute.xlu0 %968 }
 0x1c4   : > { %v8471_v40 = vpop.permute.xlu1 %1123 }
 0x1c5   : > { %v8469_v39 = vpop.permute.xlu0 %1118 }
 0x1c8   : > { %v984_v42 = vpop.permute.xlu1 %983 }
 0x1c9   : > { %v979_v41 = vpop.permute.xlu0 %978 }
 0x1cc   : > { %v8475_v44 = vpop.permute.xlu1 %993 }
 0x1cd   : > { %v8473_v43 = vpop.permute.xlu0 %988 }
 0x1d0   : > { %v8479_v46 = vpop.permute.xlu1 %1003 }
 0x1d1   : > { %v8477_v45 = vpop.permute.xlu0 %998 }
 0x1d4   : > { %v8483_v48 = vpop.permute.xlu1 %1013 }
 0x1d5   : > { %v8481_v47 = vpop.permute.xlu0 %1008 }
 0x1d8   : > { %v8487_v50 = vpop.permute.xlu1 %1023 }
 0x1d9   : > { %v8485_v49 = vpop.permute.xlu0 %1018 }
 0x1dc   : > { %v8491_v52 = vpop.permute.xlu1 %1033 }
 0x1dd   : > { %v8489_v51 = vpop.permute.xlu0 %1028 }
 0x1e0   : > { %v8495_v54 = vpop.permute.xlu1 %1043 }
 0x1e1   : > { %v8493_v53 = vpop.permute.xlu0 %1038 }
 0x1e4   : > { %v8499_v56 = vpop.permute.xlu1 %1133 }
 0x1e5   : > { %v8497_v55 = vpop.permute.xlu0 %1128 }
 0x1e8   : > { %v954_v59 = vpop.permute.xlu1 %953 }
 0x1e9   : > { %v949_v57 = vpop.permute.xlu0 %948 }
 0x1ec   : > { %v964_v7 = vpop.permute.xlu1 %963 }
 0x1ed   : > { %v959_v6 = vpop.permute.xlu0 %958 }
 0x211   : > { %v6340_v60 = vpop.f32.mrb[0].mxu0 }
 0x212   : > { %v756_v61 = vadd.f32 %v6340_v60, %v8501_v58  ;;  %v747_v62 = vpop.f32.mrb[1].mxu0 }
 0x213   : > { %v748_v63 = vadd.f32 %v8501_v58, %v747_v62  ;;  %v6341_v0 = vpop.f32.mrb[2].mxu0 }
 0x214   : > { %v908_v1 = vmax.f32 %v756_v61, 0.0  ;;  %v759_v2 = vadd.f32 %v6341_v0, %v8501_v58  ;;  %v750_v3 = vpop.f32.mrb[3].mxu0 }
 0x215   : > { %v906_v4 = vmax.f32 %v748_v63, 0.0  ;;  %v751_v5 = vadd.f32 %v8501_v58, %v750_v3 }
 0x216   : > { %v909_v8 = vmax.f32 %v759_v2, 0.0  ;;  %v1148_v10 = vmul.f32 %v959_v6, %v908_v1 }
 0x217   : > { %v907_v9 = vmax.f32 %v751_v5, 0.0  ;;  %v1146_v14 = vmul.f32 %v949_v57, %v906_v4 }
 0x218   : > { %v1149_v13 = vmul.f32 %v964_v7, %v909_v8 }
 0x219   : > { %v1147_v15 = vmul.f32 %v954_v59, %v907_v9  ;;  %v6344_v18 = vpop.f32.mrb[4].mxu0 }
 0x21a   : > { %v5943_v21 = vpack.c.bf16 %v1149_v13, %v1148_v10  ;;  %v772_v22 = vadd.f32 %v6344_v18, %v8501_v58  ;;  %v763_v25 = vpop.f32.mrb[5].mxu0 }
 0x21b   : > { %v5938_v28 = vpack.c.bf16 %v1147_v15, %v1146_v14  ;;  %v764_v29 = vadd.f32 %v8501_v58, %v763_v25  ;;  %v6345_v32 = vpop.f32.mrb[6].mxu0 }
 0x21c   : > { %6035 = vst [vmem:[#allocation2 + $0x8] sm:$0xff] %v5943_v21   ;;  %v912_v60 = vmax.f32 %v772_v22, 0.0  ;;  %v775_v61 = vadd.f32 %v6345_v32, %v8501_v58  ;;  %v766_v62 = vpop.f32.mrb[7].mxu0 }
 0x21d   : > { %5939 = vst [vmem:[#allocation2] sm:$0xff] %v5938_v28   ;;  %v910_v63 = vmax.f32 %v764_v29, 0.0  ;;  %v767_v0 = vadd.f32 %v8501_v58, %v766_v62 }
 0x21e   : > { %v913_v57 = vmax.f32 %v775_v61, 0.0  ;;  %v1152_v1 = vmul.f32 %v979_v41, %v912_v60 }
 0x21f   : > { %v911_v59 = vmax.f32 %v767_v0, 0.0  ;;  %v1150_v3 = vmul.f32 %v969_v36, %v910_v63 }
 0x220   : > { %v1153_v2 = vmul.f32 %v984_v42, %v913_v57 }
 0x221   : > { %v1151_v4 = vmul.f32 %v974_v37, %v911_v59  ;;  %v6348_v5 = vpop.f32.mrb[8].mxu0 }
 0x222   : > { %v5953_v6 = vpack.c.bf16 %v1153_v2, %v1152_v1  ;;  %v788_v7 = vadd.f32 %v6348_v5, %v8501_v58  ;;  %v779_v8 = vpop.f32.mrb[9].mxu0 }
 0x223   : > { %v5948_v9 = vpack.c.bf16 %v1151_v4, %v1150_v3  ;;  %v780_v10 = vadd.f32 %v8501_v58, %v779_v8  ;;  %v6349_v13 = vpop.f32.mrb[10].mxu0  ;;  %v8513_v14 = vld [vmem:[#allocation2 + $0x8] sm:$0xff]  }
 0x224   : > { %6037 = vst [vmem:[#allocation2 + $0x18] sm:$0xff] %v5953_v6   ;;  %v916_v15 = vmax.f32 %v788_v7, 0.0  ;;  %v791_v18 = vadd.f32 %v6349_v13, %v8501_v58  ;;  %v782_v21 = vpop.f32.mrb[11].mxu0  ;;  %v1387_v41 = vld [vmem:[#allocation2] sm:$0xf]  ;;  %v1545_v28 = vshll.u32 %v8513_v14, 16 }
 0x225   : > { %v1388_v42 = vld [vmem:[#allocation2 + $0x4] sm:$0xf]  ;;  %6036 = vst [vmem:[#allocation2 + $0x10] sm:$0xff] %v5948_v9   ;;  %v914_v36 = vmax.f32 %v780_v10, 0.0  ;;  %v783_v37 = vadd.f32 %v8501_v58, %v782_v21  ;;  %v1549_v21 = vshrl.u32 %v8513_v14, 16 }
 0x226   : > { %v8517_v22 = vcombine.low %v1387_v41, %v1388_v42  ;;  %v917_v25 = vmax.f32 %v791_v18, 0.0  ;;  %v1156_v60 = vmul.f32 %v8477_v45, %v916_v15  ;;  %v1547_v4 = vrot.slane %v1545_v28, 1 }
 0x227   : > { %v915_v29 = vmax.f32 %v783_v37, 0.0  ;;  %v1154_v62 = vmul.f32 %v8473_v43, %v914_v36 }
 0x228   : > { %v1540_v32 = vshll.u32 %v8517_v22, 16  ;;  %v1157_v61 = vmul.f32 %v8479_v46, %v917_v25  ;;  %v1538_v57 = vshrl.u32 %v8517_v22, 16  ;;  %v1551_v28 = vor.u32 %v1549_v21, %v1547_v4 }
 0x229   : > { %v1155_v63 = vmul.f32 %v8475_v44, %v915_v29  ;;  %v6352_v0 = vpop.f32.mrb[12].mxu0 }
 0x22a   : > { %v1542_v59 = vrot.slane %v1540_v32, 1  ;;  %v5963_v1 = vpack.c.bf16 %v1157_v61, %v1156_v60  ;;  %v804_v2 = vadd.f32 %v6352_v0, %v8501_v58  ;;  %v795_v3 = vpop.f32.mrb[13].mxu0 }
 0x22b   : > { %v5958_v5 = vpack.c.bf16 %v1155_v63, %v1154_v62  ;;  %v796_v6 = vadd.f32 %v8501_v58, %v795_v3  ;;  %v6353_v45 = vpop.f32.mrb[14].mxu0  ;;  %v7372_v46 = vld [vmem:[#allocation2 + $0x18] sm:$0xff]   ;;  %v7394_v63 = vld [vmem:[#allocation11 + $0x8] sm:$0xff]  }
 0x22c   : > { %v1543_v7 = vor.u32 %v1542_v59, %v1538_v57  ;;  %6039 = vst [vmem:[#allocation2 + $0x28] sm:$0xff] %v5963_v1   ;;  %v920_v43 = vmax.f32 %v804_v2, 0.0  ;;  %v807_v44 = vadd.f32 %v6353_v45, %v8501_v58  ;;  %v798_v8 = vpop.f32.mrb[15].mxu0  ;;  %v8531_v15 = vld [vmem:[#allocation2 + $0x10] sm:$0xff]   ;;  %v1561_v41 = vshll.u32 %v7372_v46, 16 }
 0x22d   : > { %6038 = vst [vmem:[#allocation2 + $0x20] sm:$0xff] %v5958_v5   ;;  %v918_v9 = vmax.f32 %v796_v6, 0.0  ;;  %v799_v10 = vadd.f32 %v8501_v58, %v798_v8  ;;  %v1553_v36 = vshll.u32 %v8531_v15, 16  ;;  %v1557_v62 = vshrl.u32 %v8531_v15, 16 }
 0x22e   : > { %v1548_v13 = vsel %vm1536_vm0, %v1543_v7, %v1547_v4  ;;  %v921_v18 = vmax.f32 %v807_v44, 0.0  ;;  %v1160_v37 = vmul.f32 %v8485_v49, %v920_v43  ;;  %v1563_v1 = vrot.slane %v1561_v41, 1 }
 0x22f   : > { %6394 = vmatprep.mubr.bf16.mxu0 %v1548_v13  ;;  %v919_v42 = vmax.f32 %v799_v10, 0.0  ;;  %v1158_v29 = vmul.f32 %v8481_v47, %v918_v9  ;;  %v1555_v61 = vrot.slane %v1553_v36, 1  ;;  %v1565_v9 = vshrl.u32 %v7372_v46, 16  ;;  %v7398_v13 = vld [vmem:[#allocation11 + $0x10] sm:$0xff]  }
 0x230   : > { %v1161_v25 = vmul.f32 %v8487_v50, %v921_v18 }
 0x231   : > { %v1159_v32 = vmul.f32 %v8483_v48, %v919_v42  ;;  %v6356_v60 = vpop.f32.mrb[16].mxu0  ;;  %v1556_v50 = vsel %vm1536_vm0, %v1551_v28, %v1555_v61  ;;  %v1559_v4 = vor.u32 %v1557_v62, %v1555_v61  ;;  %v1567_v36 = vor.u32 %v1565_v9, %v1563_v1 }
 0x232   : > { %v5973_v0 = vpack.c.bf16 %v1161_v25, %v1160_v37  ;;  %v820_v57 = vadd.f32 %v6356_v60, %v8501_v58  ;;  %v811_v59 = vpop.f32.mrb[17].mxu0  ;;  %6395 = vmatmul.mubr.bf16.vlgmr.msra.gmra.mrb[40].mxu0 %v1556_v50 }
 0x233   : > { %v5968_v2 = vpack.c.bf16 %v1159_v32, %v1158_v29  ;;  %v812_v49 = vadd.f32 %v8501_v58, %v811_v59  ;;  %v6357_v3 = vpop.f32.mrb[18].mxu0  ;;  %v8543_v47 = vld [vmem:[#allocation2 + $0x28] sm:$0xff]   ;;  %v1564_v43 = vsel %vm1536_vm0, %v1559_v4, %v1563_v1  ;;  %6427 = vmatpush3.bf16.msra.mxu0 %v8466_v38  ;;  %v7402_v29 = vld [vmem:[#allocation11 + $0x18] sm:$0xff]  }
 0x234   : > { %6041 = vst [vmem:[#allocation2 + $0x38] sm:$0xff] %v5973_v0   ;;  %v924_v48 = vmax.f32 %v820_v57, 0.0  ;;  %v823_v5 = vadd.f32 %v6357_v3, %v8501_v58  ;;  %v814_v6 = vpop.f32.mrb[19].mxu0  ;;  %v8548_v44 = vld [vmem:[#allocation2 + $0x20] sm:$0xff]   ;;  %6398 = vmatprep.mubr.bf16.mxu0 %v1564_v43  ;;  %v1577_v10 = vshll.u32 %v8543_v47, 16  ;;  %6428 = vmatprep.subr.bf16.mxu0 %v7394_v63 }
 0x235   : > { %6040 = vst [vmem:[#allocation2 + $0x30] sm:$0xff] %v5968_v2   ;;  %v922_v45 = vmax.f32 %v812_v49, 0.0  ;;  %v815_v7 = vadd.f32 %v8501_v58, %v814_v6  ;;  %v1569_v21 = vshll.u32 %v8548_v44, 16  ;;  %v1573_v46 = vshrl.u32 %v8548_v44, 16  ;;  %v7406_v6 = vld [vmem:[#allocation11 + $0x20] sm:$0xff]  }
 0x236   : > { %v925_v8 = vmax.f32 %v823_v5, 0.0  ;;  %v1164_v41 = vmul.f32 %v8493_v53, %v924_v48  ;;  %v1579_v62 = vrot.slane %v1577_v10, 1  ;;  %v1581_v48 = vshrl.u32 %v8543_v47, 16 }
 0x237   : > { %v923_v18 = vmax.f32 %v815_v7, 0.0  ;;  %v1162_v37 = vmul.f32 %v8489_v51, %v922_v45  ;;  %v1571_v28 = vrot.slane %v1569_v21, 1  ;;  %6429 = vmatpush3.bf16.msra.mxu0 %v7394_v63 }
 0x238   : > { %v1165_v42 = vmul.f32 %v8495_v54, %v925_v8  ;;  %6430 = vmatprep.subr.bf16.mxu0 %v7398_v13  ;;  %v1583_v9 = vor.u32 %v1581_v48, %v1579_v62 }
 0x239   : > { %v1163_v25 = vmul.f32 %v8491_v52, %v923_v18  ;;  %v6360_v38 = vpop.f32.mrb[20].mxu0  ;;  %v1572_v51 = vsel %vm1536_vm0, %v1567_v36, %v1571_v28  ;;  %v1575_v57 = vor.u32 %v1573_v46, %v1571_v28 }
 0x23a   : > { %v5983_v32 = vpack.c.bf16 %v1165_v42, %v1164_v41  ;;  %v836_v60 = vadd.f32 %v6360_v38, %v8501_v58  ;;  %v827_v61 = vpop.f32.mrb[21].mxu0  ;;  %6399 = vmatmul.mubr.bf16.gmra.mrb[44].mxu0 %v1572_v51  ;;  %v7410_v41 = vld [vmem:[#allocation11 + $0x28] sm:$0xff]  }
 0x23b   : > { %v5978_v53 = vpack.c.bf16 %v1163_v25, %v1162_v37  ;;  %v828_v54 = vadd.f32 %v8501_v58, %v827_v61  ;;  %v6361_v0 = vpop.f32.mrb[22].mxu0  ;;  %v8561_v52 = vld [vmem:[#allocation2 + $0x38] sm:$0xff]   ;;  %v1580_v3 = vsel %vm1536_vm0, %v1575_v57, %v1579_v62  ;;  %6431 = vmatpush3.bf16.msra.mxu0 %v7398_v13 }
 0x23c   : > { %6043 = vst [vmem:[#allocation2 + $0x48] sm:$0xff] %v5983_v32   ;;  %v928_v59 = vmax.f32 %v836_v60, 0.0  ;;  %v839_v63 = vadd.f32 %v6361_v0, %v8501_v58  ;;  %v830_v1 = vpop.f32.mrb[23].mxu0  ;;  %v8566_v50 = vld [vmem:[#allocation2 + $0x30] sm:$0xff]   ;;  %6402 = vmatprep.mubr.bf16.mxu0 %v1580_v3  ;;  %v1593_v5 = vshll.u32 %v8561_v52, 16  ;;  %6432 = vmatprep.subr.bf16.mxu0 %v7402_v29  ;;  %v1597_v0 = vshrl.u32 %v8561_v52, 16 }
 0x23d   : > { %6042 = vst [vmem:[#allocation2 + $0x40] sm:$0xff] %v5978_v53   ;;  %v926_v2 = vmax.f32 %v828_v54, 0.0  ;;  %v831_v49 = vadd.f32 %v8501_v58, %v830_v1  ;;  %v1585_v7 = vshll.u32 %v8566_v50, 16  ;;  %v1589_v47 = vshrl.u32 %v8566_v50, 16  ;;  %v7416_v57 = vld [vmem:[#allocation11 + $0x30] sm:$0xff]  }
 0x23e   : > { %v929_v4 = vmax.f32 %v839_v63, 0.0  ;;  %v1168_v43 = vmul.f32 %v8437_v12, %v928_v59  ;;  %v1595_v25 = vrot.slane %v1593_v5, 1 }
 0x23f   : > { %v927_v45 = vmax.f32 %v831_v49, 0.0  ;;  %v1166_v10 = vmul.f32 %v8435_v11, %v926_v2  ;;  %v1587_v21 = vrot.slane %v1585_v7, 1  ;;  %6433 = vmatpush3.bf16.msra.mxu0 %v7402_v29 }
 0x240   : > { %v1169_v8 = vmul.f32 %v8441_v17, %v929_v4  ;;  %6434 = vmatprep.subr.bf16.mxu0 %v7406_v6  ;;  %v1599_v49 = vor.u32 %v1597_v0, %v1595_v25 }
 0x241   : > { %v1167_v13 = vmul.f32 %v8439_v16, %v927_v45  ;;  %v6364_v18 = vpop.f32.mrb[24].mxu0  ;;  %v1588_v11 = vsel %vm1536_vm0, %v1583_v9, %v1587_v21  ;;  %v1591_v28 = vor.u32 %v1589_v47, %v1587_v21  ;;  %v7388_v47 = vld [vmem:[#allocation11 + $0x108] sm:$0xff]  }
 0x242   : > { %v5993_v42 = vpack.c.bf16 %v1169_v8, %v1168_v43  ;;  %v852_v36 = vadd.f32 %v6364_v18, %v8501_v58  ;;  %v843_v37 = vpop.f32.mrb[25].mxu0  ;;  %6403 = vmatmul.mubr.bf16.gmra.mrb[48].mxu0 %v1588_v11  ;;  %v7418_v8 = vld [vmem:[#allocation11 + $0x38] sm:$0xff]  }
 0x243   : > { %v5988_v12 = vpack.c.bf16 %v1167_v13, %v1166_v10  ;;  %v844_v17 = vadd.f32 %v8501_v58, %v843_v37  ;;  %v6365_v38 = vpop.f32.mrb[26].mxu0  ;;  %v8579_v16 = vld [vmem:[#allocation2 + $0x48] sm:$0xff]   ;;  %v1596_v62 = vsel %vm1536_vm0, %v1591_v28, %v1595_v25  ;;  %6435 = vmatpush3.bf16.msra.mxu0 %v7406_v6 }
 0x244   : > { %6045 = vst [vmem:[#allocation2 + $0x58] sm:$0xff] %v5993_v42   ;;  %v932_v46 = vmax.f32 %v852_v36, 0.0  ;;  %v855_v29 = vadd.f32 %v6365_v38, %v8501_v58  ;;  %v846_v32 = vpop.f32.mrb[27].mxu0  ;;  %v8584_v53 = vld [vmem:[#allocation2 + $0x40] sm:$0xff]   ;;  %6406 = vmatprep.mubr.bf16.mxu0 %v1596_v62  ;;  %v1609_v51 = vshll.u32 %v8579_v16, 16  ;;  %6436 = vmatprep.subr.bf16.mxu0 %v7410_v41  ;;  %v1613_v28 = vshrl.u32 %v8579_v16, 16 }
 0x245   : > { %6044 = vst [vmem:[#allocation2 + $0x50] sm:$0xff] %v5988_v12   ;;  %v930_v60 = vmax.f32 %v844_v17, 0.0  ;;  %v847_v61 = vadd.f32 %v8501_v58, %v846_v32  ;;  %v1601_v63 = vshll.u32 %v8584_v53, 16  ;;  %v1605_v52 = vshrl.u32 %v8584_v53, 16  ;;  %v2817_v38 = vld [vmem:[#allocation2 + $0x10] sm:$0xf] }
 0x246   : > { %v933_v54 = vmax.f32 %v855_v29, 0.0  ;;  %v1172_v1 = vmul.f32 %v8447_v23, %v932_v46  ;;  %v1611_v43 = vrot.slane %v1609_v51, 1 }
 0x247   : > { %v931_v59 = vmax.f32 %v847_v61, 0.0  ;;  %v1170_v3 = vmul.f32 %v8443_v19, %v930_v60  ;;  %v1603_v5 = vrot.slane %v1601_v63, 1  ;;  %6437 = vmatpush3.bf16.msra.mxu0 %v7410_v41  ;;  %v8598_v41 = vld [vmem:[#allocation11 + $0x80] sm:$0xff]   ;;  %v8610_v61 = vld [vmem:[#allocation2 + $0x14] sm:$0xf] }
 0x248   : > { %v1173_v2 = vmul.f32 %v8449_v24, %v933_v54  ;;  %6438 = vmatprep.subr.bf16.mxu0 %v7416_v57  ;;  %v1615_v51 = vor.u32 %v1613_v28, %v1611_v43 }
 0x249   : > { %v1171_v4 = vmul.f32 %v8445_v20, %v931_v59  ;;  %v6368_v48 = vpop.f32.mrb[28].mxu0  ;;  %v1604_v19 = vsel %vm1536_vm0, %v1599_v49, %v1603_v5  ;;  %v1607_v10 = vor.u32 %v1605_v52, %v1603_v5 }
 0x24a   : > { %v6003_v6 = vpack.c.bf16 %v1173_v2, %v1172_v1  ;;  %v868_v45 = vadd.f32 %v6368_v48, %v8501_v58  ;;  %v859_v7 = vpop.f32.mrb[29].mxu0  ;;  %6407 = vmatmul.mubr.bf16.gmra.mrb[52].mxu0 %v1604_v19  ;;  %v7393_v2 = vld [vmem:[#allocation11 + $0x110] sm:$0xff]  }
 0x24b   : > { %v5998_v23 = vpack.c.bf16 %v1171_v4, %v1170_v3  ;;  %v860_v24 = vadd.f32 %v8501_v58, %v859_v7  ;;  %v6369_v9 = vpop.f32.mrb[30].mxu0  ;;  %v7387_v21 = vld [vmem:[#allocation2 + $0x58] sm:$0xff]   ;;  %v1612_v37 = vsel %vm1536_vm0, %v1607_v10, %v1611_v43  ;;  %6439 = vmatpush3.bf16.msra.mxu0 %v7416_v57  ;;  %v8621_v3 = vcombine.low %v2817_v38, %v8610_v61 }
 0x24c   : > { %6047 = vst [vmem:[#allocation2 + $0x68] sm:$0xff] %v6003_v6   ;;  %v936_v20 = vmax.f32 %v868_v45, 0.0  ;;  %v871_v13 = vadd.f32 %v6369_v9, %v8501_v58  ;;  %v862_v18 = vpop.f32.mrb[31].mxu0  ;;  %v7385_v25 = vld [vmem:[#allocation2 + $0x50] sm:$0xff]   ;;  %6410 = vmatprep.mubr.bf16.mxu0 %v1612_v37  ;;  %6440 = vmatprep.subr.bf16.mxu0 %v7418_v8  ;;  %v8605_v46 = vld [vmem:[#allocation2 + $0x58] sm:$0xff]  }
 0x24d   : > { %6046 = vst [vmem:[#allocation2 + $0x60] sm:$0xff] %v5998_v23   ;;  %v934_v42 = vmax.f32 %v860_v24, 0.0  ;;  %v863_v36 = vadd.f32 %v8501_v58, %v862_v18  ;;  %v8602_v17 = vld [vmem:[#allocation2 + $0x50] sm:$0xff]   ;;  %6554 = vmatprep.mubr.bf16.mxu1 %v7385_v25  ;;  %v1625_v57 = vshll.u32 %v8605_v46, 16  ;;  %v7396_v45 = vld [vmem:[#allocation11 + $0x118] sm:$0xff]  }
 0x24e   : > { %v937_v12 = vmax.f32 %v871_v13, 0.0  ;;  %v1176_v29 = vmul.f32 %v8455_v30, %v936_v20  ;;  %6555 = vmatmul.mubr.bf16.vlgmr.msra.gmra.mrb[0].mxu1 %v7387_v21  ;;  %v1617_v60 = vshll.u32 %v8602_v17, 16  ;;  %v1621_v1 = vshrl.u32 %v8602_v17, 16 }
 0x24f   : > { %v935_v11 = vmax.f32 %v863_v36, 0.0  ;;  %v1174_v62 = vmul.f32 %v8451_v26, %v934_v42  ;;  %6571 = vmatpush3.bf16.msra.mxu1 %v8463_v35  ;;  %6441 = vmatpush3.bf16.msra.mxu0 %v7418_v8  ;;  %v1627_v49 = vrot.slane %v1625_v57, 1  ;;  %v1629_v20 = vshrl.u32 %v8605_v46, 16 }
 0x250   : > { %v1177_v32 = vmul.f32 %v8457_v31, %v937_v12  ;;  %6572 = vmatprep.subr.bf16.mxu1 %v7388_v47  ;;  %v1619_v63 = vrot.slane %v1617_v60, 1  ;;  %6474 = vmatprep.subr.bf16.mxu0 %v8598_v41  ;;  %v2953_v42 = vshll.u32 %v8621_v3, 16  ;;  %v7401_v60 = vld [vmem:[#allocation11 + $0x120] sm:$0xff]  }
 0x251   : > { %v1175_v54 = vmul.f32 %v8453_v27, %v935_v11  ;;  %v6372_v0 = vpop.f32.mrb[32].mxu0  ;;  %v1631_v12 = vor.u32 %v1629_v20, %v1627_v49  ;;  %v8639_v11 = vld [vmem:[#allocation2 + $0x18] sm:$0xff]   ;;  %v2951_v20 = vshrl.u32 %v8621_v3, 16 }
 0x252   : > { %v6013_v59 = vpack.c.bf16 %v1177_v32, %v1176_v29  ;;  %v884_v30 = vadd.f32 %v6372_v0, %v8501_v58  ;;  %v875_v31 = vpop.f32.mrb[33].mxu0  ;;  %v1620_v52 = vsel %vm1536_vm0, %v1615_v51, %v1619_v63  ;;  %v1623_v6 = vor.u32 %v1621_v1, %v1619_v63  ;;  %v7414_v3 = vld [vmem:[#allocation11 + $0x138] sm:$0xff]  }
 0x253   : > { %v6008_v26 = vpack.c.bf16 %v1175_v54, %v1174_v62  ;;  %v876_v27 = vadd.f32 %v8501_v58, %v875_v31  ;;  %v6373_v35 = vpop.f32.mrb[34].mxu0  ;;  %6411 = vmatmul.mubr.bf16.gmra.mrb[56].mxu0 %v1620_v52  ;;  %6573 = vmatpush3.bf16.msra.mxu1 %v7388_v47  ;;  %v7395_v23 = vld [vmem:[#allocation2 + $0x68] sm:$0xff]  }
 0x254   : > { %6049 = vst [vmem:[#allocation2 + $0x78] sm:$0xff] %v6013_v59   ;;  %v940_v4 = vmax.f32 %v884_v30, 0.0  ;;  %v887_v48 = vadd.f32 %v6373_v35, %v8501_v58  ;;  %v878_v5 = vpop.f32.mrb[35].mxu0  ;;  %v7392_v8 = vld [vmem:[#allocation2 + $0x60] sm:$0xff]   ;;  %v1628_v9 = vsel %vm1536_vm0, %v1623_v6, %v1627_v49  ;;  %6574 = vmatprep.subr.bf16.mxu1 %v7393_v2  ;;  %v8630_v13 = vld [vmem:[#allocation2 + $0x68] sm:$0xff]  }
 0x255   : > { %6048 = vst [vmem:[#allocation2 + $0x70] sm:$0xff] %v6008_v26   ;;  %v938_v7 = vmax.f32 %v876_v27, 0.0  ;;  %v879_v43 = vadd.f32 %v8501_v58, %v878_v5  ;;  %v8627_v19 = vld [vmem:[#allocation2 + $0x60] sm:$0xff]   ;;  %6414 = vmatprep.mubr.bf16.mxu0 %v1628_v9  ;;  %6558 = vmatprep.mubr.bf16.mxu1 %v7392_v8  ;;  %v1641_v38 = vshll.u32 %v8630_v13, 16  ;;  %v7404_v31 = vld [vmem:[#allocation11 + $0x128] sm:$0xff]   ;;  %v2958_v27 = vshll.u32 %v8639_v11, 16  ;;  %v1139_v5 = vpop.permute.xlu0 %1138 }
 0x256   : > { %v941_v24 = vmax.f32 %v887_v48, 0.0  ;;  %v1180_v18 = vmul.f32 %v8469_v39, %v940_v4  ;;  %6559 = vmatmul.mubr.bf16.gmra.mrb[4].mxu1 %v7395_v23  ;;  %v1633_v47 = vshll.u32 %v8627_v19, 16  ;;  %v1637_v32 = vshrl.u32 %v8627_v19, 16  ;;  %v1144_v48 = vpop.permute.xlu1 %1143 }
 0x257   : > { %v939_v10 = vmax.f32 %v879_v43, 0.0  ;;  %v1178_v36 = vmul.f32 %v8459_v33, %v938_v7  ;;  %6575 = vmatpush3.bf16.msra.mxu1 %v7393_v2  ;;  %v1643_v54 = vrot.slane %v1641_v38, 1  ;;  %v8653_v7 = vld [vmem:[#allocation2 + $0x20] sm:$0xff]   ;;  %v1645_v8 = vshrl.u32 %v8630_v13, 16 }
 0x258   : > { %v1181_v21 = vmul.f32 %v8471_v40, %v941_v24  ;;  %6576 = vmatprep.subr.bf16.mxu1 %v7396_v45  ;;  %v1635_v29 = vrot.slane %v1633_v47, 1 }
 0x259   : > { %v1179_v37 = vmul.f32 %v8461_v34, %v939_v10  ;;  %v6376_v25 = vpop.f32.mrb[36].mxu0 }
 0x25a   : > { %v6023_v28 = vpack.c.bf16 %v1181_v21, %v1180_v18  ;;  %v900_v39 = vadd.f32 %v6376_v25, %v8501_v58  ;;  %v891_v40 = vpop.f32.mrb[37].mxu0  ;;  %v1636_v59 = vsel %vm1536_vm0, %v1631_v12, %v1635_v29  ;;  %v1639_v30 = vor.u32 %v1637_v32, %v1635_v29 }
 0x25b   : > { %v6018_v62 = vpack.c.bf16 %v1179_v37, %v1178_v36  ;;  %v892_v33 = vadd.f32 %v8501_v58, %v891_v40  ;;  %v6377_v34 = vpop.f32.mrb[38].mxu0  ;;  %6415 = vmatmul.mubr.bf16.gmra.mrb[60].mxu0 %v1636_v59  ;;  %6577 = vmatpush3.bf16.msra.mxu1 %v7396_v45  ;;  %v7403_v26 = vld [vmem:[#allocation2 + $0x78] sm:$0xff]   ;;  %v1647_v21 = vor.u32 %v1645_v8, %v1643_v54  ;;  %v2966_v25 = vshll.u32 %v8653_v7, 16 }
 0x25c   : > { %6051 = vst [vmem:[#allocation2 + $0x88] sm:$0xff] %v6023_v28   ;;  %v944_v0 = vmax.f32 %v900_v39, 0.0  ;;  %v903_v51 = vadd.f32 %v6377_v34, %v8501_v58  ;;  %v894_v57 = vpop.f32.mrb[39].mxu0  ;;  %v7400_v2 = vld [vmem:[#allocation2 + $0x70] sm:$0xff]   ;;  %v1644_v49 = vsel %vm1536_vm0, %v1639_v30, %v1643_v54  ;;  %6578 = vmatprep.subr.bf16.mxu1 %v7401_v60  ;;  %v8651_v6 = vld [vmem:[#allocation2 + $0x78] sm:$0xff]  }
 0x25d   : > { %6050 = vst [vmem:[#allocation2 + $0x80] sm:$0xff] %v6018_v62   ;;  %v942_v63 = vmax.f32 %v892_v33, 0.0  ;;  %v895_v1 = vadd.f32 %v8501_v58, %v894_v57  ;;  %v8649_v4 = vld [vmem:[#allocation2 + $0x70] sm:$0xff]   ;;  %6418 = vmatprep.mubr.bf16.mxu0 %v1644_v49  ;;  %6562 = vmatprep.mubr.bf16.mxu1 %v7400_v2  ;;  %v2955_v58 = vrot.slane %v2953_v42, 1  ;;  %v1657_v10 = vshll.u32 %v8651_v6, 16  ;;  %v8667_v62 = vld [vmem:[#allocation2 + $0x28] sm:$0xff]  }
 0x25e   : > { %v945_v35 = vmax.f32 %v903_v51, 0.0  ;;  %v1184_v45 = vmul.f32 %v1139_v5, %v944_v0  ;;  %6563 = vmatmul.mubr.bf16.gmra.mrb[8].mxu1 %v7403_v26  ;;  %v1649_v23 = vshll.u32 %v8649_v4, 16  ;;  %v1653_v42 = vshrl.u32 %v8649_v4, 16  ;;  %v7409_v36 = vld [vmem:[#allocation11 + $0x130] sm:$0xff]   ;;  %v3339_v39 = vld [vmem:[#allocation2 + $0x10] sm:$0xe] }
 0x25f   : > { %v943_v52 = vmax.f32 %v895_v1, 0.0  ;;  %v1182_v24 = vmul.f32 %v8497_v55, %v942_v63  ;;  %6579 = vmatpush3.bf16.msra.mxu1 %v7401_v60  ;;  %v2956_v28 = vor.u32 %v2955_v58, %v2951_v20  ;;  %v2960_v60 = vrot.slane %v2958_v27, 1  ;;  %v7422_v51 = vld [vmem:[#allocation2 + $0x30] sm:$0xff]   ;;  %v8679_v5 = vld [vmem:[#allocation2 + $0x40] sm:$0xff]  }
 0x260   : > { %v1185_v43 = vmul.f32 %v1144_v48, %v945_v35  ;;  %6580 = vmatprep.subr.bf16.mxu1 %v7404_v31  ;;  %v1651_v47 = vrot.slane %v1649_v23, 1  ;;  %v1661_v33 = vshrl.u32 %v8651_v6, 16  ;;  %v2968_v0 = vrot.slane %v2966_v25, 1  ;;  %v8677_v48 = vld [vmem:[#allocation2 + $0x38] sm:$0xff]   ;;  %v7421_v58 = vld [vmem:[#allocation11 + $0x148] sm:$0xff]  }
 0x261   : > { %v1183_v9 = vmul.f32 %v8499_v56, %v943_v52  ;;  %v1659_v56 = vrot.slane %v1657_v10, 1  ;;  %v2961_v54 = vsel %vm1536_vm0, %v2956_v28, %v2960_v60  ;;  %v5808_v30 = vcombine.low %v3339_v39, %v8610_v61  ;;  %v8685_v23 = vld [vmem:[#allocation2 + $0x48] sm:$0xff]   ;;  %v7427_v39 = vld [vmem:[#allocation11 + $0x158] sm:$0xff]  }
 0x262   : > { %v6033_v18 = vpack.c.bf16 %v1185_v43, %v1184_v45  ;;  %v1652_v55 = vsel %vm1536_vm0, %v1647_v21, %v1651_v47  ;;  %v1655_v12 = vor.u32 %v1653_v42, %v1651_v47  ;;  %v2970_v63 = vshrl.u32 %v8653_v7, 16  ;;  %v7435_v25 = vld [vmem:[#allocation11 + $0x88] sm:$0xff]  }
 0x263   : > { %v6028_v37 = vpack.c.bf16 %v1183_v9, %v1182_v24  ;;  %6419 = vmatmul.mubr.bf16.gmra.mrb[64].mxu0 %v1652_v55  ;;  %6581 = vmatpush3.bf16.msra.mxu1 %v7404_v31  ;;  %v7411_v32 = vld [vmem:[#allocation2 + $0x88] sm:$0xff]   ;;  %v1663_v57 = vor.u32 %v1661_v33, %v1659_v56  ;;  %v2974_v1 = vshll.u32 %v8667_v62, 16  ;;  %v2962_v2 = vshrl.u32 %v8639_v11, 16 }
 0x264   : > { %6053 = vst [vmem:[#allocation2 + $0x98] sm:$0xff] %v6033_v18   ;;  %v7408_v38 = vld [vmem:[#allocation2 + $0x80] sm:$0xff]   ;;  %v1660_v29 = vsel %vm1536_vm0, %v1655_v12, %v1659_v56  ;;  %6582 = vmatprep.subr.bf16.mxu1 %v7409_v36  ;;  %v2972_v27 = vor.u32 %v2970_v63, %v2968_v0  ;;  %v2982_v35 = vshll.u32 %v7422_v51, 16  ;;  %v3360_v61 = vrot.slane %v5808_v30, 1  ;;  %v7424_v18 = vld [vmem:[#allocation11 + $0x150] sm:$0xff]  }
 0x265   : > { %6052 = vst [vmem:[#allocation2 + $0x90] sm:$0xff] %v6028_v37   ;;  %v8664_v40 = vld [vmem:[#allocation2 + $0x80] ss:$0 sps:$4 sm:$0x11]   ;;  %6566 = vmatprep.mubr.bf16.mxu1 %v7408_v38  ;;  %6422 = vmatprep.mubr.bf16.mxu0 %v1660_v29  ;;  %v7417_v31 = vld [vmem:[#allocation11 + $0x140] sm:$0xff]   ;;  %v2964_v49 = vor.u32 %v2962_v2, %v2960_v60  ;;  %v2976_v52 = vrot.slane %v2974_v1, 1 }
 0x266   : > { %v1665_v34 = vshll.u32 %v8664_v40, 16  ;;  %6567 = vmatmul.mubr.bf16.gmra.mrb[12].mxu1 %v7411_v32  ;;  %v3361_v45 = vrot.slane %v8639_v11, 1  ;;  %v2978_v8 = vshrl.u32 %v8667_v62, 16  ;;  %v3363_v24 = vrot.slane %v8653_v7, 1  ;;  %v8703_v37 = vld [vmem:[#allocation2 + $0x58] sm:$0xff]   ;;  %v8706_v56 = vld [vmem:[#allocation2 + $0x60] sm:$0xff]  }
 0x267   : > { %6583 = vmatpush3.bf16.msra.mxu1 %v7409_v36  ;;  %6586 = vmatprep.mubr.bf16.mxu1 %v2961_v54  ;;  %v2969_v43 = vsel %vm1536_vm0, %v2964_v49, %v2968_v0  ;;  %v3365_v9 = vrot.slane %v8667_v62, 1  ;;  %v2977_v10 = vsel %vm1536_vm0, %v2972_v27, %v2976_v52  ;;  %v2986_v20 = vshrl.u32 %v7422_v51, 16  ;;  %v8701_v36 = vld [vmem:[#allocation2 + $0x50] sm:$0xff]   ;;  %v8734_v63 = vld [vmem:[#allocation2 + $0x80] sm:$0xff]   ;;  %v8738_v2 = vld [vmem:[#allocation2 + $0x88] sm:$0xff]  }
 0x268   : > { %v1667_v59 = vrot.slane %v1665_v34, 1  ;;  %6584 = vmatprep.subr.bf16.mxu1 %v7414_v3  ;;  %v8691_v21 = vsel %vm2140_vm1, %v3360_v61, %v3361_v45  ;;  %v2990_v11 = vshll.u32 %v8677_v48, 16  ;;  %v2998_v47 = vshll.u32 %v8679_v5, 16  ;;  %v8723_v0 = vld [vmem:[#allocation2 + $0x70] sm:$0xff]  }
 0x269   : > { %v8696_v42 = vsel %vm2140_vm1, %v3361_v45, %v3363_v24  ;;  %v8699_v7 = vsel %vm2140_vm1, %v3363_v24, %v3365_v9  ;;  %v3367_v55 = vrot.slane %v7422_v51, 1  ;;  %v3369_v12 = vrot.slane %v8677_v48, 1  ;;  %v8725_v51 = vld [vmem:[#allocation2 + $0x78] sm:$0xff]  }
 0x26a   : > { %v1668_v26 = vsel %vm1536_vm0, %v1663_v57, %v1667_v59  ;;  %v3371_v38 = vrot.slane %v8679_v5, 1  ;;  %v3373_v60 = vrot.slane %v8685_v23, 1  ;;  %v2980_v62 = vor.u32 %v2978_v8, %v2976_v52  ;;  %v7438_v57 = vld [vmem:[#allocation11 + $0x90] sm:$0xff]  }
 0x26b   : > { %6423 = vmatmul.mubr.bf16.gmra.mrb[68].mxu0 %v1668_v26  ;;  %6585 = vmatpush3.bf16.msra.mxu1 %v7414_v3  ;;  %v8709_v3 = vld [vmem:[#allocation2 + $0x68] sm:$0xff]   ;;  %v8712_v29 = vsel %vm2140_vm1, %v3365_v9, %v3367_v55  ;;  %v8715_v32 = vsel %vm2140_vm1, %v3367_v55, %v3369_v12  ;;  %v2992_v33 = vrot.slane %v2990_v11, 1  ;;  %v3000_v34 = vrot.slane %v2998_v47, 1  ;;  %v8769_v47 = vld [vmem:[#allocation2 + $0x18] sm:$0xff]  }
 0x26c   : > { %6442 = vmatprep.mubr.bf16.mxu0 %v8517_v22  ;;  %6618 = vmatprep.subr.bf16.mxu1 %v7417_v31  ;;  %v2984_v22 = vrot.slane %v2982_v35, 1  ;;  %v8720_v54 = vsel %vm2140_vm1, %v3369_v12, %v3371_v38  ;;  %v8728_v59 = vsel %vm2140_vm1, %v3371_v38, %v3373_v60  ;;  %v3377_v30 = vrot.slane %v8703_v37, 1  ;;  %v8740_v26 = vld [vmem:[#allocation2 + $0x90] ss:$0 sps:$4 sm:$0x11]  }
 0x26d   : > { %v3002_v49 = vshrl.u32 %v8679_v5, 16  ;;  %v3006_v52 = vshll.u32 %v8685_v23, 16  ;;  %v3385_v8 = vrot.slane %v8725_v51, 1  ;;  %v2994_v24 = vshrl.u32 %v8677_v48, 16  ;;  %v7434_v12 = vld [vmem:[#allocation11 + $0x168] sm:$0xff]  }
 0x26e   : > { %6587 = vmatmul.mubr.bf16.vlgmr.msra.gmra.mrb[16].mxu1 %v2969_v43  ;;  %v2988_v28 = vor.u32 %v2986_v20, %v2984_v22  ;;  %v3383_v43 = vrot.slane %v8723_v0, 1  ;;  %v3387_v5 = vrot.slane %v8734_v63, 1  ;;  %v3389_v11 = vrot.slane %v8738_v2, 1 }
 0x26f   : > { %6619 = vmatpush3.bf16.msra.mxu1 %v7417_v31  ;;  %6590 = vmatprep.mubr.bf16.mxu1 %v2977_v10  ;;  %v2985_v31 = vsel %vm1536_vm0, %v2980_v62, %v2984_v22  ;;  %v3004_v9 = vor.u32 %v3002_v49, %v3000_v34  ;;  %v7440_v10 = vld [vmem:[#allocation11 + $0x98] sm:$0xff]   ;;  %v3014_v22 = vshll.u32 %v8701_v36, 16  ;;  %v2996_v48 = vor.u32 %v2994_v24, %v2992_v33 }
 0x270   : > { %6620 = vmatprep.subr.bf16.mxu1 %v7421_v58  ;;  %v2993_v1 = vsel %vm1536_vm0, %v2988_v28, %v2992_v33  ;;  %v3008_v55 = vrot.slane %v3006_v52, 1  ;;  %v8777_v38 = vsel %vm2140_vm1, %v3387_v5, %v3389_v11  ;;  %v3391_v28 = vrot.slane %v8740_v26, 1  ;;  %v7443_v33 = vld [vmem:[#allocation11 + $0xa0] sm:$0xff]   ;;  %v7444_v52 = vld [vmem:[#allocation11 + $0x178] sm:$0xff]  }
 0x271   : > { %v3026_v24 = vshrl.u32 %v8703_v37, 16 }
 0x272   : > { %v3009_v62 = vsel %vm1536_vm0, %v3004_v9, %v3008_v55  ;;  %v3034_v9 = vshrl.u32 %v8706_v56, 16 }
 0x273   : > { %6443 = vmatmul.mubr.bf16.vlgmr.msra.gmra.mrb[40].mxu0 %v8513_v14  ;;  %6621 = vmatpush3.bf16.msra.mxu1 %v7421_v58  ;;  %v3375_v14 = vrot.slane %v8701_v36, 1  ;;  %v7430_v58 = vld [vmem:[#allocation11 + $0x160] sm:$0xff]  }
 0x274   : > { %6446 = vmatprep.mubr.bf16.mxu0 %v8531_v15  ;;  %6622 = vmatprep.subr.bf16.mxu1 %v7424_v18  ;;  %v3379_v15 = vrot.slane %v8706_v56, 1 }
 0x275   : > { %6475 = vmatpush3.bf16.msra.mxu0 %v8598_v41  ;;  %v8743_v27 = vsel %vm2140_vm1, %v3373_v60, %v3375_v14  ;;  %v8746_v35 = vsel %vm2140_vm1, %v3375_v14, %v3377_v30  ;;  %v3381_v41 = vrot.slane %v8709_v3, 1  ;;  %v3001_v60 = vsel %vm1536_vm0, %v2996_v48, %v3000_v34  ;;  %v8801_v48 = vld [vmem:[#allocation2 + $0x38] sm:$0xff]  }
 0x276   : > { %6591 = vmatmul.mubr.bf16.gmra.mrb[20].mxu1 %v2985_v31  ;;  %6476 = vmatprep.subr.bf16.mxu0 %v7435_v25  ;;  %v8751_v61 = vsel %vm2140_vm1, %v3377_v30, %v3379_v15  ;;  %v8783_v14 = vsel %vm2140_vm1, %v3389_v11, %v3391_v28  ;;  %v3018_v30 = vshrl.u32 %v8701_v36, 16  ;;  %v3022_v31 = vshll.u32 %v8703_v37, 16  ;;  %v7451_v11 = vld [vmem:[#allocation11 + $0xb8] sm:$0xff]  }
 0x277   : > { %6594 = vmatprep.mubr.bf16.mxu1 %v2993_v1  ;;  %6623 = vmatpush3.bf16.msra.mxu1 %v7424_v18  ;;  %v8755_v45 = vsel %vm2140_vm1, %v3379_v15, %v3381_v41  ;;  %v8763_v20 = vsel %vm2140_vm1, %v3381_v41, %v3383_v43  ;;  %v8766_v18 = vsel %vm2140_vm1, %v3383_v43, %v3385_v8  ;;  %v3010_v34 = vshrl.u32 %v8685_v23, 16  ;;  %v7445_v1 = vld [vmem:[#allocation11 + $0xa8] sm:$0xff]  }
 0x278   : > { %6624 = vmatprep.subr.bf16.mxu1 %v7427_v39  ;;  %v3030_v15 = vshll.u32 %v8706_v56, 16  ;;  %v8789_v41 = vld [vmem:[#allocation2 + $0x28] sm:$0xff]   ;;  %v3024_v36 = vrot.slane %v3022_v31, 1 }
 0x279   : > { %6477 = vmatpush3.bf16.msra.mxu0 %v7435_v25  ;;  %v8773_v25 = vsel %vm2140_vm1, %v3385_v8, %v3387_v5  ;;  %v3012_v49 = vor.u32 %v3010_v34, %v3008_v55  ;;  %v7448_v8 = vld [vmem:[#allocation11 + $0xb0] sm:$0xff]   ;;  %v8814_v31 = vld [vmem:[#allocation11 + $0xc0] sm:$0xff]  }
 0x27a   : > { %6478 = vmatprep.subr.bf16.mxu0 %v7438_v57  ;;  %v3032_v43 = vrot.slane %v3030_v15, 1  ;;  %v3028_v55 = vor.u32 %v3026_v24, %v3024_v36  ;;  %v8817_v34 = vld [vmem:[#allocation2 + $0x28] sm:$0xff]  }
 0x27b   : > { %6447 = vmatmul.mubr.bf16.gmra.mrb[44].mxu0 %v8769_v47  ;;  %6625 = vmatpush3.bf16.msra.mxu1 %v7427_v39  ;;  %v3016_v39 = vrot.slane %v3014_v22, 1  ;;  %v3046_v22 = vshll.u32 %v8723_v0, 16 }
 0x27c   : > { %6450 = vmatprep.mubr.bf16.mxu0 %v8548_v44  ;;  %6626 = vmatprep.subr.bf16.mxu1 %v7430_v58  ;;  %v7439_v44 = vld [vmem:[#allocation11 + $0x170] sm:$0xff]   ;;  %v3036_v5 = vor.u32 %v3034_v9, %v3032_v43  ;;  %v3033_v56 = vsel %vm1536_vm0, %v3028_v55, %v3032_v43  ;;  %v8832_v43 = vld [vmem:[#allocation2 + $0x48] sm:$0xff]  }
 0x27d   : > { %6479 = vmatpush3.bf16.msra.mxu0 %v7438_v57  ;;  %v3020_v57 = vor.u32 %v3018_v30, %v3016_v39  ;;  %v3048_v28 = vrot.slane %v3046_v22, 1  ;;  %v8835_v9 = vld [vmem:[#allocation2 + $0x50] sm:$0xff]   ;;  %v8843_v22 = vld [vmem:[#allocation2 + $0x68] sm:$0xff]  }
 0x27e   : > { %6595 = vmatmul.mubr.bf16.gmra.mrb[24].mxu1 %v3001_v60  ;;  %6480 = vmatprep.subr.bf16.mxu0 %v7440_v10  ;;  %v3054_v60 = vshll.u32 %v8725_v51, 16 }
 0x27f   : > { %6598 = vmatprep.mubr.bf16.mxu1 %v3009_v62  ;;  %6627 = vmatpush3.bf16.msra.mxu1 %v7430_v58  ;;  %v3017_v58 = vsel %vm1536_vm0, %v3012_v49, %v3016_v39  ;;  %v3025_v23 = vsel %vm1536_vm0, %v3020_v57, %v3024_v36  ;;  %v3062_v62 = vshll.u32 %v8734_v63, 16  ;;  %v3050_v39 = vshrl.u32 %v8723_v0, 16 }
 0x280   : > { %6628 = vmatprep.subr.bf16.mxu1 %v7434_v12  ;;  %v3056_v30 = vrot.slane %v3054_v60, 1  ;;  %v3058_v49 = vshrl.u32 %v8725_v51, 16  ;;  %v3066_v36 = vshrl.u32 %v8734_v63, 16  ;;  %v8837_v51 = vld [vmem:[#allocation2 + $0x58] sm:$0xff]   ;;  %v4580_v63 = vrot.slane %v8817_v34, 1  ;;  %v8851_v60 = vld [vmem:[#allocation2 + $0x80] sm:$0xff]  }
 0x281   : > { %6481 = vmatpush3.bf16.msra.mxu0 %v7440_v10  ;;  %v8798_v10 = vld [vmem:[#allocation11 + $0x180] sm:$0xff]   ;;  %v3064_v15 = vrot.slane %v3062_v62, 1 }
 0x282   : > { %6482 = vmatprep.subr.bf16.mxu0 %v7443_v33 }
 0x283   : > { %6451 = vmatmul.mubr.bf16.gmra.mrb[48].mxu0 %v8789_v41  ;;  %6629 = vmatpush3.bf16.msra.mxu1 %v7434_v12  ;;  %v3068_v24 = vor.u32 %v3066_v36, %v3064_v15  ;;  %v8871_v36 = vld [vmem:[#allocation2 + $0x98] sm:$0xff]  }
 0x284   : > { %6454 = vmatprep.mubr.bf16.mxu0 %v8566_v50  ;;  %6630 = vmatprep.subr.bf16.mxu1 %v7439_v44  ;;  %v3038_v50 = vshll.u32 %v8709_v3, 16 }
 0x285   : > { %6483 = vmatpush3.bf16.msra.mxu0 %v7443_v33  ;;  %v8812_v33 = vld [vmem:[#allocation2 + $0x24] sm:$0xf] }
 0x286   : > { %6599 = vmatmul.mubr.bf16.gmra.mrb[28].mxu1 %v3017_v58  ;;  %6484 = vmatprep.subr.bf16.mxu0 %v7445_v1  ;;  %v3040_v37 = vrot.slane %v3038_v50, 1  ;;  %v8829_v58 = vld [vmem:[#allocation2 + $0x40] sm:$0xff]  }
 0x287   : > { %6602 = vmatprep.mubr.bf16.mxu1 %v3025_v23  ;;  %6631 = vmatpush3.bf16.msra.mxu1 %v7439_v44  ;;  %v3052_v44 = vor.u32 %v3050_v39, %v3048_v28  ;;  %v4558_v23 = vld [vmem:[#allocation2 + $0x20] sm:$0xe]  ;;  %v4586_v39 = vrot.slane %v8829_v58, 1 }
 0x288   : > { %6632 = vmatprep.subr.bf16.mxu1 %v7444_v52  ;;  %v3041_v12 = vsel %vm1536_vm0, %v3036_v5, %v3040_v37  ;;  %v8841_v5 = vld [vmem:[#allocation2 + $0x60] sm:$0xff]  }
 0x289   : > { %6485 = vmatpush3.bf16.msra.mxu0 %v7445_v1  ;;  %v8820_v1 = vld [vmem:[#allocation2 + $0x30] sm:$0xff]  }
 0x28a   : > { %6486 = vmatprep.subr.bf16.mxu0 %v7448_v8  ;;  %v4582_v50 = vrot.slane %v8820_v1, 1 }
 0x28b   : > { %6455 = vmatmul.mubr.bf16.gmra.mrb[52].mxu0 %v8801_v48  ;;  %6633 = vmatpush3.bf16.msra.mxu1 %v7444_v52  ;;  %v3070_v52 = vshll.u32 %v8738_v2, 16 }
 0x28c   : > { %6458 = vmatprep.mubr.bf16.mxu0 %v8584_v53  ;;  %6666 = vmatprep.subr.bf16.mxu1 %v8798_v10  ;;  %v3042_v53 = vshrl.u32 %v8709_v3, 16  ;;  %v8823_v3 = vld [vmem:[#allocation2 + $0x38] sm:$0xff]   ;;  %v8854_v62 = vsel %vm2140_vm1, %v4580_v63, %v4582_v50 }
 0x28d   : > { %6487 = vmatpush3.bf16.msra.mxu0 %v7448_v8  ;;  %v3060_v8 = vor.u32 %v3058_v49, %v3056_v30  ;;  %v8869_v49 = vld [vmem:[#allocation2 + $0x90] sm:$0xff]  }
 0x28e   : > { %6603 = vmatmul.mubr.bf16.gmra.mrb[0].mxu1 %v3033_v56  ;;  %6488 = vmatprep.subr.bf16.mxu0 %v7451_v11  ;;  %v3044_v57 = vor.u32 %v3042_v53, %v3040_v37  ;;  %v4584_v37 = vrot.slane %v8823_v3, 1  ;;  %v3078_v53 = vshll.u32 %v8740_v26, 16 }
 0x28f   : > { %6606 = vmatprep.mubr.bf16.mxu1 %v3041_v12  ;;  %v3065_v56 = vsel %vm1536_vm0, %v3060_v8, %v3064_v15  ;;  %v3072_v12 = vrot.slane %v3070_v52, 1  ;;  %v4588_v15 = vrot.slane %v8832_v43, 1  ;;  %v4590_v52 = vrot.slane %v8835_v9, 1 }
 0x290   : > { %v3049_v0 = vsel %vm1536_vm0, %v3044_v57, %v3048_v28  ;;  %v8849_v28 = vld [vmem:[#allocation2 + $0x78] sm:$0xff]   ;;  %v8864_v57 = vsel %vm2140_vm1, %v4582_v50, %v4584_v37  ;;  %v8874_v26 = vsel %vm2140_vm1, %v4584_v37, %v4586_v39  ;;  %v4596_v8 = vrot.slane %v8843_v22, 1 }
 0x291   : > { %6489 = vmatpush3.bf16.msra.mxu0 %v7451_v11  ;;  %v8845_v11 = vld [vmem:[#allocation2 + $0x70] sm:$0xff]  }
 0x292   : > { %6522 = vmatprep.subr.bf16.mxu0 %v8814_v31 }
 0x293   : > { %6459 = vmatmul.mubr.bf16.gmra.mrb[56].mxu0 %v8579_v16  ;;  %v3057_v16 = vsel %vm1536_vm0, %v3052_v44, %v3056_v30  ;;  %v8858_v44 = vld [vmem:[#allocation2 + $0x88] sm:$0xff]  }
 0x294   : > { %6462 = vmatprep.mubr.bf16.mxu0 %v8602_v17  ;;  %v5866_v17 = vcombine.low %v4558_v23, %v8812_v33  ;;  %v4592_v23 = vrot.slane %v8837_v51, 1 }
 0x296   : > { %6607 = vmatmul.mubr.bf16.gmra.mrb[4].mxu1 %v3049_v0  ;;  %v4579_v55 = vrot.slane %v5866_v17, 1  ;;  %v3073_v0 = vsel %vm1536_vm0, %v3068_v24, %v3072_v12  ;;  %v8882_v17 = vsel %vm2140_vm1, %v4586_v39, %v4588_v15  ;;  %v4598_v24 = vrot.slane %v8845_v11, 1 }
 0x297   : > { %6610 = vmatprep.mubr.bf16.mxu1 %v3057_v16  ;;  %v8879_v16 = vld [vmem:[#allocation2 + $0xa0] ss:$0 sps:$4 sm:$0x11]   ;;  %9552 = vst [vmem:[#allocation29_spill] sm:$0xff] %v8882_v17  ;;  %v8891_v50 = vsel %vm2140_vm1, %v4590_v52, %v4592_v23 }
 0x298   : > { %v8861_v30 = vsel %vm2140_vm1, %v4579_v55, %v4580_v63  ;;  %v8888_v63 = vsel %vm2140_vm1, %v4588_v15, %v4590_v52  ;;  %9553 = vst [vmem:[#allocation30_spill] sm:$0xff] %v8891_v50  ;;  %v4600_v55 = vrot.slane %v8849_v28, 1  ;;  %v8902_v17 = vsel %vm2140_vm1, %v4596_v8, %v4598_v24 }
 0x299   : > { %9556 = vst [vmem:[#allocation33_spill] sm:$0xff] %v8902_v17  ;;  %v4604_v15 = vrot.slane %v8858_v44, 1  ;;  %v3074_v17 = vshrl.u32 %v8738_v2, 16 }
 0x29a   : > { %v8906_v52 = vsel %vm2140_vm1, %v4598_v24, %v4600_v55 }
 0x29b   : > { %6463 = vmatmul.mubr.bf16.gmra.mrb[60].mxu0 %v8605_v46  ;;  %v4594_v46 = vrot.slane %v8841_v5, 1  ;;  %9557 = vst [vmem:[#allocation34_spill] sm:$0xff] %v8906_v52  ;;  %v7546_v52 = vld [vmem:[#allocation2 + $0x4] sm:$0xf] }
 0x29c   : > { %6466 = vmatprep.mubr.bf16.mxu0 %v8627_v19  ;;  %v4602_v19 = vrot.slane %v8851_v60, 1 }
 0x29d   : > { %v8896_v37 = vsel %vm2140_vm1, %v4592_v23, %v4594_v46  ;;  %v8899_v39 = vsel %vm2140_vm1, %v4594_v46, %v4596_v8  ;;  %v4608_v23 = vrot.slane %v8871_v36, 1  ;;  %v4610_v8 = vrot.slane %v8879_v16, 1 }
 0x29e   : > { %6611 = vmatmul.mubr.bf16.gmra.mrb[8].mxu1 %v3065_v56  ;;  %9554 = vst [vmem:[#allocation31_spill] sm:$0xff] %v8896_v37  ;;  %9555 = vst [vmem:[#allocation32_spill] sm:$0xff] %v8899_v39  ;;  %v8909_v50 = vsel %vm2140_vm1, %v4600_v55, %v4602_v19  ;;  %v4606_v56 = vrot.slane %v8869_v49, 1  ;;  %v2119_v37 = vld [vmem:[#allocation2] sm:$0xe]  ;;  %v8914_v46 = vsel %vm2140_vm1, %v4602_v19, %v4604_v15  ;;  %v3080_v39 = vrot.slane %v3078_v53, 1 }
 0x29f   : > { %6614 = vmatprep.mubr.bf16.mxu1 %v3073_v0  ;;  %9558 = vst [vmem:[#allocation35_spill] sm:$0xff] %v8909_v50  ;;  %9559 = vst [vmem:[#allocation36_spill] sm:$0xff] %v8914_v46  ;;  %v8925_v55 = vsel %vm2140_vm1, %v4608_v23, %v4610_v8  ;;  %v3076_v50 = vor.u32 %v3074_v17, %v3072_v12  ;;  %v5750_v19 = vcombine.low %v2119_v37, %v7546_v52  ;;  %v7547_v53 = vld [vmem:[#allocation2 + $0x8] sm:$0xff]   ;;  %v7551_v8 = vld [vmem:[#allocation11 + $0xd0] sm:$0xff]  }
 0x2a0   : > { %v8919_v0 = vsel %vm2140_vm1, %v4604_v15, %v4606_v56  ;;  %v8922_v24 = vsel %vm2140_vm1, %v4606_v56, %v4608_v23  ;;  %v2142_v15 = vrot.slane %v7547_v53, 1  ;;  %v7452_v23 = vld [vmem:[#allocation11 + $0x188] sm:$0xff]   ;;  %v2146_v17 = vrot.slane %v8769_v47, 1  ;;  %v7455_v52 = vld [vmem:[#allocation11 + $0x1a0] sm:$0xff]   ;;  %v7457_v53 = vld [vmem:[#allocation11 + $0x1b0] sm:$0xff]  }
 0x2a1   : > { %v3081_v46 = vsel %vm1536_vm0, %v3076_v50, %v3080_v39  ;;  %v2141_v2 = vrot.slane %v5750_v19, 1  ;;  %v7454_v39 = vld [vmem:[#allocation11 + $0x198] sm:$0xff]   ;;  %v2150_v47 = vrot.slane %v8789_v41, 1 }
 0x2a2   : > { %v7553_v19 = vld [vmem:[#allocation11 + $0xd8] sm:$0xff]  }
 0x2a3   : > { %6467 = vmatmul.mubr.bf16.gmra.mrb[64].mxu0 %v8630_v13  ;;  %v2143_v56 = vsel %vm2140_vm1, %v2141_v2, %v2142_v15  ;;  %v7548_v13 = vld [vmem:[#allocation2 + $0x10] sm:$0xff]   ;;  %v2154_v2 = vrot.slane %v8801_v48, 1 }
 0x2a4   : > { %6470 = vmatprep.mubr.bf16.mxu0 %v8649_v4  ;;  %v2144_v12 = vrot.slane %v7548_v13, 1  ;;  %v7556_v13 = vld [vmem:[#allocation11 + $0xe8] sm:$0xff]  }
 0x2a6   : > { %6615 = vmatmul.mubr.bf16.gmra.mrb[12].mxu1 %v3081_v46  ;;  %v2145_v50 = vsel %vm2140_vm1, %v2142_v15, %v2144_v12  ;;  %v2147_v37 = vsel %vm2140_vm1, %v2144_v12, %v2146_v17  ;;  %v7557_v12 = vld [vmem:[#allocation2 + $0x48] sm:$0xff]  }
 0x2a7   : > { %6634 = vmatprep.mubr.bf16.mxu1 %v8691_v21  ;;  %v7453_v21 = vld [vmem:[#allocation11 + $0x190] sm:$0xff]  }
 0x2ab   : > { %6471 = vmatmul.mubr.bf16.gmra.mrb[68].mxu0 %v8651_v6 }
 0x2ac   : > { %6490 = vmatprep.mubr.bf16.mxu0 %v2143_v56  ;;  %v7554_v56 = vld [vmem:[#allocation11 + $0xe0] sm:$0xff]  }
 0x2ae   : > { %6635 = vmatmul.mubr.bf16.vlgmr.msra.gmra.mrb[16].mxu1 %v8696_v42  ;;  %v7549_v42 = vld [vmem:[#allocation2 + $0x20] sm:$0xff]  }
 0x2af   : > { %6667 = vmatpush3.bf16.msra.mxu1 %v8798_v10  ;;  %6638 = vmatprep.mubr.bf16.mxu1 %v8699_v7  ;;  %v2148_v10 = vrot.slane %v7549_v42, 1  ;;  %v7550_v7 = vld [vmem:[#allocation11 + $0xc8] sm:$0xff]   ;;  %v7560_v42 = vld [vmem:[#allocation11 + $0xf8] sm:$0xff]  }
 0x2b0   : > { %6668 = vmatprep.subr.bf16.mxu1 %v7452_v23 }
 0x2b1   : > { %v2149_v46 = vsel %vm2140_vm1, %v2146_v17, %v2148_v10  ;;  %v2158_v17 = vrot.slane %v7557_v12, 1  ;;  %v7472_v12 = vld [vmem:[#allocation2 + $0x48] sm:$0xff]  }
 0x2b3   : > { %6491 = vmatmul.mubr.bf16.vlgmr.msra.gmra.mrb[40].mxu0 %v2145_v50  ;;  %6669 = vmatpush3.bf16.msra.mxu1 %v7452_v23 }
 0x2b4   : > { %6494 = vmatprep.mubr.bf16.mxu0 %v2147_v37  ;;  %6670 = vmatprep.subr.bf16.mxu1 %v7453_v21  ;;  %v7558_v37 = vld [vmem:[#allocation11 + $0xf0] sm:$0xff]  }
 0x2b5   : > { %6523 = vmatpush3.bf16.msra.mxu0 %v8814_v31  ;;  %v2151_v31 = vsel %vm2140_vm1, %v2148_v10, %v2150_v47  ;;  %v7561_v10 = vld [vmem:[#allocation2 + $0x58] sm:$0xff]  }
 0x2b6   : > { %6639 = vmatmul.mubr.bf16.gmra.mrb[20].mxu1 %v8712_v29  ;;  %6524 = vmatprep.subr.bf16.mxu0 %v7550_v7  ;;  %v7456_v29 = vld [vmem:[#allocation11 + $0x1a8] sm:$0xff]  }
 0x2b7   : > { %6642 = vmatprep.mubr.bf16.mxu1 %v8715_v32  ;;  %6671 = vmatpush3.bf16.msra.mxu1 %v7453_v21  ;;  %v7552_v32 = vld [vmem:[#allocation2 + $0x30] sm:$0xff]   ;;  %v7461_v21 = vld [vmem:[#allocation11 + $0x1c0] sm:$0xff]  }
 0x2b8   : > { %6672 = vmatprep.subr.bf16.mxu1 %v7454_v39  ;;  %v2152_v41 = vrot.slane %v7552_v32, 1  ;;  %v2168_v32 = vrot.slane %v8649_v4, 1  ;;  %v7462_v4 = vld [vmem:[#allocation2 + $0x28] sm:$0xff]  }
 0x2b9   : > { %6525 = vmatpush3.bf16.msra.mxu0 %v7550_v7  ;;  %v2162_v7 = vrot.slane %v7561_v10, 1  ;;  %v7493_v10 = vld [vmem:[#allocation11 + $0x200] sm:$0xff]  }
 0x2ba   : > { %6526 = vmatprep.subr.bf16.mxu0 %v7551_v8  ;;  %v2153_v15 = vsel %vm2140_vm1, %v2150_v47, %v2152_v41  ;;  %v2155_v23 = vsel %vm2140_vm1, %v2152_v41, %v2154_v2 }
 0x2bb   : > { %6495 = vmatmul.mubr.bf16.gmra.mrb[44].mxu0 %v2149_v46  ;;  %6673 = vmatpush3.bf16.msra.mxu1 %v7454_v39  ;;  %v7562_v46 = vld [vmem:[#allocation2 + $0x60] sm:$0xff]  }
 0x2bc   : > { %6498 = vmatprep.mubr.bf16.mxu0 %v2151_v31  ;;  %6674 = vmatprep.subr.bf16.mxu1 %v7455_v52 }
 0x2bd   : > { %6527 = vmatpush3.bf16.msra.mxu0 %v7551_v8  ;;  %v2164_v8 = vrot.slane %v7562_v46, 1  ;;  %v4036_v46 = vld [vmem:[#allocation2 + $0x20] sm:$0xf] }
 0x2be   : > { %6643 = vmatmul.mubr.bf16.gmra.mrb[24].mxu1 %v8720_v54  ;;  %6528 = vmatprep.subr.bf16.mxu0 %v7553_v19  ;;  %v7458_v54 = vld [vmem:[#allocation11 + $0x1b8] sm:$0xff]  }
 0x2bf   : > { %6646 = vmatprep.mubr.bf16.mxu1 %v8728_v59  ;;  %6675 = vmatpush3.bf16.msra.mxu1 %v7455_v52  ;;  %v7555_v59 = vld [vmem:[#allocation2 + $0x40] sm:$0xff]  }
 0x2c0   : > { %6676 = vmatprep.subr.bf16.mxu1 %v7456_v29  ;;  %v2156_v48 = vrot.slane %v7555_v59, 1  ;;  %v7480_v59 = vld [vmem:[#allocation11 + $0x1e0] sm:$0xff]  }
 0x2c1   : > { %6529 = vmatpush3.bf16.msra.mxu0 %v7553_v19  ;;  %v7459_v19 = vld [vmem:[#allocation2 + $0x20] sm:$0xff]  }
 0x2c2   : > { %6530 = vmatprep.subr.bf16.mxu0 %v7554_v56  ;;  %v2157_v50 = vsel %vm2140_vm1, %v2154_v2, %v2156_v48  ;;  %v2159_v39 = vsel %vm2140_vm1, %v2156_v48, %v2158_v17  ;;  %v2172_v2 = vrot.slane %v8664_v40, 1  ;;  %v7467_v40 = vld [vmem:[#allocation2 + $0x38] sm:$0xff]   ;;  %v7469_v48 = vld [vmem:[#allocation2 + $0x28] sm:$0xff]  }
 0x2c3   : > { %6499 = vmatmul.mubr.bf16.gmra.mrb[48].mxu0 %v2153_v15  ;;  %6677 = vmatpush3.bf16.msra.mxu1 %v7456_v29  ;;  %v2165_v29 = vsel %vm2140_vm1, %v2162_v7, %v2164_v8  ;;  %v7471_v15 = vld [vmem:[#allocation11 + $0x1d0] sm:$0xff]  }
 0x2c4   : > { %6502 = vmatprep.mubr.bf16.mxu0 %v2155_v23  ;;  %6678 = vmatprep.subr.bf16.mxu1 %v7457_v53  ;;  %v7465_v23 = vld [vmem:[#allocation2 + $0x20] sm:$0xff]  }
 0x2c5   : > { %6531 = vmatpush3.bf16.msra.mxu0 %v7554_v56  ;;  %v7464_v56 = vld [vmem:[#allocation2 + $0x18] sm:$0xff]  }
 0x2c6   : > { %6647 = vmatmul.mubr.bf16.gmra.mrb[28].mxu1 %v8743_v27  ;;  %6532 = vmatprep.subr.bf16.mxu0 %v7556_v13  ;;  %v7559_v27 = vld [vmem:[#allocation2 + $0x50] sm:$0xff]  }
 0x2c7   : > { %6650 = vmatprep.mubr.bf16.mxu1 %v8746_v35  ;;  %6679 = vmatpush3.bf16.msra.mxu1 %v7457_v53  ;;  %v2160_v35 = vrot.slane %v7559_v27, 1  ;;  %v7460_v53 = vld [vmem:[#allocation2 + $0x10] sm:$0xff]   ;;  %v7477_v27 = vld [vmem:[#allocation2 + $0x58] sm:$0xff]  }
 0x2c8   : > { %6680 = vmatprep.subr.bf16.mxu1 %v7458_v54 }
 0x2c9   : > { %6533 = vmatpush3.bf16.msra.mxu0 %v7556_v13  ;;  %v2161_v47 = vsel %vm2140_vm1, %v2158_v17, %v2160_v35  ;;  %v2163_v52 = vsel %vm2140_vm1, %v2160_v35, %v2162_v7  ;;  %v7470_v13 = vld [vmem:[#allocation2 + $0x30] sm:$0xff]   ;;  %v7489_v35 = vld [vmem:[#allocation11 + $0x1f8] sm:$0xff]   ;;  %v7479_v7 = vld [vmem:[#allocation2 + $0x48] sm:$0xff]  }
 0x2ca   : > { %6534 = vmatprep.subr.bf16.mxu0 %v7558_v37  ;;  %v7483_v17 = vld [vmem:[#allocation11 + $0x1e8] sm:$0xff]  }
 0x2cb   : > { %6503 = vmatmul.mubr.bf16.gmra.mrb[52].mxu0 %v2157_v50  ;;  %6681 = vmatpush3.bf16.msra.mxu1 %v7458_v54  ;;  %v7468_v54 = vld [vmem:[#allocation2 + $0x40] sm:$0xff]   ;;  %v7486_v50 = vld [vmem:[#allocation11 + $0x1f0] sm:$0xff]  }
 0x2cc   : > { %6506 = vmatprep.mubr.bf16.mxu0 %v2159_v39  ;;  %6714 = vmatprep.subr.bf16.mxu1 %v7461_v21  ;;  %v7475_v39 = vld [vmem:[#allocation2 + $0x40] sm:$0xff]  }
 0x2cd   : > { %6535 = vmatpush3.bf16.msra.mxu0 %v7558_v37  ;;  %v7474_v37 = vld [vmem:[#allocation2 + $0x38] sm:$0xff]  }
 0x2ce   : > { %6651 = vmatmul.mubr.bf16.gmra.mrb[0].mxu1 %v8751_v61  ;;  %6536 = vmatprep.subr.bf16.mxu0 %v7560_v42  ;;  %v7563_v61 = vld [vmem:[#allocation2 + $0x68] sm:$0xff]  }
 0x2cf   : > { %6654 = vmatprep.mubr.bf16.mxu1 %v8755_v45  ;;  %v2166_v31 = vrot.slane %v7563_v61, 1  ;;  %v7485_v61 = vld [vmem:[#allocation2 + $0x80] sm:$0xff]  }
 0x2d1   : > { %6537 = vmatpush3.bf16.msra.mxu0 %v7560_v42  ;;  %v2167_v45 = vsel %vm2140_vm1, %v2164_v8, %v2166_v31  ;;  %v2169_v41 = vsel %vm2140_vm1, %v2166_v31, %v2168_v32  ;;  %v7478_v42 = vld [vmem:[#allocation2 + $0x60] sm:$0xff]   ;;  %v7484_v8 = vld [vmem:[#allocation2 + $0x78] sm:$0xff]   ;;  %v5841_v31 = vcombine.low %v4036_v46, %v8812_v33  ;;  %v4189_v33 = vshrl.u32 %v8820_v1, 16 }
 0x2d2   : > { %v4233_v46 = vshll.u32 %v8841_v5, 16 }
 0x2d3   : > { %6507 = vmatmul.mubr.bf16.gmra.mrb[56].mxu0 %v2161_v47  ;;  %v7481_v47 = vld [vmem:[#allocation2 + $0x68] sm:$0xff]  }
 0x2d4   : > { %6510 = vmatprep.mubr.bf16.mxu0 %v2163_v52  ;;  %v7482_v52 = vld [vmem:[#allocation2 + $0x70] sm:$0xff]  }
 0x2d6   : > { %6655 = vmatmul.mubr.bf16.gmra.mrb[4].mxu1 %v8763_v20  ;;  %v2170_v20 = vrot.slane %v8651_v6, 1  ;;  %v7463_v6 = vld [vmem:[#allocation2 + $0x30] sm:$0xff]  }
 0x2d7   : > { %6658 = vmatprep.mubr.bf16.mxu1 %v8766_v18 }
 0x2d8   : > { %v2171_v18 = vsel %vm2140_vm1, %v2168_v32, %v2170_v20  ;;  %v7488_v32 = vld [vmem:[#allocation2 + $0x90] sm:$0xff]  }
 0x2db   : > { %6511 = vmatmul.mubr.bf16.gmra.mrb[60].mxu0 %v2165_v29  ;;  %v4172_v29 = vshll.u32 %v5841_v31, 16 }
 0x2dc   : > { %6514 = vmatprep.mubr.bf16.mxu0 %v2167_v45  ;;  %v7487_v45 = vld [vmem:[#allocation2 + $0x88] sm:$0xff]  }
 0x2de   : > { %6659 = vmatmul.mubr.bf16.gmra.mrb[8].mxu1 %v8773_v25  ;;  %v2173_v25 = vsel %vm2140_vm1, %v2170_v20, %v2172_v2  ;;  %v4174_v20 = vrot.slane %v4172_v29, 1  ;;  %v4185_v2 = vshll.u32 %v8820_v1, 16  ;;  %v4205_v1 = vshrl.u32 %v8829_v58, 16 }
 0x2df   : > { %6662 = vmatprep.mubr.bf16.mxu1 %v8777_v38  ;;  %v7466_v38 = vld [vmem:[#allocation11 + $0x1c8] sm:$0xff]  }
 0x2e3   : > { %6515 = vmatmul.mubr.bf16.gmra.mrb[64].mxu0 %v2169_v41  ;;  %v4170_v41 = vshrl.u32 %v5841_v31, 16  ;;  %v7508_v31 = vld [vmem:[#allocation11 + $0x228] sm:$0xff]  }
 0x2e4   : > { %6518 = vmatprep.mubr.bf16.mxu0 %v2171_v18  ;;  %v4177_v18 = vshll.u32 %v8817_v34, 16 }
 0x2e6   : > { %6663 = vmatmul.mubr.bf16.gmra.mrb[12].mxu1 %v8783_v14  ;;  %v7476_v14 = vld [vmem:[#allocation11 + $0x1d8] sm:$0xff]  }
 0x2e7   : > { %6682 = vmatprep.mubr.bf16.mxu1 %v7459_v19  ;;  %v4175_v19 = vor.u32 %v4174_v20, %v4170_v41  ;;  %v7511_v20 = vld [vmem:[#allocation11 + $0x230] sm:$0xff]   ;;  %v4229_v41 = vshrl.u32 %v8837_v51, 16 }
 0x2eb   : > { %6519 = vmatmul.mubr.bf16.gmra.mrb[68].mxu0 %v2173_v25  ;;  %v7490_v25 = vld [vmem:[#allocation2 + $0x98] sm:$0xff]  }
 0x2ec   : > { %6538 = vmatprep.mubr.bf16.mxu0 %v7460_v53  ;;  %v4179_v53 = vrot.slane %v4177_v18, 1 }
 0x2ee   : > { %6683 = vmatmul.mubr.bf16.vlgmr.msra.gmra.mrb[16].mxu1 %v7462_v4  ;;  %v4180_v4 = vsel %vm1536_vm0, %v4175_v19, %v4179_v53  ;;  %v4249_v19 = vshll.u32 %v8845_v11, 16 }
 0x2ef   : > { %6715 = vmatpush3.bf16.msra.mxu1 %v7461_v21  ;;  %6686 = vmatprep.mubr.bf16.mxu1 %v7463_v6  ;;  %v7473_v21 = vld [vmem:[#allocation2 + $0x50] sm:$0xff]   ;;  %v4193_v6 = vshll.u32 %v8823_v3, 16 }
 0x2f0   : > { %6716 = vmatprep.subr.bf16.mxu1 %v7466_v38 }
 0x2f3   : > { %6539 = vmatmul.mubr.bf16.vlgmr.msra.gmra.mrb[40].mxu0 %v7464_v56  ;;  %6717 = vmatpush3.bf16.msra.mxu1 %v7466_v38  ;;  %v4187_v38 = vrot.slane %v4185_v2, 1 }
 0x2f4   : > { %6542 = vmatprep.mubr.bf16.mxu0 %v7465_v23  ;;  %6718 = vmatprep.subr.bf16.mxu1 %v7471_v15  ;;  %v4201_v23 = vshll.u32 %v8829_v58, 16  ;;  %v4221_v58 = vshrl.u32 %v8835_v9, 16 }
 0x2f5   : > { %v4191_v56 = vor.u32 %v4189_v33, %v4187_v38  ;;  %v4253_v33 = vshrl.u32 %v8845_v11, 16  ;;  %v4269_v11 = vshrl.u32 %v8851_v60, 16 }
 0x2f6   : > { %6687 = vmatmul.mubr.bf16.gmra.mrb[20].mxu1 %v7467_v40 }
 0x2f7   : > { %6690 = vmatprep.mubr.bf16.mxu1 %v7468_v54  ;;  %6719 = vmatpush3.bf16.msra.mxu1 %v7471_v15  ;;  %v4181_v15 = vshrl.u32 %v8817_v34, 16  ;;  %v7496_v54 = vld [vmem:[#allocation11 + $0x208] sm:$0xff]   ;;  %v7499_v34 = vld [vmem:[#allocation11 + $0x210] sm:$0xff]  }
 0x2f8   : > { %6720 = vmatprep.subr.bf16.mxu1 %v7476_v14 }
 0x2f9   : > { %v4183_v40 = vor.u32 %v4181_v15, %v4179_v53  ;;  %v7514_v53 = vld [vmem:[#allocation11 + $0x238] sm:$0xff]  }
 0x2fb   : > { %6543 = vmatmul.mubr.bf16.gmra.mrb[44].mxu0 %v7469_v48  ;;  %6721 = vmatpush3.bf16.msra.mxu1 %v7476_v14  ;;  %v4195_v14 = vrot.slane %v4193_v6, 1  ;;  %v4245_v6 = vshrl.u32 %v8843_v22, 16 }
 0x2fc   : > { %6546 = vmatprep.mubr.bf16.mxu0 %v7470_v13  ;;  %6722 = vmatprep.subr.bf16.mxu1 %v7480_v59  ;;  %v4203_v13 = vrot.slane %v4201_v23, 1 }
 0x2fd   : > { %v4196_v48 = vsel %vm1536_vm0, %v4191_v56, %v4195_v14  ;;  %v4265_v56 = vshll.u32 %v8851_v60, 16  ;;  %v4289_v60 = vshll.u32 %v8871_v36, 16 }
 0x2fe   : > { %6691 = vmatmul.mubr.bf16.gmra.mrb[24].mxu1 %v7472_v12  ;;  %v4209_v12 = vshll.u32 %v8832_v43, 16 }
 0x2ff   : > { %6694 = vmatprep.mubr.bf16.mxu1 %v7473_v21  ;;  %6723 = vmatpush3.bf16.msra.mxu1 %v7480_v59  ;;  %v4188_v59 = vsel %vm1536_vm0, %v4183_v40, %v4187_v38  ;;  %v4207_v21 = vor.u32 %v4205_v1, %v4203_v13  ;;  %v4281_v1 = vshll.u32 %v8869_v49, 16 }
 0x300   : > { %6724 = vmatprep.subr.bf16.mxu1 %v7483_v17 }
 0x303   : > { %6547 = vmatmul.mubr.bf16.gmra.mrb[48].mxu0 %v7474_v37  ;;  %6725 = vmatpush3.bf16.msra.mxu1 %v7483_v17  ;;  %v4197_v17 = vshrl.u32 %v8823_v3, 16  ;;  %v4225_v3 = vshll.u32 %v8837_v51, 16  ;;  %v4257_v51 = vshll.u32 %v8849_v28, 16 }
 0x304   : > { %6550 = vmatprep.mubr.bf16.mxu0 %v7475_v39  ;;  %6726 = vmatprep.subr.bf16.mxu1 %v7486_v50  ;;  %v4211_v39 = vrot.slane %v4209_v12, 1 }
 0x305   : > { %v4199_v37 = vor.u32 %v4197_v17, %v4195_v14  ;;  %v4259_v40 = vrot.slane %v4257_v51, 1 }
 0x306   : > { %6695 = vmatmul.mubr.bf16.gmra.mrb[28].mxu1 %v7477_v27  ;;  %v7502_v27 = vld [vmem:[#allocation11 + $0x218] sm:$0xff]  }
 0x307   : > { %6698 = vmatprep.mubr.bf16.mxu1 %v7478_v42  ;;  %6727 = vmatpush3.bf16.msra.mxu1 %v7486_v50  ;;  %v4217_v50 = vshll.u32 %v8835_v9, 16  ;;  %v4212_v42 = vsel %vm1536_vm0, %v4207_v21, %v4211_v39  ;;  %v4235_v9 = vrot.slane %v4233_v46, 1  ;;  %v7519_v46 = vld [vmem:[#allocation14 + $0x10] sm:$0xff]  }
 0x308   : > { %6728 = vmatprep.subr.bf16.mxu1 %v7489_v35 }
 0x30b   : > { %6551 = vmatmul.mubr.bf16.gmra.mrb[52].mxu0 %v7479_v7  ;;  %6729 = vmatpush3.bf16.msra.mxu1 %v7489_v35  ;;  %v4204_v35 = vsel %vm1536_vm0, %v4199_v37, %v4203_v13  ;;  %v7505_v7 = vld [vmem:[#allocation11 + $0x220] sm:$0xff]   ;;  %v4261_v13 = vshrl.u32 %v8849_v28, 16  ;;  %v4285_v37 = vshrl.u32 %v8869_v49, 16 }
 0x30c   : > { %6762 = vmatprep.subr.bf16.mxu1 %v7493_v10  ;;  %v7517_v49 = vld [vmem:[#allocation14] sm:$0xff]  }
 0x30d   : > { %v4263_v12 = vor.u32 %v4261_v13, %v4259_v40  ;;  %6810 = vmatprep.subr.bf16.mxu0 %v7517_v49 }
 0x30e   : > { %6699 = vmatmul.mubr.bf16.gmra.mrb[0].mxu1 %v7481_v47  ;;  %v4213_v47 = vshrl.u32 %v8832_v43, 16  ;;  %v4241_v43 = vshll.u32 %v8843_v22, 16  ;;  %6811 = vmatpush3.bf16.msra.mxu0 %v7517_v49 }
 0x30f   : > { %6702 = vmatprep.mubr.bf16.mxu1 %v7482_v52 }
 0x316   : > { %6703 = vmatmul.mubr.bf16.gmra.mrb[4].mxu1 %v7484_v8  ;;  %v4215_v8 = vor.u32 %v4213_v47, %v4211_v39  ;;  %v4277_v39 = vshrl.u32 %v8858_v44, 16 }
 0x317   : > { %6706 = vmatprep.mubr.bf16.mxu1 %v7485_v61  ;;  %v4227_v61 = vrot.slane %v4225_v3, 1  ;;  %v4293_v3 = vshrl.u32 %v8871_v36, 16  ;;  %v7521_v36 = vld [vmem:[#allocation14 + $0x20] sm:$0xff]  }
 0x319   : > { %v4231_v2 = vor.u32 %v4229_v41, %v4227_v61 }
 0x31e   : > { %6707 = vmatmul.mubr.bf16.gmra.mrb[8].mxu1 %v7487_v45 }
 0x31f   : > { %6710 = vmatprep.mubr.bf16.mxu1 %v7488_v32  ;;  %v4237_v32 = vshrl.u32 %v8841_v5, 16  ;;  %v4251_v5 = vrot.slane %v4249_v19, 1 }
 0x321   : > { %v4239_v18 = vor.u32 %v4237_v32, %v4235_v9  ;;  %v4255_v15 = vor.u32 %v4253_v33, %v4251_v5  ;;  %v7522_v33 = vld [vmem:[#allocation14 + $0x28] sm:$0xff]  }
 0x326   : > { %6711 = vmatmul.mubr.bf16.gmra.mrb[12].mxu1 %v7490_v25  ;;  %v4243_v25 = vrot.slane %v4241_v43, 1 }
 0x327   : > { %6730 = vmatprep.mubr.bf16.mxu1 %v4180_v4  ;;  %v4236_v4 = vsel %vm1536_vm0, %v4231_v2, %v4235_v9 }
 0x328   : > { %v4244_v38 = vsel %vm1536_vm0, %v4239_v18, %v4243_v25  ;;  %v4247_v23 = vor.u32 %v4245_v6, %v4243_v25 }
 0x32a   : > { %v4252_v14 = vsel %vm1536_vm0, %v4247_v23, %v4251_v5 }
 0x32e   : > { %6731 = vmatmul.mubr.bf16.vlgmr.msra.gmra.mrb[16].mxu1 %v4188_v59  ;;  %v4267_v59 = vrot.slane %v4265_v56, 1 }
 0x32f   : > { %6763 = vmatpush3.bf16.msra.mxu1 %v7493_v10  ;;  %6734 = vmatprep.mubr.bf16.mxu1 %v4196_v48  ;;  %v4219_v10 = vrot.slane %v4217_v50, 1  ;;  %v4273_v48 = vshll.u32 %v8858_v44, 16  ;;  %v4283_v50 = vrot.slane %v4281_v1, 1 }
 0x330   : > { %6764 = vmatprep.subr.bf16.mxu1 %v7496_v54  ;;  %v4271_v22 = vor.u32 %v4269_v11, %v4267_v59  ;;  %v4268_v17 = vsel %vm1536_vm0, %v4263_v12, %v4267_v59 }
 0x331   : > { %v4223_v52 = vor.u32 %v4221_v58, %v4219_v10  ;;  %v4220_v29 = vsel %vm1536_vm0, %v4215_v8, %v4219_v10  ;;  %v4297_v10 = vshll.u32 %v8879_v16, 16  ;;  %v7520_v16 = vld [vmem:[#allocation14 + $0x18] sm:$0xff]  }
 0x332   : > { %v9563_v8 = vld [vmem:[#allocation32_spill] sm:$0xff] }
 0x333   : > { %6765 = vmatpush3.bf16.msra.mxu1 %v7496_v54  ;;  %v4228_v45 = vsel %vm1536_vm0, %v4223_v52, %v4227_v61  ;;  %v4260_v54 = vsel %vm1536_vm0, %v4255_v15, %v4259_v40  ;;  %v4299_v47 = vrot.slane %v4297_v10, 1  ;;  %v7518_v52 = vld [vmem:[#allocation14 + $0x8] sm:$0xff]   ;;  %v7523_v15 = vld [vmem:[#allocation14 + $0x30] sm:$0xff]   ;;  %v7524_v40 = vld [vmem:[#allocation14 + $0x38] sm:$0xff]  }
 0x334   : > { %6766 = vmatprep.subr.bf16.mxu1 %v7499_v34  ;;  %6812 = vmatprep.subr.bf16.mxu0 %v7518_v52  ;;  %v9564_v61 = vld [vmem:[#allocation33_spill] sm:$0xff] }
 0x335   : > { %6813 = vmatpush3.bf16.msra.mxu0 %v7518_v52 }
 0x336   : > { %6735 = vmatmul.mubr.bf16.gmra.mrb[20].mxu1 %v4204_v35  ;;  %v4291_v35 = vrot.slane %v4289_v60, 1  ;;  %6814 = vmatprep.subr.bf16.mxu0 %v7519_v46 }
 0x337   : > { %6738 = vmatprep.mubr.bf16.mxu1 %v4212_v42  ;;  %6767 = vmatpush3.bf16.msra.mxu1 %v7499_v34  ;;  %v4275_v34 = vrot.slane %v4273_v48, 1 }
 0x338   : > { %6768 = vmatprep.subr.bf16.mxu1 %v7502_v27 }
 0x339   : > { %v4276_v21 = vsel %vm1536_vm0, %v4271_v22, %v4275_v34  ;;  %v4279_v28 = vor.u32 %v4277_v39, %v4275_v34  ;;  %6815 = vmatpush3.bf16.msra.mxu0 %v7519_v46 }
 0x33a   : > { %6816 = vmatprep.subr.bf16.mxu0 %v7520_v16 }
 0x33b   : > { %6769 = vmatpush3.bf16.msra.mxu1 %v7502_v27  ;;  %v4287_v27 = vor.u32 %v4285_v37, %v4283_v50  ;;  %v4284_v42 = vsel %vm1536_vm0, %v4279_v28, %v4283_v50 }
 0x33c   : > { %6770 = vmatprep.subr.bf16.mxu1 %v7505_v7 }
 0x33d   : > { %v4292_v58 = vsel %vm1536_vm0, %v4287_v27, %v4291_v35  ;;  %6817 = vmatpush3.bf16.msra.mxu0 %v7520_v16 }
 0x33e   : > { %6739 = vmatmul.mubr.bf16.gmra.mrb[24].mxu1 %v4220_v29  ;;  %6818 = vmatprep.subr.bf16.mxu0 %v7521_v36  ;;  %v9567_v29 = vld [vmem:[#allocation36_spill] sm:$0xff] }
 0x33f   : > { %6742 = vmatprep.mubr.bf16.mxu1 %v4228_v45  ;;  %6771 = vmatpush3.bf16.msra.mxu1 %v7505_v7  ;;  %v4295_v7 = vor.u32 %v4293_v3, %v4291_v35 }
 0x340   : > { %6772 = vmatprep.subr.bf16.mxu1 %v7508_v31 }
 0x341   : > { %v4300_v44 = vsel %vm1536_vm0, %v4295_v7, %v4299_v47  ;;  %6819 = vmatpush3.bf16.msra.mxu0 %v7521_v36 }
 0x342   : > { %6820 = vmatprep.subr.bf16.mxu0 %v7522_v33 }
 0x343   : > { %6773 = vmatpush3.bf16.msra.mxu1 %v7508_v31  ;;  %v9565_v31 = vld [vmem:[#allocation34_spill] sm:$0xff] }
 0x344   : > { %6774 = vmatprep.subr.bf16.mxu1 %v7511_v20 }
 0x345   : > { %6821 = vmatpush3.bf16.msra.mxu0 %v7522_v33 }
 0x346   : > { %6743 = vmatmul.mubr.bf16.gmra.mrb[28].mxu1 %v4236_v4  ;;  %6822 = vmatprep.subr.bf16.mxu0 %v7523_v15 }
 0x347   : > { %6746 = vmatprep.mubr.bf16.mxu1 %v4244_v38  ;;  %6775 = vmatpush3.bf16.msra.mxu1 %v7511_v20 }
 0x348   : > { %6776 = vmatprep.subr.bf16.mxu1 %v7514_v53 }
 0x349   : > { %6823 = vmatpush3.bf16.msra.mxu0 %v7523_v15 }
 0x34a   : > { %6824 = vmatprep.subr.bf16.mxu0 %v7524_v40 }
 0x34b   : > { %6777 = vmatpush3.bf16.msra.mxu1 %v7514_v53 }
 0x34c   : > { %6874 = vmatprep.subr.bf16.mxu1 %v7517_v49 }
 0x34d   : > { %6825 = vmatpush3.bf16.msra.mxu0 %v7524_v40 }
 0x34e   : > { %6747 = vmatmul.mubr.bf16.gmra.mrb[0].mxu1 %v4252_v14 }
 0x34f   : > { %6750 = vmatprep.mubr.bf16.mxu1 %v4260_v54 }
 0x356   : > { %6751 = vmatmul.mubr.bf16.gmra.mrb[4].mxu1 %v4268_v17 }
 0x357   : > { %6754 = vmatprep.mubr.bf16.mxu1 %v4276_v21  ;;  %v9073_v21 = vld [vmem:[#allocation12] ss:$0 sm:$0xff] }
 0x35e   : > { %6755 = vmatmul.mubr.bf16.gmra.mrb[8].mxu1 %v4284_v42 }
 0x35f   : > { %6758 = vmatprep.mubr.bf16.mxu1 %v4292_v58 }
 0x366   : > { %6759 = vmatmul.mubr.bf16.gmra.mrb[12].mxu1 %v4300_v44 }
 0x367   : > { %6778 = vmatprep.mubr.bf16.mxu1 %v8861_v30  ;;  %v9560_v30 = vld [vmem:[#allocation29_spill] sm:$0xff] }
 0x36e   : > { %6779 = vmatmul.mubr.bf16.vlgmr.msra.gmra.mrb[16].mxu1 %v8854_v62  ;;  %v9561_v62 = vld [vmem:[#allocation30_spill] sm:$0xff] }
 0x36f   : > { %6782 = vmatprep.mubr.bf16.mxu1 %v8864_v57  ;;  %6882 = vmatpush3.bf16.msra.mxu1 %v7517_v49  ;;  %v9562_v57 = vld [vmem:[#allocation31_spill] sm:$0xff] }
 0x370   : > { %6875 = vmatprep.subr.bf16.mxu1 %v7518_v52 }
 0x373   : > { %6883 = vmatpush3.bf16.msra.mxu1 %v7518_v52 }
 0x374   : > { %6876 = vmatprep.subr.bf16.mxu1 %v7519_v46 }
 0x376   : > { %6783 = vmatmul.mubr.bf16.gmra.mrb[20].mxu1 %v8874_v26  ;;  %v9566_v26 = vld [vmem:[#allocation35_spill] sm:$0xff] }
 0x377   : > { %6786 = vmatprep.mubr.bf16.mxu1 %v9560_v30  ;;  %6884 = vmatpush3.bf16.msra.mxu1 %v7519_v46 }
 0x378   : > { %6877 = vmatprep.subr.bf16.mxu1 %v7520_v16 }
 0x37b   : > { %6885 = vmatpush3.bf16.msra.mxu1 %v7520_v16 }
 0x37c   : > { %6878 = vmatprep.subr.bf16.mxu1 %v7521_v36 }
 0x37e   : > { %6787 = vmatmul.mubr.bf16.gmra.mrb[24].mxu1 %v8888_v63 }
 0x37f   : > { %6790 = vmatprep.mubr.bf16.mxu1 %v9561_v62  ;;  %6886 = vmatpush3.bf16.msra.mxu1 %v7521_v36 }
 0x380   : > { %6879 = vmatprep.subr.bf16.mxu1 %v7522_v33 }
 0x383   : > { %6887 = vmatpush3.bf16.msra.mxu1 %v7522_v33 }
 0x384   : > { %6880 = vmatprep.subr.bf16.mxu1 %v7523_v15 }
 0x386   : > { %6791 = vmatmul.mubr.bf16.gmra.mrb[28].mxu1 %v9562_v57 }
 0x387   : > { %6794 = vmatprep.mubr.bf16.mxu1 %v9563_v8  ;;  %6888 = vmatpush3.bf16.msra.mxu1 %v7523_v15 }
 0x388   : > { %6881 = vmatprep.subr.bf16.mxu1 %v7524_v40 }
 0x38b   : > { %6889 = vmatpush3.bf16.msra.mxu1 %v7524_v40 }
 0x38e   : > { %6795 = vmatmul.mubr.bf16.gmra.mrb[0].mxu1 %v9564_v61 }
 0x38f   : > { %6798 = vmatprep.mubr.bf16.mxu1 %v9565_v31 }
 0x396   : > { %6799 = vmatmul.mubr.bf16.gmra.mrb[4].mxu1 %v9566_v26 }
 0x397   : > { %6802 = vmatprep.mubr.bf16.mxu1 %v9567_v29 }
 0x39e   : > { %6803 = vmatmul.mubr.bf16.gmra.mrb[8].mxu1 %v8919_v0 }
 0x39f   : > { %6806 = vmatprep.mubr.bf16.mxu1 %v8922_v24 }
 0x3a6   : > { %v9034_v63 = vpop.f32.mrb[56].mxu0  ;;  %6807 = vmatmul.mubr.bf16.gmra.mrb[12].mxu1 %v8925_v55 }
 0x3a7   : > { %v9037_v45 = vpop.f32.mrb[57].mxu0 }
 0x3a8   : > { %v9039_v9 = vpop.f32.mrb[58].mxu0 }
 0x3a9   : > { %v9041_v32 = vpop.f32.mrb[59].mxu0 }
 0x3ae   : > { %v9043_v43 = vpop.f32.mrb[60].mxu0 }
 0x3af   : > { %v9045_v20 = vpop.f32.mrb[61].mxu0 }
 0x3b0   : > { %v9047_v41 = vpop.f32.mrb[62].mxu0 }
 0x3b1   : > { %v9049_v18 = vpop.f32.mrb[63].mxu0 }
 0x3b6   : > { %v9051_v0 = vpop.f32.mrb[64].mxu0 }
 0x3b7   : > { %v9053_v24 = vpop.f32.mrb[65].mxu0 }
 0x3b8   : > { %v9055_v19 = vpop.f32.mrb[66].mxu0 }
 0x3b9   : > { %v9057_v55 = vpop.f32.mrb[67].mxu0 }
 0x3be   : > { %v9059_v2 = vpop.f32.mrb[68].mxu0 }
 0x3bf   : > { %v9061_v25 = vpop.f32.mrb[69].mxu0 }
 0x3c0   : > { %v9063_v53 = vpop.f32.mrb[70].mxu0 }
 0x3c1   : > { %v9065_v4 = vpop.f32.mrb[71].mxu0 }
 0x3c6   : > { %v6540_v38 = vpop.f32.mrb[40].mxu0 }
 0x3c7   : > { %v2658_v5 = vpop.f32.mrb[41].mxu0 }
 0x3c8   : > { %v6541_v51 = vpop.f32.mrb[42].mxu0 }
 0x3c9   : > { %v2661_v6 = vpop.f32.mrb[43].mxu0 }
 0x3ce   : > { %v6544_v56 = vpop.f32.mrb[44].mxu0 }
 0x3cf   : > { %v2674_v23 = vpop.f32.mrb[45].mxu0 }
 0x3d0   : > { %v6545_v14 = vpop.f32.mrb[46].mxu0 }
 0x3d1   : > { %v2677_v54 = vpop.f32.mrb[47].mxu0 }
 0x3d6   : > { %v6548_v59 = vpop.f32.mrb[48].mxu0 }
 0x3d7   : > { %v2690_v11 = vpop.f32.mrb[49].mxu0 }
 0x3d8   : > { %v6549_v48 = vpop.f32.mrb[50].mxu0 }
 0x3d9   : > { %v2693_v13 = vpop.f32.mrb[51].mxu0 }
 0x3de   : > { %v6552_v22 = vpop.f32.mrb[52].mxu0 }
 0x3df   : > { %v9067_v1 = vpop.f32.mrb[53].mxu0 }
 0x3e0   : > { %v9069_v12 = vpop.f32.mrb[54].mxu0 }
 0x3e1   : > { %v9071_v34 = vpop.f32.mrb[55].mxu0 }
 0x441   : > { %v6780_v17 = vpop.f32.mrb[16].mxu1 }
 0x442   : > { %v6890_v50 = vadd.f32 %v6780_v17, %v6540_v38  ;;  %v4710_v37 = vpop.f32.mrb[17].mxu1 }
 0x443   : > { %v6891_v60 = vadd.f32 %v4710_v37, %v2658_v5  ;;  %v6781_v39 = vpop.f32.mrb[18].mxu1 }
 0x444   : > { %v4878_v27 = vadd.f32 %v6890_v50, %v9073_v21  ;;  %v6892_v28 = vadd.f32 %v6781_v39, %v6541_v51  ;;  %v4713_v35 = vpop.f32.mrb[19].mxu1 }
 0x445   : > { %v4876_v42 = vadd.f32 %v6891_v60, %v9073_v21  ;;  %v6893_v10 = vadd.f32 %v4713_v35, %v2661_v6 }
 0x446   : > { %v4879_v58 = vadd.f32 %v6892_v28, %v9073_v21  ;;  %v4910_v7 = vmax.f32 %v4878_v27, 0.0 }
 0x447   : > { %v4877_v3 = vadd.f32 %v6893_v10, %v9073_v21  ;;  %v4908_v49 = vmax.f32 %v4876_v42, 0.0 }
 0x448   : > { %v4911_v47 = vmax.f32 %v4879_v58, 0.0 }
 0x449   : > { %v4909_v52 = vmax.f32 %v4877_v3, 0.0  ;;  %v6784_v44 = vpop.f32.mrb[20].mxu1 }
 0x44a   : > { %v4941_v46 = vpack.c.bf16 %v4911_v47, %v4910_v7  ;;  %v6894_v16 = vadd.f32 %v6784_v44, %v6544_v56  ;;  %v4726_v36 = vpop.f32.mrb[21].mxu1 }
 0x44b   : > { %v6895_v30 = vadd.f32 %v4726_v36, %v2674_v23  ;;  %v6785_v62 = vpop.f32.mrb[22].mxu1  ;;  %v4940_v57 = vpack.c.bf16 %v4909_v52, %v4908_v49 }
 0x44c   : > { %v4882_v8 = vadd.f32 %v6894_v16, %v9073_v21  ;;  %v6896_v61 = vadd.f32 %v6785_v62, %v6545_v14  ;;  %v4729_v31 = vpop.f32.mrb[23].mxu1 }
 0x44d   : > { %v4880_v26 = vadd.f32 %v6895_v30, %v9073_v21  ;;  %v6897_v29 = vadd.f32 %v4729_v31, %v2677_v54  ;;  %6826 = vmatprep.mubr.bf16.mxu0 %v4940_v57 }
 0x44e   : > { %v4883_v38 = vadd.f32 %v6896_v61, %v9073_v21  ;;  %6827 = vmatmul.mubr.bf16.vlgmr.msra.gmra.mrb[72].mxu0 %v4941_v46  ;;  %v4914_v33 = vmax.f32 %v4882_v8, 0.0 }
 0x44f   : > { %v4881_v5 = vadd.f32 %v6897_v29, %v9073_v21  ;;  %v4912_v6 = vmax.f32 %v4880_v26, 0.0 }
 0x450   : > { %v4915_v51 = vmax.f32 %v4883_v38, 0.0 }
 0x451   : > { %v4913_v15 = vmax.f32 %v4881_v5, 0.0  ;;  %v6788_v56 = vpop.f32.mrb[24].mxu1 }
 0x452   : > { %v6898_v23 = vadd.f32 %v6788_v56, %v6548_v59  ;;  %v4742_v40 = vpop.f32.mrb[25].mxu1  ;;  %v4943_v17 = vpack.c.bf16 %v4915_v51, %v4914_v33 }
 0x453   : > { %v6899_v50 = vadd.f32 %v4742_v40, %v2690_v11  ;;  %v6789_v14 = vpop.f32.mrb[26].mxu1  ;;  %v4942_v37 = vpack.c.bf16 %v4913_v15, %v4912_v6 }
 0x454   : > { %v4886_v60 = vadd.f32 %v6898_v23, %v9073_v21  ;;  %v6900_v54 = vadd.f32 %v6789_v14, %v6549_v48  ;;  %v4745_v39 = vpop.f32.mrb[27].mxu1 }
 0x455   : > { %v4884_v27 = vadd.f32 %v6899_v50, %v9073_v21  ;;  %v6901_v28 = vadd.f32 %v4745_v39, %v2693_v13  ;;  %6830 = vmatprep.mubr.bf16.mxu0 %v4942_v37 }
 0x456   : > { %v4887_v35 = vadd.f32 %v6900_v54, %v9073_v21  ;;  %6831 = vmatmul.mubr.bf16.gmra.mrb[76].mxu0 %v4943_v17  ;;  %v4918_v10 = vmax.f32 %v4886_v60, 0.0 }
 0x457   : > { %v4885_v42 = vadd.f32 %v6901_v28, %v9073_v21  ;;  %v4916_v58 = vmax.f32 %v4884_v27, 0.0 }
 0x458   : > { %v4919_v59 = vmax.f32 %v4887_v35, 0.0 }
 0x459   : > { %v4917_v3 = vmax.f32 %v4885_v42, 0.0  ;;  %v6792_v11 = vpop.f32.mrb[28].mxu1 }
 0x45a   : > { %v6902_v7 = vadd.f32 %v6792_v11, %v6552_v22  ;;  %v4758_v47 = vpop.f32.mrb[29].mxu1  ;;  %v4945_v49 = vpack.c.bf16 %v4919_v59, %v4918_v10 }
 0x45b   : > { %v6903_v48 = vadd.f32 %v4758_v47, %v9067_v1  ;;  %v6793_v52 = vpop.f32.mrb[30].mxu1  ;;  %v4944_v44 = vpack.c.bf16 %v4917_v3, %v4916_v58 }
 0x45c   : > { %v4890_v13 = vadd.f32 %v6902_v7, %v9073_v21  ;;  %v6904_v46 = vadd.f32 %v6793_v52, %v9069_v12  ;;  %v4761_v16 = vpop.f32.mrb[31].mxu1 }
 0x45d   : > { %v4888_v36 = vadd.f32 %v6903_v48, %v9073_v21  ;;  %v6905_v30 = vadd.f32 %v4761_v16, %v9071_v34  ;;  %6834 = vmatprep.mubr.bf16.mxu0 %v4944_v44 }
 0x45e   : > { %v4891_v62 = vadd.f32 %v6904_v46, %v9073_v21  ;;  %6835 = vmatmul.mubr.bf16.gmra.mrb[80].mxu0 %v4945_v49  ;;  %v4922_v57 = vmax.f32 %v4890_v13, 0.0 }
 0x45f   : > { %v4889_v22 = vadd.f32 %v6905_v30, %v9073_v21  ;;  %v4920_v1 = vmax.f32 %v4888_v36, 0.0 }
 0x460   : > { %v4923_v8 = vmax.f32 %v4891_v62, 0.0 }
 0x461   : > { %v4921_v61 = vmax.f32 %v4889_v22, 0.0  ;;  %v6796_v31 = vpop.f32.mrb[0].mxu1 }
 0x462   : > { %v6906_v26 = vadd.f32 %v6796_v31, %v9034_v63  ;;  %v4774_v29 = vpop.f32.mrb[1].mxu1  ;;  %v4947_v12 = vpack.c.bf16 %v4923_v8, %v4922_v57 }
 0x463   : > { %v6907_v38 = vadd.f32 %v4774_v29, %v9037_v45  ;;  %v6797_v5 = vpop.f32.mrb[2].mxu1  ;;  %v4946_v33 = vpack.c.bf16 %v4921_v61, %v4920_v1 }
 0x464   : > { %v4894_v34 = vadd.f32 %v6906_v26, %v9073_v21  ;;  %v6908_v51 = vadd.f32 %v6797_v5, %v9039_v9  ;;  %v4777_v6 = vpop.f32.mrb[3].mxu1 }
 0x465   : > { %v4892_v15 = vadd.f32 %v6907_v38, %v9073_v21  ;;  %v6909_v56 = vadd.f32 %v4777_v6, %v9041_v32  ;;  %6838 = vmatprep.mubr.bf16.mxu0 %v4946_v33 }
 0x466   : > { %v4895_v23 = vadd.f32 %v6908_v51, %v9073_v21  ;;  %6839 = vmatmul.mubr.bf16.gmra.mrb[84].mxu0 %v4947_v12  ;;  %v4926_v40 = vmax.f32 %v4894_v34, 0.0 }
 0x467   : > { %v4893_v63 = vadd.f32 %v6909_v56, %v9073_v21  ;;  %v4924_v45 = vmax.f32 %v4892_v15, 0.0 }
 0x468   : > { %v4927_v17 = vmax.f32 %v4895_v23, 0.0  ;;  %v7564_v23 = vld [vmem:[%s8370_s18 + $0x20] sm:$0xff]  }
 0x469   : > { %v4925_v50 = vmax.f32 %v4893_v63, 0.0  ;;  %v6800_v14 = vpop.f32.mrb[4].mxu1  ;;  %v5192_v63 = vunpack.c.l.bf16 %v7564_v23 }
 0x46a   : > { %v6910_v37 = vadd.f32 %v6800_v14, %v9043_v43  ;;  %v4790_v60 = vpop.f32.mrb[5].mxu1  ;;  %v4949_v9 = vpack.c.bf16 %v4927_v17, %v4926_v40  ;;  %v9129_v17 = vld [vmem:[%s8370_s18 + $0x10] sm:$0xff]  }
 0x46b   : > { %v6911_v54 = vadd.f32 %v4790_v60, %v9045_v20  ;;  %v6801_v39 = vpop.f32.mrb[6].mxu1  ;;  %v4948_v27 = vpack.c.bf16 %v4925_v50, %v4924_v45  ;;  %v5189_v45 = vunpack.c.h.bf16 %v9129_v17 }
 0x46c   : > { %v4898_v32 = vadd.f32 %v6910_v37, %v9073_v21  ;;  %v6912_v28 = vadd.f32 %v6801_v39, %v9047_v41  ;;  %v4793_v35 = vpop.f32.mrb[7].mxu1 }
 0x46d   : > { %v4896_v42 = vadd.f32 %v6911_v54, %v9073_v21  ;;  %v6913_v10 = vadd.f32 %v4793_v35, %v9049_v18  ;;  %6842 = vmatprep.mubr.bf16.mxu0 %v4948_v27  ;;  %v9136_v37 = vrot.slane %v5189_v45, 1  ;;  %v5193_v35 = vunpack.c.h.bf16 %v7564_v23 }
 0x46e   : > { %v4899_v59 = vadd.f32 %v6912_v28, %v9073_v21  ;;  %6843 = vmatmul.mubr.bf16.gmra.mrb[88].mxu0 %v4949_v9  ;;  %v4930_v58 = vmax.f32 %v4898_v32, 0.0  ;;  %v7567_v9 = vld [vmem:[%s8370_s18 + $0x30] sm:$0xff]   ;;  %v7568_v32 = vld [vmem:[%s8370_s18 + $0x28] sm:$0xff]  }
 0x46f   : > { %v4897_v43 = vadd.f32 %v6913_v10, %v9073_v21  ;;  %v4928_v20 = vmax.f32 %v4896_v42, 0.0  ;;  %v5196_v54 = vunpack.c.l.bf16 %v7567_v9  ;;  %v5195_v28 = vunpack.c.h.bf16 %v7568_v32 }
 0x470   : > { %v4931_v3 = vmax.f32 %v4899_v59, 0.0  ;;  %v5194_v42 = vunpack.c.l.bf16 %v7568_v32 }
 0x471   : > { %v4929_v11 = vmax.f32 %v4897_v43, 0.0  ;;  %v6804_v7 = vpop.f32.mrb[8].mxu1  ;;  %v9152_v10 = vrot.slane %v5196_v54, 1  ;;  %v9154_v59 = vrot.slane %v5195_v28, 1  ;;  %v9156_v43 = vrot.slane %v5193_v35, 1  ;;  %v7577_v54 = vld [vmem:[%s8370_s18 + $0x80] sm:$0xff]  }
 0x472   : > { %v6914_v47 = vadd.f32 %v6804_v7, %v9051_v0  ;;  %v4806_v49 = vpop.f32.mrb[9].mxu1  ;;  %v4951_v41 = vpack.c.bf16 %v4931_v3, %v4930_v58  ;;  %v9158_v58 = vrot.slane %v5194_v42, 1  ;;  %v7569_v3 = vld [vmem:[%s8370_s18 + $0x40] sm:$0xff]   ;;  %v5216_v32 = vunpack.c.l.bf16 %v7577_v54  ;;  %v7578_v42 = vld [vmem:[%s8370_s18 + $0x78] sm:$0xff]  }
 0x473   : > { %v6915_v48 = vadd.f32 %v4806_v49, %v9053_v24  ;;  %v6805_v52 = vpop.f32.mrb[10].mxu1  ;;  %v4950_v44 = vpack.c.bf16 %v4929_v11, %v4928_v20  ;;  %v5200_v20 = vunpack.c.l.bf16 %v7569_v3  ;;  %v9164_v11 = vsel %vm2140_vm1, %v9154_v59, %v9152_v10 }
 0x474   : > { %v4902_v18 = vadd.f32 %v6914_v47, %v9073_v21  ;;  %v6916_v13 = vadd.f32 %v6805_v52, %v9055_v19  ;;  %v4809_v46 = vpop.f32.mrb[11].mxu1  ;;  %v9169_v7 = vsel %vm2140_vm1, %v9156_v43, %v9158_v58  ;;  %v7570_v47 = vld [vmem:[%s8370_s18 + $0x38] sm:$0xff]  }
 0x475   : > { %v4900_v16 = vadd.f32 %v6915_v48, %v9073_v21  ;;  %v6917_v36 = vadd.f32 %v4809_v46, %v9057_v55  ;;  %6846 = vmatprep.mubr.bf16.mxu0 %v4950_v44  ;;  %v5199_v49 = vunpack.c.h.bf16 %v7570_v47  ;;  %v5198_v48 = vunpack.c.l.bf16 %v7570_v47  ;;  %v7571_v46 = vld [vmem:[%s8370_s18 + $0x50] sm:$0xff]  }
 0x476   : > { %v4903_v30 = vadd.f32 %v6916_v13, %v9073_v21  ;;  %6847 = vmatmul.mubr.bf16.gmra.mrb[92].mxu0 %v4951_v41  ;;  %v4934_v62 = vmax.f32 %v4902_v18, 0.0  ;;  %v5197_v41 = vunpack.c.h.bf16 %v7567_v9  ;;  %v9172_v52 = vrot.slane %v5200_v20, 1 }
 0x477   : > { %v4901_v0 = vadd.f32 %v6917_v36, %v9073_v21  ;;  %v4932_v24 = vmax.f32 %v4900_v16, 0.0  ;;  %v9174_v44 = vrot.slane %v5199_v49, 1  ;;  %v9178_v13 = vrot.slane %v5198_v48, 1 }
 0x478   : > { %v4935_v22 = vmax.f32 %v4903_v30, 0.0  ;;  %v9176_v18 = vrot.slane %v5197_v41, 1  ;;  %v5204_v16 = vunpack.c.l.bf16 %v7571_v46  ;;  %v5214_v47 = vunpack.c.l.bf16 %v7578_v42 }
 0x479   : > { %v4933_v57 = vmax.f32 %v4901_v0, 0.0  ;;  %v6808_v8 = vpop.f32.mrb[12].mxu1  ;;  %v9184_v36 = vsel %vm2140_vm1, %v9174_v44, %v9172_v52  ;;  %v7572_v0 = vld [vmem:[%s8370_s18 + $0x48] sm:$0xff]   ;;  %v9252_v49 = vrot.slane %v5216_v32, 1 }
 0x47a   : > { %v6918_v1 = vadd.f32 %v6808_v8, %v9059_v2  ;;  %v4822_v61 = vpop.f32.mrb[13].mxu1  ;;  %v4953_v19 = vpack.c.bf16 %v4935_v22, %v4934_v62  ;;  %v9189_v30 = vsel %vm2140_vm1, %v9176_v18, %v9178_v13  ;;  %v5203_v62 = vunpack.c.h.bf16 %v7572_v0 }
 0x47b   : > { %v6919_v31 = vadd.f32 %v4822_v61, %v9061_v25  ;;  %v6809_v26 = vpop.f32.mrb[14].mxu1  ;;  %v4952_v29 = vpack.c.bf16 %v4933_v57, %v4932_v24  ;;  %v5201_v22 = vunpack.c.h.bf16 %v7569_v3  ;;  %v5202_v24 = vunpack.c.l.bf16 %v7572_v0 }
 0x47c   : > { %v4906_v55 = vadd.f32 %v6918_v1, %v9073_v21  ;;  %v6920_v12 = vadd.f32 %v6809_v26, %v9063_v53  ;;  %v4825_v38 = vpop.f32.mrb[15].mxu1  ;;  %v9192_v57 = vrot.slane %v5204_v16, 1  ;;  %v9194_v8 = vrot.slane %v5203_v62, 1  ;;  %v7579_v16 = vld [vmem:[%s8370_s18 + $0x90] sm:$0xff]  }
 0x47d   : > { %v4904_v5 = vadd.f32 %v6919_v31, %v9073_v21  ;;  %v6921_v33 = vadd.f32 %v4825_v38, %v9065_v4  ;;  %6850 = vmatprep.mubr.bf16.mxu0 %v4952_v29  ;;  %v7565_v4 = vld [vmem:[%s8370_s18 + $0x18] sm:$0xff]   ;;  %v9196_v1 = vrot.slane %v5201_v22, 1  ;;  %v9198_v61 = vrot.slane %v5202_v24, 1  ;;  %v7580_v24 = vld [vmem:[%s8370_s18 + $0x88] sm:$0xff]  }
 0x47e   : > { %v4907_v2 = vadd.f32 %v6920_v12, %v9073_v21  ;;  %6851 = vmatmul.mubr.bf16.gmra.mrb[96].mxu0 %v4953_v19  ;;  %v4938_v34 = vmax.f32 %v4906_v55, 0.0  ;;  %v5191_v40 = vunpack.c.h.bf16 %v7565_v4  ;;  %v5190_v50 = vunpack.c.l.bf16 %v7565_v4  ;;  %v7573_v19 = vld [vmem:[%s8370_s18 + $0x60] sm:$0xff]   ;;  %v7574_v55 = vld [vmem:[%s8370_s18 + $0x58] sm:$0xff]  }
 0x47f   : > { %v4905_v25 = vadd.f32 %v6921_v33, %v9073_v21  ;;  %v4936_v6 = vmax.f32 %v4904_v5, 0.0  ;;  %v9132_v21 = vrot.slane %v5192_v63, 1  ;;  %v5208_v31 = vunpack.c.l.bf16 %v7573_v19 }
 0x480   : > { %v4939_v51 = vmax.f32 %v4907_v2, 0.0  ;;  %v9134_v14 = vrot.slane %v5191_v40, 1  ;;  %v9138_v60 = vrot.slane %v5190_v50, 1  ;;  %v9204_v26 = vsel %vm2140_vm1, %v9194_v8, %v9192_v57 }
 0x481   : > { %v4937_v15 = vmax.f32 %v4905_v25, 0.0  ;;  %v9209_v29 = vsel %vm2140_vm1, %v9196_v1, %v9198_v61  ;;  %v5207_v12 = vunpack.c.h.bf16 %v7574_v55  ;;  %v5205_v38 = vunpack.c.h.bf16 %v7571_v46 }
 0x482   : > { %v4955_v53 = vpack.c.bf16 %v4939_v51, %v4938_v34  ;;  %v9144_v39 = vsel %vm2140_vm1, %v9134_v14, %v9132_v21  ;;  %v9149_v27 = vsel %vm2140_vm1, %v9136_v37, %v9138_v60  ;;  %v5206_v5 = vunpack.c.l.bf16 %v7574_v55  ;;  %v7575_v51 = vld [vmem:[%s8370_s18 + $0x70] sm:$0xff]  }
 0x483   : > { %v4954_v56 = vpack.c.bf16 %v4937_v15, %v4936_v6  ;;  %v9212_v33 = vrot.slane %v5208_v31, 1  ;;  %v9214_v2 = vrot.slane %v5207_v12, 1  ;;  %v9216_v25 = vrot.slane %v5205_v38, 1 }
 0x484   : > { %v9218_v34 = vrot.slane %v5206_v5, 1  ;;  %v5212_v6 = vunpack.c.l.bf16 %v7575_v51  ;;  %v5209_v63 = vunpack.c.h.bf16 %v7573_v19  ;;  %v5215_v3 = vunpack.c.h.bf16 %v7578_v42 }
 0x485   : > { %6854 = vmatprep.mubr.bf16.mxu1 %v4954_v56  ;;  %v9224_v15 = vsel %vm2140_vm1, %v9214_v2, %v9212_v33  ;;  %v7576_v56 = vld [vmem:[%s8370_s18 + $0x68] sm:$0xff]   ;;  %v5213_v20 = vunpack.c.h.bf16 %v7575_v51  ;;  %v9258_v46 = vrot.slane %v5214_v47, 1  ;;  %v5220_v0 = vunpack.c.l.bf16 %v7579_v16  ;;  %s9570_s18 = sld [smem:[#allocation42_spill]] }
 0x486   : > { %6855 = vmatmul.mubr.bf16.vlgmr.msra.gmra.mrb[32].mxu1 %v4955_v53  ;;  %v9229_v53 = vsel %vm2140_vm1, %v9216_v25, %v9218_v34  ;;  %v5211_v23 = vunpack.c.h.bf16 %v7576_v56  ;;  %v5210_v4 = vunpack.c.l.bf16 %v7576_v56  ;;  %v9232_v40 = vrot.slane %v5212_v6, 1 }
 0x487   : > { %v9236_v50 = vrot.slane %v5209_v63, 1  ;;  %v9254_v41 = vrot.slane %v5215_v3, 1  ;;  %v9256_v48 = vrot.slane %v5213_v20, 1  ;;  %v5219_v19 = vunpack.c.h.bf16 %v7580_v24 }
 0x488   : > { %v9234_v45 = vrot.slane %v5211_v23, 1  ;;  %v9238_v9 = vrot.slane %v5210_v4, 1  ;;  %v5217_v31 = vunpack.c.h.bf16 %v7577_v54  ;;  %v5218_v55 = vunpack.c.l.bf16 %v7580_v24  ;;  %v9289_v4 = vld [vmem:[#allocation15] ss:$0 sm:$0xff] }
 0x489   : > { %v9264_v62 = vsel %vm2140_vm1, %v9254_v41, %v9252_v49  ;;  %v9269_v22 = vsel %vm2140_vm1, %v9256_v48, %v9258_v46  ;;  %v5318_v12 = vrot.slane %v5220_v0, 1  ;;  %v9272_v38 = vrot.slane %v5219_v19, 1 }
 0x48a   : > { %v9244_v28 = vsel %vm2140_vm1, %v9234_v45, %v9232_v40  ;;  %v9249_v35 = vsel %vm2140_vm1, %v9236_v50, %v9238_v9  ;;  %v9274_v5 = vrot.slane %v5217_v31, 1  ;;  %v9276_v51 = vrot.slane %v5218_v55, 1 }
 0x48b   : > { %v9280_v6 = vsel %vm2140_vm1, %v9272_v38, %v5318_v12  ;;  %v5188_v23 = vunpack.c.l.bf16 %v9129_v17  ;;  %v5261_v32 = vsel %vm2140_vm1, %v9138_v60, %v9134_v14  ;;  %s9428_s0 = scalar_lea.hbm %s9570_s18, %s5889_s19 }
 0x48c   : > { %v9285_v56 = vsel %vm2140_vm1, %v9274_v5, %v9276_v51 }
 0x48d   : > { %v5255_v63 = vrot.slane %v5188_v23, 1 }
 0x48f   : > { %v5257_v20 = vsel %vm2140_vm1, %v5255_v63, %v9136_v37 }
 0x521   : > { %v6828_v54 = vpop.f32.mrb[72].mxu0 }
 0x522   : > { %v5070_v42 = vadd.f32 %v6828_v54, %v9289_v4  ;;  %v5061_v3 = vpop.f32.mrb[73].mxu0  ;;  %v5269_v54 = vsel %vm2140_vm1, %v9158_v58, %v9154_v59 }
 0x523   : > { %v5062_v47 = vadd.f32 %v9289_v4, %v5061_v3  ;;  %v6829_v17 = vpop.f32.mrb[74].mxu0 }
 0x524   : > { %v5354_v16 = vadd.f32 %v5261_v32, %v5070_v42  ;;  %v5073_v0 = vadd.f32 %v6829_v17, %v9289_v4  ;;  %v5064_v24 = vpop.f32.mrb[75].mxu0  ;;  %v5265_v32 = vsel %vm2140_vm1, %v9132_v21, %v9156_v43 }
 0x525   : > { %v5352_v19 = vadd.f32 %v5257_v20, %v5062_v47  ;;  %v5065_v31 = vadd.f32 %v9289_v4, %v5064_v24 }
 0x526   : > { %v5386_v55 = vmax.f32 %v5354_v16, 0.0  ;;  %v5355_v14 = vadd.f32 %v9144_v39, %v5073_v0 }
 0x527   : > { %v5384_v60 = vmax.f32 %v5352_v19, 0.0  ;;  %v5353_v12 = vadd.f32 %v9149_v27, %v5065_v31 }
 0x528   : > { %5418 = vst [vmem:[%s9304_s4 + $0x10] sm:$0xff] %v5386_v55  ;;  %v5387_v37 = vmax.f32 %v5355_v14, 0.0  ;;  %v5277_v55 = vsel %vm2140_vm1, %v9178_v13, %v9174_v44 }
 0x529   : > { %5416 = vst [vmem:[%s9304_s4] sm:$0xff] %v5384_v60  ;;  %v5385_v23 = vmax.f32 %v5353_v12, 0.0  ;;  %v6832_v63 = vpop.f32.mrb[76].mxu0 }
 0x52a   : > { %5419 = vst [vmem:[%s9304_s4 + $0x18] sm:$0xff] %v5387_v37  ;;  %v5086_v39 = vadd.f32 %v6832_v63, %v9289_v4  ;;  %v5077_v27 = vpop.f32.mrb[77].mxu0 }
 0x52b   : > { %5417 = vst [vmem:[%s9304_s4 + $0x8] sm:$0xff] %v5385_v23  ;;  %v5078_v42 = vadd.f32 %v9289_v4, %v5077_v27  ;;  %v6833_v3 = vpop.f32.mrb[78].mxu0 }
 0x52c   : > { %v5358_v20 = vadd.f32 %v5269_v54, %v5086_v39  ;;  %v5089_v47 = vadd.f32 %v6833_v3, %v9289_v4  ;;  %v5080_v17 = vpop.f32.mrb[79].mxu0  ;;  %v5285_v3 = vsel %vm2140_vm1, %v9198_v61, %v9194_v8 }
 0x52d   : > { %v5356_v59 = vadd.f32 %v5265_v32, %v5078_v42  ;;  %v5081_v58 = vadd.f32 %v9289_v4, %v5080_v17 }
 0x52e   : > { %v5390_v16 = vmax.f32 %v5358_v20, 0.0  ;;  %v5359_v0 = vadd.f32 %v9164_v11, %v5089_v47  ;;  %v5273_v11 = vsel %vm2140_vm1, %v9152_v10, %v9176_v18 }
 0x52f   : > { %v5388_v24 = vmax.f32 %v5356_v59, 0.0  ;;  %v5357_v19 = vadd.f32 %v9169_v7, %v5081_v58 }
 0x530   : > { %5422 = vst [vmem:[%s9304_s4 + $0x30] sm:$0xff] %v5390_v16  ;;  %v5391_v21 = vmax.f32 %v5359_v0, 0.0 }
 0x531   : > { %5420 = vst [vmem:[%s9304_s4 + $0x20] sm:$0xff] %v5388_v24  ;;  %v5389_v43 = vmax.f32 %v5357_v19, 0.0  ;;  %v6836_v31 = vpop.f32.mrb[80].mxu0 }
 0x532   : > { %5423 = vst [vmem:[%s9304_s4 + $0x38] sm:$0xff] %v5391_v21  ;;  %v5102_v14 = vadd.f32 %v6836_v31, %v9289_v4  ;;  %v5093_v60 = vpop.f32.mrb[81].mxu0  ;;  %v5293_v31 = vsel %vm2140_vm1, %v9218_v34, %v9214_v2 }
 0x533   : > { %5421 = vst [vmem:[%s9304_s4 + $0x28] sm:$0xff] %v5389_v43  ;;  %v5094_v7 = vadd.f32 %v9289_v4, %v5093_v60  ;;  %v6837_v12 = vpop.f32.mrb[82].mxu0 }
 0x534   : > { %v5362_v37 = vadd.f32 %v5277_v55, %v5102_v14  ;;  %v5105_v23 = vadd.f32 %v6837_v12, %v9289_v4  ;;  %v5096_v63 = vpop.f32.mrb[83].mxu0 }
 0x535   : > { %v5360_v44 = vadd.f32 %v5273_v11, %v5094_v7  ;;  %v5097_v13 = vadd.f32 %v9289_v4, %v5096_v63 }
 0x536   : > { %v5394_v54 = vmax.f32 %v5362_v37, 0.0  ;;  %v5363_v39 = vadd.f32 %v9184_v36, %v5105_v23  ;;  %v5281_v36 = vsel %vm2140_vm1, %v9172_v52, %v9196_v1 }
 0x537   : > { %v5392_v27 = vmax.f32 %v5360_v44, 0.0  ;;  %v5361_v32 = vadd.f32 %v9189_v30, %v5097_v13 }
 0x538   : > { %5426 = vst [vmem:[%s9304_s4 + $0x50] sm:$0xff] %v5394_v54  ;;  %v5395_v10 = vmax.f32 %v5363_v39, 0.0  ;;  %v5301_v54 = vsel %vm2140_vm1, %v9238_v9, %v9234_v45 }
 0x539   : > { %5424 = vst [vmem:[%s9304_s4 + $0x40] sm:$0xff] %v5392_v27  ;;  %v5393_v18 = vmax.f32 %v5361_v32, 0.0  ;;  %v6840_v42 = vpop.f32.mrb[84].mxu0 }
 0x53a   : > { %5427 = vst [vmem:[%s9304_s4 + $0x58] sm:$0xff] %v5395_v10  ;;  %v5118_v20 = vadd.f32 %v6840_v42, %v9289_v4  ;;  %v5109_v47 = vpop.f32.mrb[85].mxu0 }
 0x53b   : > { %5425 = vst [vmem:[%s9304_s4 + $0x48] sm:$0xff] %v5393_v18  ;;  %v5110_v30 = vadd.f32 %v9289_v4, %v5109_v47  ;;  %v6841_v17 = vpop.f32.mrb[86].mxu0 }
 0x53c   : > { %v5366_v59 = vadd.f32 %v5285_v3, %v5118_v20  ;;  %v5121_v58 = vadd.f32 %v6841_v17, %v9289_v4  ;;  %v5112_v16 = vpop.f32.mrb[87].mxu0  ;;  %v5309_v17 = vsel %vm2140_vm1, %v9258_v46, %v9254_v41 }
 0x53d   : > { %v5364_v8 = vadd.f32 %v5281_v36, %v5110_v30  ;;  %v5113_v61 = vadd.f32 %v9289_v4, %v5112_v16 }
 0x53e   : > { %v5398_v0 = vmax.f32 %v5366_v59, 0.0  ;;  %v5367_v24 = vadd.f32 %v9204_v26, %v5121_v58  ;;  %v5289_v26 = vsel %vm2140_vm1, %v9192_v57, %v9216_v25 }
 0x53f   : > { %v5396_v19 = vmax.f32 %v5364_v8, 0.0  ;;  %v5365_v21 = vadd.f32 %v9209_v29, %v5113_v61 }
 0x540   : > { %5430 = vst [vmem:[%s9304_s4 + $0x70] sm:$0xff] %v5398_v0  ;;  %v5399_v52 = vmax.f32 %v5367_v24, 0.0 }
 0x541   : > { %5428 = vst [vmem:[%s9304_s4 + $0x60] sm:$0xff] %v5396_v19  ;;  %v5397_v1 = vmax.f32 %v5365_v21, 0.0  ;;  %v6844_v43 = vpop.f32.mrb[88].mxu0 }
 0x542   : > { %5431 = vst [vmem:[%s9304_s4 + $0x78] sm:$0xff] %v5399_v52  ;;  %v5134_v55 = vadd.f32 %v6844_v43, %v9289_v4  ;;  %v5125_v14 = vpop.f32.mrb[89].mxu0  ;;  %v5317_v43 = vsel %vm2140_vm1, %v9276_v51, %v9272_v38 }
 0x543   : > { %5429 = vst [vmem:[%s9304_s4 + $0x68] sm:$0xff] %v5397_v1  ;;  %v5126_v29 = vadd.f32 %v9289_v4, %v5125_v14  ;;  %v6845_v60 = vpop.f32.mrb[90].mxu0 }
 0x544   : > { %v5370_v11 = vadd.f32 %v5293_v31, %v5134_v55  ;;  %v5137_v7 = vadd.f32 %v6845_v60, %v9289_v4  ;;  %v5128_v12 = vpop.f32.mrb[91].mxu0 }
 0x545   : > { %v5368_v2 = vadd.f32 %v5289_v26, %v5126_v29  ;;  %v5129_v34 = vadd.f32 %v9289_v4, %v5128_v12 }
 0x546   : > { %v5402_v37 = vmax.f32 %v5370_v11, 0.0  ;;  %v5371_v23 = vadd.f32 %v9224_v15, %v5137_v7  ;;  %v5297_v15 = vsel %vm2140_vm1, %v9212_v33, %v9236_v50 }
 0x547   : > { %v5400_v63 = vmax.f32 %v5368_v2, 0.0  ;;  %v5369_v44 = vadd.f32 %v9229_v53, %v5129_v34 }
 0x548   : > { %5434 = vst [vmem:[%s9304_s4 + $0x90] sm:$0xff] %v5402_v37  ;;  %v5403_v57 = vmax.f32 %v5371_v23, 0.0 }
 0x549   : > { %5432 = vst [vmem:[%s9304_s4 + $0x80] sm:$0xff] %v5400_v63  ;;  %v5401_v25 = vmax.f32 %v5369_v44, 0.0  ;;  %v6848_v13 = vpop.f32.mrb[92].mxu0 }
 0x54a   : > { %5435 = vst [vmem:[%s9304_s4 + $0x98] sm:$0xff] %v5403_v57  ;;  %v5150_v39 = vadd.f32 %v6848_v13, %v9289_v4  ;;  %v5141_v27 = vpop.f32.mrb[93].mxu0 }
 0x54b   : > { %5433 = vst [vmem:[%s9304_s4 + $0x88] sm:$0xff] %v5401_v25  ;;  %v5142_v53 = vadd.f32 %v9289_v4, %v5141_v27  ;;  %v6849_v32 = vpop.f32.mrb[94].mxu0 }
 0x54c   : > { %v5374_v10 = vadd.f32 %v5301_v54, %v5150_v39  ;;  %v5153_v18 = vadd.f32 %v6849_v32, %v9289_v4  ;;  %v5144_v42 = vpop.f32.mrb[95].mxu0 }
 0x54d   : > { %v5372_v45 = vadd.f32 %v5297_v15, %v5142_v53  ;;  %v5145_v9 = vadd.f32 %v9289_v4, %v5144_v42 }
 0x54e   : > { %v5406_v3 = vmax.f32 %v5374_v10, 0.0  ;;  %v5375_v20 = vadd.f32 %v9244_v28, %v5153_v18  ;;  %v5305_v28 = vsel %vm2140_vm1, %v9232_v40, %v9256_v48 }
 0x54f   : > { %v5404_v47 = vmax.f32 %v5372_v45, 0.0  ;;  %v5373_v36 = vadd.f32 %v9249_v35, %v5145_v9 }
 0x550   : > { %5438 = vst [vmem:[%s9304_s4 + $0xb0] sm:$0xff] %v5406_v3  ;;  %v5407_v33 = vmax.f32 %v5375_v20, 0.0 }
 0x551   : > { %5436 = vst [vmem:[%s9304_s4 + $0xa0] sm:$0xff] %v5404_v47  ;;  %v5405_v50 = vmax.f32 %v5373_v36, 0.0  ;;  %v6852_v30 = vpop.f32.mrb[96].mxu0 }
 0x552   : > { %5439 = vst [vmem:[%s9304_s4 + $0xb8] sm:$0xff] %v5407_v33  ;;  %v5166_v59 = vadd.f32 %v6852_v30, %v9289_v4  ;;  %v5157_v58 = vpop.f32.mrb[97].mxu0 }
 0x553   : > { %5437 = vst [vmem:[%s9304_s4 + $0xa8] sm:$0xff] %v5405_v50  ;;  %v5158_v35 = vadd.f32 %v9289_v4, %v5157_v58  ;;  %v6853_v16 = vpop.f32.mrb[98].mxu0 }
 0x554   : > { %v5378_v8 = vadd.f32 %v5309_v17, %v5166_v59  ;;  %v5169_v61 = vadd.f32 %v6853_v16, %v9289_v4  ;;  %v5160_v41 = vpop.f32.mrb[99].mxu0 }
 0x555   : > { %v5376_v46 = vadd.f32 %v5305_v28, %v5158_v35  ;;  %v5161_v0 = vadd.f32 %v9289_v4, %v5160_v41 }
 0x556   : > { %v5410_v24 = vmax.f32 %v5378_v8, 0.0  ;;  %v5379_v19 = vadd.f32 %v9264_v62, %v5169_v61  ;;  %v5313_v62 = vsel %vm2140_vm1, %v9252_v49, %v9274_v5 }
 0x557   : > { %v5408_v21 = vmax.f32 %v5376_v46, 0.0  ;;  %v5377_v40 = vadd.f32 %v9269_v22, %v5161_v0 }
 0x558   : > { %5442 = vst [vmem:[%s9304_s4 + $0xd0] sm:$0xff] %v5410_v24  ;;  %v5411_v48 = vmax.f32 %v5379_v19, 0.0 }
 0x559   : > { %5440 = vst [vmem:[%s9304_s4 + $0xc0] sm:$0xff] %v5408_v21  ;;  %v5409_v52 = vmax.f32 %v5377_v40, 0.0  ;;  %v6856_v1 = vpop.f32.mrb[32].mxu1 }
 0x55a   : > { %5443 = vst [vmem:[%s9304_s4 + $0xd8] sm:$0xff] %v5411_v48  ;;  %v5182_v31 = vadd.f32 %v6856_v1, %v9289_v4  ;;  %v5173_v55 = vpop.f32.mrb[33].mxu1 }
 0x55b   : > { %5441 = vst [vmem:[%s9304_s4 + $0xc8] sm:$0xff] %v5409_v52  ;;  %v5174_v22 = vadd.f32 %v9289_v4, %v5173_v55  ;;  %v6857_v14 = vpop.f32.mrb[34].mxu1 }
 0x55c   : > { %v5382_v26 = vadd.f32 %v5317_v43, %v5182_v31  ;;  %v5185_v29 = vadd.f32 %v6857_v14, %v9289_v4  ;;  %v5176_v38 = vpop.f32.mrb[35].mxu1 }
 0x55d   : > { %v5380_v51 = vadd.f32 %v5313_v62, %v5174_v22  ;;  %v5177_v60 = vadd.f32 %v9289_v4, %v5176_v38 }
 0x55e   : > { %v5414_v11 = vmax.f32 %v5382_v26, 0.0  ;;  %v5383_v49 = vadd.f32 %v9280_v6, %v5185_v29 }
 0x55f   : > { %v5412_v5 = vmax.f32 %v5380_v51, 0.0  ;;  %v5381_v7 = vadd.f32 %v9285_v56, %v5177_v60 }
 0x560   : > { %5446 = vst [vmem:[%s9304_s4 + $0xf0] sm:$0xff] %v5414_v11  ;;  %v5415_v12 = vmax.f32 %v5383_v49, 0.0 }
 0x561   : > { %5444 = vst [vmem:[%s9304_s4 + $0xe0] sm:$0xff] %v5412_v5  ;;  %v5413_v2 = vmax.f32 %v5381_v7, 0.0 }
 0x562   : > { %5447 = vst [vmem:[%s9304_s4 + $0xf8] sm:$0xff] %v5415_v12 }
 0x563   : > { %5445 = vst [vmem:[%s9304_s4 + $0xe8] sm:$0xff] %v5413_v2 }
 0x564   : > { %7820 = shalt.err (!%p7817_p3)
}
 0x565   : > { %s7821_s26 = scalar_lea.hbm %s9428_s0, 4096  ;;  %s7825_s16 = scalar_lea.hbm %s9570_s18, 16384 }
 0x566   : > { %p7822_p13 = scmp.ne.s32.totalorder %s9428_s0, %s7821_s26  ;;  %p7826_p8 = scmp.lt.u32.totalorder %s9428_s0, %s9570_s18 }
 0x567   : > { %p7827_p12 = scmp.lt.u32.totalorder %s7825_s16, %s7821_s26  ;;  %p7829_p0 = scmp.lt.u32.totalorder %s7821_s26, %s9428_s0 }
 0x568   : > { %p7823_p4 = pnand %p7822_p13, %p9571_p1 }
 0x569   : > { %p7828_p10 = por %p7827_p12, %p7826_p8 }
 0x56a   : > { %p7824_p6 = pneg %p7823_p4 }
 0x56b   : > { %p7830_p5 = por %p7829_p0, %p7828_p10 }
 0x56d   : > { %p7831_p2 = pnand %p7830_p5, %p7824_p6 }
 0x56f   : > { %7834 = shalt.err (!%p7831_p2)
}
 0x570   : > { %s7961_s24 = smov 128   ;;  %s7962_s3 = smov 8  }
 0x571   : > { %7179 = dma.vmem_to_hbm [thread:$0]  (%p9571_p1), %s9422_s23, 4096, %s9428_s0, %s9434_s17, %s7961_s24, %s7961_s24, %s7962_s3  }
 0x572 PF: > { %s9572_s30 = sld [smem:[#allocation24_spill]]  ;;  %p7226_p9 = scmp.ge.s32.totalorder %s7945_s15, 2 }
 0x573   : > { %p9573_p7 = scmp.ne.s32.totalorder %s9543_s2, 0 }
 0x575   : > { %p7208_p11 = pnand %p7226_p9, %p9573_p7 }
 0x578   : > { %s5480_s1 = sand.u32 1, %s9572_s30  }
 0x579   : > { %s5481_s20 = scalar_lea.sflag [#allocation5], %s5480_s1 }
 0x57a   : > { %7900 = dma.done.wait (!%p7208_p11), %s5481_s20, 4096  }
 0x57b   : > { %7902 = vsyncadd (!%p7208_p11), %s5481_s20, 4294963200  ;;  %s28_s15 = sadd.s32 1, %s7945_s15   ;;  %s9574_s27 = sld [smem:[#allocation25_spill]] }
 0x57c   : > { %p25_p3 = scmp.ge.s32.totalorder %s28_s15, 6   ;;  %s9575_s28 = smov %s7913_s29 }
 0x57d   : > { %s9576_s29 = smov %s8293_s8  ;;  %s9577_s30 = smov %s7921_s9 }
 0x57e   : > { %s9578_s9 = smov %s7925_s10  ;;  %s9579_s10 = smov %s8290_s12 }
 0x57f   : > { %s9580_s11 = smov %s7937_s13  ;;  %s9581_s12 = smov %s7941_s14 }
 0x580   : > { %s9582_s13 = smov %s9585_s21  ;;  %s9583_s14 = smov %s9589_s22 }
 0x581   :  { %27 = sbr.rel (!%p25_p3) target bundleno = 20 (0x14), region = 135 }
 0x588   :  { %5486 = vsyncpa [#allocation4], 1 }
 0x589   :  { %5488 = vsyncpa [#allocation4 + $0x1], 1 }
 0x58a   :  { %5489 = vsyncpa [#allocation7], 1 }
 0x58b   :  { %5490 = vsyncpa [#allocation10], 1 }
 0x58c   :  { %5491 = vsyncpa [#allocation13], 1 }
 0x58d   :  { %5492 = vsyncpa [#allocation16], 1 }
 0x58e   :  { %5493 = vsyncpa [#allocation5], 1 }
 0x58f   :  { %5495 = vsyncpa [#allocation5 + $0x1], 1 }

</bundles_post_ra>
